<compile_context>
chip_gen: v7x
topology: tpu7x:2x2x1
jax: 0.10.0
libtpu: 0.0.40
codegen_flags: <defaults>
</compile_context>

<pallas_src>
import jax
import jax.numpy as jnp
from jax.experimental import pallas as pl
from jax.experimental.pallas import tpu as pltpu
import numpy as np

B, S, T, E, H = 2, 8, 8, 32, 32   # batch, src len, trg len, emb size, hidden size
F32 = jnp.float32


def decoder_kernel(trg2d_ref, enc_h_ref, enc_final_ref, mask_bias_ref,
                   wb_t_ref, bb_ref, wk_t_ref, whq_t_ref, we_col_ref,
                   wih_x_t_ref, wih_c_t_ref, bih_ref, bhh_ref,
                   wp_x_t_ref, wp_h_t_ref, wp_c_t_ref,
                   dec_ref, hid_out_ref, pre_ref, attn_ref):
    tb, e = trg2d_ref.shape                 # [T*B, E] (step-major rows)
    b, s, h2 = enc_h_ref.shape              # [B, S, 2H]
    h = h2 // 2
    t = tb // b

    enc_h = enc_h_ref[...]                  # [B, S, 2H]
    mask_bias = mask_bias_ref[...]          # [B, S, 1] additive (0 / -1e30)

    whq_t = whq_t_ref[...]                  # [H, 4H]  columns: [wq | whh_r | whh_z | whh_n]
    we_col = we_col_ref[...]                # [H, 1]
    wih_c_t = wih_c_t_ref[...]              # [2H, 3H]
    bhh = bhh_ref[...]                      # [1, 3H]
    wp_h_t = wp_h_t_ref[...]                # [H, H]
    wp_c_t = wp_c_t_ref[...]                # [2H, H]

    # ---------------- hoisted, loop-invariant work ----------------
    # bridge: init_hidden = tanh(Linear(encoder_final))
    hidden = jnp.tanh(jnp.dot(enc_final_ref[...], wb_t_ref[...],
                              preferred_element_type=F32) + bb_ref[...])          # [B, H]
    # proj_key = key_layer(encoder_hidden), kept 2-D / lane-major: [B*S, H]
    proj_key = jnp.dot(enc_h.reshape(b * s, h2), wk_t_ref[...],
                       preferred_element_type=F32)
    # trg-dependent halves, batched over all T steps at once (8x sublane fill)
    trg2d = trg2d_ref[...]                                                         # [T*B, E]
    gi_trg = jnp.dot(trg2d, wih_x_t_ref[...],
                     preferred_element_type=F32) + bih_ref[...]                    # [T*B, 3H]
    pre_trg = jnp.dot(trg2d, wp_x_t_ref[...], preferred_element_type=F32)          # [T*B, H]

    # ---------------- recurrent unroll (only `hidden` is carried) ----------------
    for i in range(t):
        # fused hidden-dependent matmul: query layer + GRU hh gates in one push
        hq = jnp.dot(hidden, whq_t, preferred_element_type=F32)                    # [B, 4H]
        q = hq[:, :h]                                                              # [B, H]
        gh = hq[:, h:] + bhh                                                       # [B, 3H]

        # --- Bahdanau attention (scores on MXU, softmax along sublanes) ---
        qk = jnp.broadcast_to(q[:, None, :], (b, s, h)).reshape(b * s, h)
        energy = jnp.tanh(qk + proj_key)                                           # [B*S, H]
        scores = jnp.dot(energy, we_col,
                         preferred_element_type=F32).reshape(b, s, 1)              # [B, S, 1]
        scores = scores + mask_bias
        m = jnp.max(scores, axis=1, keepdims=True)
        p = jnp.exp(scores - m)
        alphas = p * pl.reciprocal(jnp.sum(p, axis=1, keepdims=True), approx=True) # [B, S, 1]
        context = jnp.sum(alphas * enc_h, axis=1)                                  # [B, 2H]

        # --- GRU cell (PyTorch gate order r, z, n), no lane concats ---
        gi = gi_trg[i * b:(i + 1) * b] + jnp.dot(context, wih_c_t,
                                                 preferred_element_type=F32)       # [B, 3H]
        r = jax.nn.sigmoid(gi[:, :h] + gh[:, :h])
        z = jax.nn.sigmoid(gi[:, h:2 * h] + gh[:, h:2 * h])
        n = jnp.tanh(gi[:, 2 * h:] + r * gh[:, 2 * h:])
        hidden = (1.0 - z) * n + z * hidden                                        # [B, H]

        # --- pre-output projection (dropout p=0.0 -> identity), split weights ---
        pre_o = (pre_trg[i * b:(i + 1) * b]
                 + jnp.dot(hidden, wp_h_t, preferred_element_type=F32)
                 + jnp.dot(context, wp_c_t, preferred_element_type=F32))           # [B, H]

        # --- per-step stores (no list + stack epilogue) ---
        dec_ref[:, i * h:(i + 1) * h] = hidden
        pre_ref[:, i * h:(i + 1) * h] = pre_o
        attn_ref[:, :, i:i + 1] = alphas

    hid_out_ref[0] = hidden                                                        # [1, B, H]


def decoder_forward(trg_embed, encoder_hidden, encoder_final, src_mask, params):
    b, t, e = trg_embed.shape
    _, s, h2 = encoder_hidden.shape
    h = h2 // 2

    # ---- layout plumbing & weight prep, all at trace time (outside kernel) ----
    trg2d = jnp.transpose(trg_embed, (1, 0, 2)).reshape(t * b, e)   # step-major rows
    enc_final2d = encoder_final[0]                                  # [B, 2H]
    mask_bias = jnp.where(src_mask[:, 0, :] == 0.0,
                          jnp.float32(-1e30), jnp.float32(0.0))[:, :, None]  # [B, S, 1]

    wih, wp = params["wih"], params["wp"]
    wb_t = params["wb"].T                                           # [2H, H]
    wk_t = params["wk"].T                                           # [2H, H]
    whq_t = jnp.concatenate([params["wq"], params["whh"]], axis=0).T  # [H, 4H]
    we_col = params["we"].T                                         # [H, 1]
    wih_x_t = wih[:, :e].T                                          # [E, 3H]
    wih_c_t = wih[:, e:].T                                          # [2H, 3H]
    wp_x_t = wp[:, :e].T                                            # [E, H]
    wp_h_t = wp[:, e:e + h].T                                       # [H, H]
    wp_c_t = wp[:, e + h:].T                                        # [2H, H]

    args = (trg2d, encoder_hidden, enc_final2d, mask_bias,
            wb_t, params["bb"], wk_t, whq_t, we_col,
            wih_x_t, wih_c_t, params["bih"], params["bhh"],
            wp_x_t, wp_h_t, wp_c_t)

    vmem = pl.BlockSpec(memory_space=pltpu.MemorySpace.VMEM)
    out_shapes = (
        jax.ShapeDtypeStruct((b, t * h), F32),   # decoder_states (lane-dense slab)
        jax.ShapeDtypeStruct((1, b, h), F32),    # final hidden
        jax.ShapeDtypeStruct((b, t * h), F32),   # pre_output_vectors (lane-dense slab)
        jax.ShapeDtypeStruct((b, s, t), F32),    # attn history, sublane-major S
    )
    # TODO(synk): on v7x, add a batch grid axis with dimension_semantics=("parallel",)
    # to use both TensorCores once B is large; at B=2 single-core is correct & best.
    dec_flat, hid, pre_flat, attn_sbt = pl.pallas_call(
        decoder_kernel,
        out_shape=out_shapes,
        in_specs=[vmem] * len(args),
        out_specs=tuple([vmem] * len(out_shapes)),
    )(*args)

    dec = dec_flat.reshape(b, t, h)
    pre = pre_flat.reshape(b, t, h)
    attn = jnp.transpose(attn_sbt, (0, 2, 1))    # [B, T, S]
    return dec, hid, pre, attn


def decoder_reference(trg_embed, enc_h, enc_final, mask, p):
    """Pure-JAX reference mirroring the PyTorch forward."""
    hidden = jnp.tanh(enc_final[0] @ p["wb"].T + p["bb"])
    proj_key = jnp.einsum("bsk,hk->bsh", enc_h, p["wk"])
    mask2d = mask[:, 0, :]
    dec, pre, attn = [], [], []
    for i in range(T):
        prev = trg_embed[:, i, :]
        q = hidden @ p["wq"].T
        scores = jnp.sum(jnp.tanh(q[:, None, :] + proj_key) * p["we"][None, :, :], -1)
        scores = jnp.where(mask2d == 0.0, -1e30, scores)
        alphas = jax.nn.softmax(scores, axis=-1)
        context = jnp.einsum("bs,bsk->bk", alphas, enc_h)
        x = jnp.concatenate([prev, context], -1)
        gi = x @ p["wih"].T + p["bih"]
        gh = hidden @ p["whh"].T + p["bhh"]
        r = jax.nn.sigmoid(gi[:, :H] + gh[:, :H])
        z = jax.nn.sigmoid(gi[:, H:2 * H] + gh[:, H:2 * H])
        n = jnp.tanh(gi[:, 2 * H:] + r * gh[:, 2 * H:])
        hidden = (1.0 - z) * n + z * hidden
        pre.append(jnp.concatenate([prev, hidden, context], -1) @ p["wp"].T)
        dec.append(hidden)
        attn.append(alphas)
    return (jnp.stack(dec, 1), hidden[None], jnp.stack(pre, 1), jnp.stack(attn, 1))


if __name__ == "__main__":
    key = jax.random.PRNGKey(0)
    ks = jax.random.split(key, 16)

    def unif(k, shape, fan_in):
        lim = 1.0 / np.sqrt(fan_in)
        return jax.random.uniform(k, shape, F32, -lim, lim)

    params = {
        "wb":  unif(ks[0], (H, 2 * H), 2 * H),          # bridge weight
        "bb":  unif(ks[1], (1, H), 2 * H),              # bridge bias
        "wk":  unif(ks[2], (H, 2 * H), 2 * H),          # attention key_layer
        "wq":  unif(ks[3], (H, H), H),                  # attention query_layer
        "we":  unif(ks[4], (1, H), H),                  # attention energy_layer
        "wih": unif(ks[5], (3 * H, E + 2 * H), H),      # GRU weight_ih_l0
        "whh": unif(ks[6], (3 * H, H), H),              # GRU weight_hh_l0
        "bih": unif(ks[7], (1, 3 * H), H),              # GRU bias_ih_l0
        "bhh": unif(ks[8], (1, 3 * H), H),              # GRU bias_hh_l0
        "wp":  unif(ks[9], (H, E + 3 * H), E + 3 * H),  # pre_output_layer (no bias)
    }

    trg_embed = jax.random.normal(ks[10], (B, T, E), F32) * 0.5
    encoder_hidden = jax.random.normal(ks[11], (B, S, 2 * H), F32) * 0.5
    encoder_final = jax.random.normal(ks[12], (1, B, 2 * H), F32) * 0.5
    src_lens = jnp.array([S, S - 3], dtype=jnp.int32)
    src_mask = (jnp.arange(S)[None, :] < src_lens[:, None]).astype(F32).reshape(B, 1, S)

    outs = decoder_forward(trg_embed, encoder_hidden, encoder_final, src_mask, params)
    outs = jax.block_until_ready(outs)

    refs = decoder_reference(trg_embed, encoder_hidden, encoder_final, src_mask, params)
    # tolerance 2e-3 accommodates the approx (EUP) reciprocal in the softmax
    for o, r in zip(outs, refs):
        np.testing.assert_allclose(np.asarray(o), np.asarray(r), rtol=2e-3, atol=2e-3)

    print("KERNEL_OK")
</pallas_src>

<mosaic_0001>
module attributes {stable_mosaic.version = 11 : i64} {
  func.func @decoder_kernel(%arg0: memref<16x32xf32, #tpu.memory_space<vmem>>, %arg1: memref<2x8x64xf32, #tpu.memory_space<vmem>>, %arg2: memref<2x64xf32, #tpu.memory_space<vmem>>, %arg3: memref<2x8x1xf32, #tpu.memory_space<vmem>>, %arg4: memref<64x32xf32, #tpu.memory_space<vmem>>, %arg5: memref<1x32xf32, #tpu.memory_space<vmem>>, %arg6: memref<64x32xf32, #tpu.memory_space<vmem>>, %arg7: memref<32x128xf32, #tpu.memory_space<vmem>>, %arg8: memref<32x1xf32, #tpu.memory_space<vmem>>, %arg9: memref<32x96xf32, #tpu.memory_space<vmem>>, %arg10: memref<64x96xf32, #tpu.memory_space<vmem>>, %arg11: memref<1x96xf32, #tpu.memory_space<vmem>>, %arg12: memref<1x96xf32, #tpu.memory_space<vmem>>, %arg13: memref<32x32xf32, #tpu.memory_space<vmem>>, %arg14: memref<32x32xf32, #tpu.memory_space<vmem>>, %arg15: memref<64x32xf32, #tpu.memory_space<vmem>>, %arg16: memref<2x256xf32, #tpu.memory_space<vmem>>, %arg17: memref<1x2x32xf32, #tpu.memory_space<vmem>>, %arg18: memref<2x256xf32, #tpu.memory_space<vmem>>, %arg19: memref<2x8x8xf32, #tpu.memory_space<vmem>>) attributes {dimension_semantics = [], scalar_prefetch = 0 : i64, scratch_operands = 0 : i64, tpu.core_type = #tpu.core_type<tc>} {
    %c0 = arith.constant 0 : index
    %c0_0 = arith.constant 0 : index
    %c0_1 = arith.constant 0 : index
    %0 = vector.load %arg1[%c0, %c0_0, %c0_1] : memref<2x8x64xf32, #tpu.memory_space<vmem>>, vector<2x8x64xf32>
    %c0_2 = arith.constant 0 : index
    %c0_3 = arith.constant 0 : index
    %c0_4 = arith.constant 0 : index
    %1 = vector.load %arg3[%c0_2, %c0_3, %c0_4] : memref<2x8x1xf32, #tpu.memory_space<vmem>>, vector<2x8x1xf32>
    %c0_5 = arith.constant 0 : index
    %c0_6 = arith.constant 0 : index
    %2 = vector.load %arg7[%c0_5, %c0_6] : memref<32x128xf32, #tpu.memory_space<vmem>>, vector<32x128xf32>
    %c0_7 = arith.constant 0 : index
    %c0_8 = arith.constant 0 : index
    %3 = vector.load %arg8[%c0_7, %c0_8] : memref<32x1xf32, #tpu.memory_space<vmem>>, vector<32x1xf32>
    %c0_9 = arith.constant 0 : index
    %c0_10 = arith.constant 0 : index
    %4 = vector.load %arg10[%c0_9, %c0_10] : memref<64x96xf32, #tpu.memory_space<vmem>>, vector<64x96xf32>
    %c0_11 = arith.constant 0 : index
    %c0_12 = arith.constant 0 : index
    %5 = vector.load %arg12[%c0_11, %c0_12] : memref<1x96xf32, #tpu.memory_space<vmem>>, vector<1x96xf32>
    %c0_13 = arith.constant 0 : index
    %c0_14 = arith.constant 0 : index
    %6 = vector.load %arg14[%c0_13, %c0_14] : memref<32x32xf32, #tpu.memory_space<vmem>>, vector<32x32xf32>
    %c0_15 = arith.constant 0 : index
    %c0_16 = arith.constant 0 : index
    %7 = vector.load %arg15[%c0_15, %c0_16] : memref<64x32xf32, #tpu.memory_space<vmem>>, vector<64x32xf32>
    %c0_17 = arith.constant 0 : index
    %c0_18 = arith.constant 0 : index
    %8 = vector.load %arg2[%c0_17, %c0_18] : memref<2x64xf32, #tpu.memory_space<vmem>>, vector<2x64xf32>
    %c0_19 = arith.constant 0 : index
    %c0_20 = arith.constant 0 : index
    %9 = vector.load %arg4[%c0_19, %c0_20] : memref<64x32xf32, #tpu.memory_space<vmem>>, vector<64x32xf32>
    %cst = arith.constant dense<0.000000e+00> : vector<2x32xf32>
    %10 = tpu.matmul %8, %9, %cst {dimension_numbers = #tpu.dot_dimension_numbers<[1], [0], [0], [1], [0, 0, 1, 1], [], []>} : vector<2x64xf32>, vector<64x32xf32>, vector<2x32xf32> -> vector<2x32xf32>
    %c0_21 = arith.constant 0 : index
    %c0_22 = arith.constant 0 : index
    %11 = vector.load %arg5[%c0_21, %c0_22] : memref<1x32xf32, #tpu.memory_space<vmem>>, vector<1x32xf32>
    %12 = vector.broadcast %11 : vector<1x32xf32> to vector<2x32xf32>
    %13 = arith.addf %10, %12 : vector<2x32xf32>
    %14 = math.tanh %13 : vector<2x32xf32>
    %15 = vector.shape_cast %0 : vector<2x8x64xf32> to vector<16x64xf32>
    %c0_23 = arith.constant 0 : index
    %c0_24 = arith.constant 0 : index
    %16 = vector.load %arg6[%c0_23, %c0_24] : memref<64x32xf32, #tpu.memory_space<vmem>>, vector<64x32xf32>
    %cst_25 = arith.constant dense<0.000000e+00> : vector<16x32xf32>
    %17 = tpu.matmul %15, %16, %cst_25 {dimension_numbers = #tpu.dot_dimension_numbers<[1], [0], [0], [1], [0, 0, 1, 1], [], []>} : vector<16x64xf32>, vector<64x32xf32>, vector<16x32xf32> -> vector<16x32xf32>
    %c0_26 = arith.constant 0 : index
    %c0_27 = arith.constant 0 : index
    %18 = vector.load %arg0[%c0_26, %c0_27] : memref<16x32xf32, #tpu.memory_space<vmem>>, vector<16x32xf32>
    %c0_28 = arith.constant 0 : index
    %c0_29 = arith.constant 0 : index
    %19 = vector.load %arg9[%c0_28, %c0_29] : memref<32x96xf32, #tpu.memory_space<vmem>>, vector<32x96xf32>
    %cst_30 = arith.constant dense<0.000000e+00> : vector<16x96xf32>
    %20 = tpu.matmul %18, %19, %cst_30 {dimension_numbers = #tpu.dot_dimension_numbers<[1], [0], [0], [1], [0, 0, 1, 1], [], []>} : vector<16x32xf32>, vector<32x96xf32>, vector<16x96xf32> -> vector<16x96xf32>
    %c0_31 = arith.constant 0 : index
    %c0_32 = arith.constant 0 : index
    %21 = vector.load %arg11[%c0_31, %c0_32] : memref<1x96xf32, #tpu.memory_space<vmem>>, vector<1x96xf32>
    %22 = vector.broadcast %21 : vector<1x96xf32> to vector<16x96xf32>
    %23 = arith.addf %20, %22 : vector<16x96xf32>
    %c0_33 = arith.constant 0 : index
    %c0_34 = arith.constant 0 : index
    %24 = vector.load %arg13[%c0_33, %c0_34] : memref<32x32xf32, #tpu.memory_space<vmem>>, vector<32x32xf32>
    %cst_35 = arith.constant dense<0.000000e+00> : vector<16x32xf32>
    %25 = tpu.matmul %18, %24, %cst_35 {dimension_numbers = #tpu.dot_dimension_numbers<[1], [0], [0], [1], [0, 0, 1, 1], [], []>} : vector<16x32xf32>, vector<32x32xf32>, vector<16x32xf32> -> vector<16x32xf32>
    %cst_36 = arith.constant dense<0.000000e+00> : vector<2x128xf32>
    %26 = tpu.matmul %14, %2, %cst_36 {dimension_numbers = #tpu.dot_dimension_numbers<[1], [0], [0], [1], [0, 0, 1, 1], [], []>} : vector<2x32xf32>, vector<32x128xf32>, vector<2x128xf32> -> vector<2x128xf32>
    %27 = vector.extract_strided_slice %26 {offsets = [0, 0], sizes = [2, 32], strides = [1, 1]} : vector<2x128xf32> to vector<2x32xf32>
    %28 = vector.extract_strided_slice %26 {offsets = [0, 32], sizes = [2, 96], strides = [1, 1]} : vector<2x128xf32> to vector<2x96xf32>
    %29 = vector.broadcast %5 : vector<1x96xf32> to vector<2x96xf32>
    %30 = arith.addf %28, %29 : vector<2x96xf32>
    %31 = vector.shape_cast %27 : vector<2x32xf32> to vector<2x1x32xf32>
    %32 = vector.shape_cast %31 : vector<2x1x32xf32> to vector<2x1x32xf32>
    %33 = vector.broadcast %32 : vector<2x1x32xf32> to vector<2x8x32xf32>
    %34 = vector.shape_cast %33 : vector<2x8x32xf32> to vector<16x32xf32>
    %35 = arith.addf %34, %17 : vector<16x32xf32>
    %36 = math.tanh %35 : vector<16x32xf32>
    %cst_37 = arith.constant dense<0.000000e+00> : vector<16x1xf32>
    %37 = tpu.matmul %36, %3, %cst_37 {dimension_numbers = #tpu.dot_dimension_numbers<[1], [0], [0], [1], [0, 0, 1, 1], [], []>} : vector<16x32xf32>, vector<32x1xf32>, vector<16x1xf32> -> vector<16x1xf32>
    %38 = vector.shape_cast %37 : vector<16x1xf32> to vector<2x8x1xf32>
    %39 = arith.addf %38, %1 : vector<2x8x1xf32>
    %cst_38 = arith.constant dense<0xFF800000> : vector<2x1xf32>
    %40 = vector.multi_reduction <maximumf>, %39, %cst_38 [1] : vector<2x8x1xf32> to vector<2x1xf32>
    %41 = vector.shape_cast %40 : vector<2x1xf32> to vector<2x1x1xf32>
    %42 = vector.broadcast %41 : vector<2x1x1xf32> to vector<2x8x1xf32>
    %43 = arith.subf %39, %42 : vector<2x8x1xf32>
    %44 = math.exp %43 : vector<2x8x1xf32>
    %cst_39 = arith.constant dense<0.000000e+00> : vector<2x1xf32>
    %45 = vector.multi_reduction <add>, %44, %cst_39 [1] : vector<2x8x1xf32> to vector<2x1xf32>
    %46 = vector.shape_cast %45 : vector<2x1xf32> to vector<2x1x1xf32>
    %47 = tpu.reciprocal %46 {approx = true} : vector<2x1x1xf32> -> vector<2x1x1xf32>
    %48 = vector.broadcast %47 : vector<2x1x1xf32> to vector<2x8x1xf32>
    %49 = arith.mulf %44, %48 : vector<2x8x1xf32>
    %50 = vector.broadcast %49 : vector<2x8x1xf32> to vector<2x8x64xf32>
    %51 = arith.mulf %50, %0 : vector<2x8x64xf32>
    %cst_40 = arith.constant dense<0.000000e+00> : vector<2x64xf32>
    %52 = vector.multi_reduction <add>, %51, %cst_40 [1] : vector<2x8x64xf32> to vector<2x64xf32>
    %53 = vector.extract_strided_slice %23 {offsets = [0, 0], sizes = [2, 96], strides = [1, 1]} : vector<16x96xf32> to vector<2x96xf32>
    %cst_41 = arith.constant dense<0.000000e+00> : vector<2x96xf32>
    %54 = tpu.matmul %52, %4, %cst_41 {dimension_numbers = #tpu.dot_dimension_numbers<[1], [0], [0], [1], [0, 0, 1, 1], [], []>} : vector<2x64xf32>, vector<64x96xf32>, vector<2x96xf32> -> vector<2x96xf32>
    %55 = arith.addf %53, %54 : vector<2x96xf32>
    %56 = vector.extract_strided_slice %55 {offsets = [0, 0], sizes = [2, 32], strides = [1, 1]} : vector<2x96xf32> to vector<2x32xf32>
    %57 = vector.extract_strided_slice %30 {offsets = [0, 0], sizes = [2, 32], strides = [1, 1]} : vector<2x96xf32> to vector<2x32xf32>
    %58 = arith.addf %56, %57 : vector<2x32xf32>
    %59 = arith.negf %58 : vector<2x32xf32>
    %60 = math.exp %59 : vector<2x32xf32>
    %cst_42 = arith.constant 1.000000e+00 : f32
    %61 = vector.broadcast %cst_42 : f32 to vector<2x32xf32>
    %62 = arith.addf %61, %60 : vector<2x32xf32>
    %63 = arith.divf %61, %62 : vector<2x32xf32>
    %64 = vector.extract_strided_slice %55 {offsets = [0, 32], sizes = [2, 32], strides = [1, 1]} : vector<2x96xf32> to vector<2x32xf32>
    %65 = vector.extract_strided_slice %30 {offsets = [0, 32], sizes = [2, 32], strides = [1, 1]} : vector<2x96xf32> to vector<2x32xf32>
    %66 = arith.addf %64, %65 : vector<2x32xf32>
    %67 = arith.negf %66 : vector<2x32xf32>
    %68 = math.exp %67 : vector<2x32xf32>
    %cst_43 = arith.constant 1.000000e+00 : f32
    %69 = vector.broadcast %cst_43 : f32 to vector<2x32xf32>
    %70 = arith.addf %69, %68 : vector<2x32xf32>
    %71 = arith.divf %69, %70 : vector<2x32xf32>
    %72 = vector.extract_strided_slice %55 {offsets = [0, 64], sizes = [2, 32], strides = [1, 1]} : vector<2x96xf32> to vector<2x32xf32>
    %73 = vector.extract_strided_slice %30 {offsets = [0, 64], sizes = [2, 32], strides = [1, 1]} : vector<2x96xf32> to vector<2x32xf32>
    %74 = arith.mulf %63, %73 : vector<2x32xf32>
    %75 = arith.addf %72, %74 : vector<2x32xf32>
    %76 = math.tanh %75 : vector<2x32xf32>
    %cst_44 = arith.constant 1.000000e+00 : f32
    %77 = vector.broadcast %cst_44 : f32 to vector<2x32xf32>
    %78 = arith.subf %77, %71 : vector<2x32xf32>
    %79 = arith.mulf %78, %76 : vector<2x32xf32>
    %80 = arith.mulf %71, %14 : vector<2x32xf32>
    %81 = arith.addf %79, %80 : vector<2x32xf32>
    %82 = vector.extract_strided_slice %25 {offsets = [0, 0], sizes = [2, 32], strides = [1, 1]} : vector<16x32xf32> to vector<2x32xf32>
    %cst_45 = arith.constant dense<0.000000e+00> : vector<2x32xf32>
    %83 = tpu.matmul %81, %6, %cst_45 {dimension_numbers = #tpu.dot_dimension_numbers<[1], [0], [0], [1], [0, 0, 1, 1], [], []>} : vector<2x32xf32>, vector<32x32xf32>, vector<2x32xf32> -> vector<2x32xf32>
    %84 = arith.addf %82, %83 : vector<2x32xf32>
    %cst_46 = arith.constant dense<0.000000e+00> : vector<2x32xf32>
    %85 = tpu.matmul %52, %7, %cst_46 {dimension_numbers = #tpu.dot_dimension_numbers<[1], [0], [0], [1], [0, 0, 1, 1], [], []>} : vector<2x64xf32>, vector<64x32xf32>, vector<2x32xf32> -> vector<2x32xf32>
    %86 = arith.addf %84, %85 : vector<2x32xf32>
    %c0_47 = arith.constant 0 : index
    %c0_48 = arith.constant 0 : index
    %87 = vector.load %arg16[%c0_47, %c0_48] : memref<2x256xf32, #tpu.memory_space<vmem>>, vector<2x32xf32>
    tpu.vector_store %arg16[%c0_47, %c0_48], %81 {strides = array<i32>} : memref<2x256xf32, #tpu.memory_space<vmem>>, vector<2x32xf32>,
    %c0_49 = arith.constant 0 : index
    %c0_50 = arith.constant 0 : index
    %88 = vector.load %arg18[%c0_49, %c0_50] : memref<2x256xf32, #tpu.memory_space<vmem>>, vector<2x32xf32>
    tpu.vector_store %arg18[%c0_49, %c0_50], %86 {strides = array<i32>} : memref<2x256xf32, #tpu.memory_space<vmem>>, vector<2x32xf32>,
    %c0_51 = arith.constant 0 : index
    %c0_52 = arith.constant 0 : index
    %c0_53 = arith.constant 0 : index
    %89 = vector.load %arg19[%c0_51, %c0_52, %c0_53] : memref<2x8x8xf32, #tpu.memory_space<vmem>>, vector<2x8x1xf32>
    tpu.vector_store %arg19[%c0_51, %c0_52, %c0_53], %49 {strides = array<i32>} : memref<2x8x8xf32, #tpu.memory_space<vmem>>, vector<2x8x1xf32>,
    %cst_54 = arith.constant dense<0.000000e+00> : vector<2x128xf32>
    %90 = tpu.matmul %81, %2, %cst_54 {dimension_numbers = #tpu.dot_dimension_numbers<[1], [0], [0], [1], [0, 0, 1, 1], [], []>} : vector<2x32xf32>, vector<32x128xf32>, vector<2x128xf32> -> vector<2x128xf32>
    %91 = vector.extract_strided_slice %90 {offsets = [0, 0], sizes = [2, 32], strides = [1, 1]} : vector<2x128xf32> to vector<2x32xf32>
    %92 = vector.extract_strided_slice %90 {offsets = [0, 32], sizes = [2, 96], strides = [1, 1]} : vector<2x128xf32> to vector<2x96xf32>
    %93 = vector.broadcast %5 : vector<1x96xf32> to vector<2x96xf32>
    %94 = arith.addf %92, %93 : vector<2x96xf32>
    %95 = vector.shape_cast %91 : vector<2x32xf32> to vector<2x1x32xf32>
    %96 = vector.shape_cast %95 : vector<2x1x32xf32> to vector<2x1x32xf32>
    %97 = vector.broadcast %96 : vector<2x1x32xf32> to vector<2x8x32xf32>
    %98 = vector.shape_cast %97 : vector<2x8x32xf32> to vector<16x32xf32>
    %99 = arith.addf %98, %17 : vector<16x32xf32>
    %100 = math.tanh %99 : vector<16x32xf32>
    %cst_55 = arith.constant dense<0.000000e+00> : vector<16x1xf32>
    %101 = tpu.matmul %100, %3, %cst_55 {dimension_numbers = #tpu.dot_dimension_numbers<[1], [0], [0], [1], [0, 0, 1, 1], [], []>} : vector<16x32xf32>, vector<32x1xf32>, vector<16x1xf32> -> vector<16x1xf32>
    %102 = vector.shape_cast %101 : vector<16x1xf32> to vector<2x8x1xf32>
    %103 = arith.addf %102, %1 : vector<2x8x1xf32>
    %cst_56 = arith.constant dense<0xFF800000> : vector<2x1xf32>
    %104 = vector.multi_reduction <maximumf>, %103, %cst_56 [1] : vector<2x8x1xf32> to vector<2x1xf32>
    %105 = vector.shape_cast %104 : vector<2x1xf32> to vector<2x1x1xf32>
    %106 = vector.broadcast %105 : vector<2x1x1xf32> to vector<2x8x1xf32>
    %107 = arith.subf %103, %106 : vector<2x8x1xf32>
    %108 = math.exp %107 : vector<2x8x1xf32>
    %cst_57 = arith.constant dense<0.000000e+00> : vector<2x1xf32>
    %109 = vector.multi_reduction <add>, %108, %cst_57 [1] : vector<2x8x1xf32> to vector<2x1xf32>
    %110 = vector.shape_cast %109 : vector<2x1xf32> to vector<2x1x1xf32>
    %111 = tpu.reciprocal %110 {approx = true} : vector<2x1x1xf32> -> vector<2x1x1xf32>
    %112 = vector.broadcast %111 : vector<2x1x1xf32> to vector<2x8x1xf32>
    %113 = arith.mulf %108, %112 : vector<2x8x1xf32>
    %114 = vector.broadcast %113 : vector<2x8x1xf32> to vector<2x8x64xf32>
    %115 = arith.mulf %114, %0 : vector<2x8x64xf32>
    %cst_58 = arith.constant dense<0.000000e+00> : vector<2x64xf32>
    %116 = vector.multi_reduction <add>, %115, %cst_58 [1] : vector<2x8x64xf32> to vector<2x64xf32>
    %117 = vector.extract_strided_slice %23 {offsets = [2, 0], sizes = [2, 96], strides = [1, 1]} : vector<16x96xf32> to vector<2x96xf32>
    %cst_59 = arith.constant dense<0.000000e+00> : vector<2x96xf32>
    %118 = tpu.matmul %116, %4, %cst_59 {dimension_numbers = #tpu.dot_dimension_numbers<[1], [0], [0], [1], [0, 0, 1, 1], [], []>} : vector<2x64xf32>, vector<64x96xf32>, vector<2x96xf32> -> vector<2x96xf32>
    %119 = arith.addf %117, %118 : vector<2x96xf32>
    %120 = vector.extract_strided_slice %119 {offsets = [0, 0], sizes = [2, 32], strides = [1, 1]} : vector<2x96xf32> to vector<2x32xf32>
    %121 = vector.extract_strided_slice %94 {offsets = [0, 0], sizes = [2, 32], strides = [1, 1]} : vector<2x96xf32> to vector<2x32xf32>
    %122 = arith.addf %120, %121 : vector<2x32xf32>
    %123 = arith.negf %122 : vector<2x32xf32>
    %124 = math.exp %123 : vector<2x32xf32>
    %cst_60 = arith.constant 1.000000e+00 : f32
    %125 = vector.broadcast %cst_60 : f32 to vector<2x32xf32>
    %126 = arith.addf %125, %124 : vector<2x32xf32>
    %127 = arith.divf %125, %126 : vector<2x32xf32>
    %128 = vector.extract_strided_slice %119 {offsets = [0, 32], sizes = [2, 32], strides = [1, 1]} : vector<2x96xf32> to vector<2x32xf32>
    %129 = vector.extract_strided_slice %94 {offsets = [0, 32], sizes = [2, 32], strides = [1, 1]} : vector<2x96xf32> to vector<2x32xf32>
    %130 = arith.addf %128, %129 : vector<2x32xf32>
    %131 = arith.negf %130 : vector<2x32xf32>
    %132 = math.exp %131 : vector<2x32xf32>
    %cst_61 = arith.constant 1.000000e+00 : f32
    %133 = vector.broadcast %cst_61 : f32 to vector<2x32xf32>
    %134 = arith.addf %133, %132 : vector<2x32xf32>
    %135 = arith.divf %133, %134 : vector<2x32xf32>
    %136 = vector.extract_strided_slice %119 {offsets = [0, 64], sizes = [2, 32], strides = [1, 1]} : vector<2x96xf32> to vector<2x32xf32>
    %137 = vector.extract_strided_slice %94 {offsets = [0, 64], sizes = [2, 32], strides = [1, 1]} : vector<2x96xf32> to vector<2x32xf32>
    %138 = arith.mulf %127, %137 : vector<2x32xf32>
    %139 = arith.addf %136, %138 : vector<2x32xf32>
    %140 = math.tanh %139 : vector<2x32xf32>
    %cst_62 = arith.constant 1.000000e+00 : f32
    %141 = vector.broadcast %cst_62 : f32 to vector<2x32xf32>
    %142 = arith.subf %141, %135 : vector<2x32xf32>
    %143 = arith.mulf %142, %140 : vector<2x32xf32>
    %144 = arith.mulf %135, %81 : vector<2x32xf32>
    %145 = arith.addf %143, %144 : vector<2x32xf32>
    %146 = vector.extract_strided_slice %25 {offsets = [2, 0], sizes = [2, 32], strides = [1, 1]} : vector<16x32xf32> to vector<2x32xf32>
    %cst_63 = arith.constant dense<0.000000e+00> : vector<2x32xf32>
    %147 = tpu.matmul %145, %6, %cst_63 {dimension_numbers = #tpu.dot_dimension_numbers<[1], [0], [0], [1], [0, 0, 1, 1], [], []>} : vector<2x32xf32>, vector<32x32xf32>, vector<2x32xf32> -> vector<2x32xf32>
    %148 = arith.addf %146, %147 : vector<2x32xf32>
    %cst_64 = arith.constant dense<0.000000e+00> : vector<2x32xf32>
    %149 = tpu.matmul %116, %7, %cst_64 {dimension_numbers = #tpu.dot_dimension_numbers<[1], [0], [0], [1], [0, 0, 1, 1], [], []>} : vector<2x64xf32>, vector<64x32xf32>, vector<2x32xf32> -> vector<2x32xf32>
    %150 = arith.addf %148, %149 : vector<2x32xf32>
    %c0_65 = arith.constant 0 : index
    %c32 = arith.constant 32 : index
    %151 = vector.load %arg16[%c0_65, %c32] : memref<2x256xf32, #tpu.memory_space<vmem>>, vector<2x32xf32>
    tpu.vector_store %arg16[%c0_65, %c32], %145 {strides = array<i32>} : memref<2x256xf32, #tpu.memory_space<vmem>>, vector<2x32xf32>,
    %c0_66 = arith.constant 0 : index
    %c32_67 = arith.constant 32 : index
    %152 = vector.load %arg18[%c0_66, %c32_67] : memref<2x256xf32, #tpu.memory_space<vmem>>, vector<2x32xf32>
    tpu.vector_store %arg18[%c0_66, %c32_67], %150 {strides = array<i32>} : memref<2x256xf32, #tpu.memory_space<vmem>>, vector<2x32xf32>,
    %c0_68 = arith.constant 0 : index
    %c0_69 = arith.constant 0 : index
    %c1 = arith.constant 1 : index
    %153 = vector.load %arg19[%c0_68, %c0_69, %c1] : memref<2x8x8xf32, #tpu.memory_space<vmem>>, vector<2x8x1xf32>
    tpu.vector_store %arg19[%c0_68, %c0_69, %c1], %113 {strides = array<i32>} : memref<2x8x8xf32, #tpu.memory_space<vmem>>, vector<2x8x1xf32>,
    %cst_70 = arith.constant dense<0.000000e+00> : vector<2x128xf32>
    %154 = tpu.matmul %145, %2, %cst_70 {dimension_numbers = #tpu.dot_dimension_numbers<[1], [0], [0], [1], [0, 0, 1, 1], [], []>} : vector<2x32xf32>, vector<32x128xf32>, vector<2x128xf32> -> vector<2x128xf32>
    %155 = vector.extract_strided_slice %154 {offsets = [0, 0], sizes = [2, 32], strides = [1, 1]} : vector<2x128xf32> to vector<2x32xf32>
    %156 = vector.extract_strided_slice %154 {offsets = [0, 32], sizes = [2, 96], strides = [1, 1]} : vector<2x128xf32> to vector<2x96xf32>
    %157 = vector.broadcast %5 : vector<1x96xf32> to vector<2x96xf32>
    %158 = arith.addf %156, %157 : vector<2x96xf32>
    %159 = vector.shape_cast %155 : vector<2x32xf32> to vector<2x1x32xf32>
    %160 = vector.shape_cast %159 : vector<2x1x32xf32> to vector<2x1x32xf32>
    %161 = vector.broadcast %160 : vector<2x1x32xf32> to vector<2x8x32xf32>
    %162 = vector.shape_cast %161 : vector<2x8x32xf32> to vector<16x32xf32>
    %163 = arith.addf %162, %17 : vector<16x32xf32>
    %164 = math.tanh %163 : vector<16x32xf32>
    %cst_71 = arith.constant dense<0.000000e+00> : vector<16x1xf32>
    %165 = tpu.matmul %164, %3, %cst_71 {dimension_numbers = #tpu.dot_dimension_numbers<[1], [0], [0], [1], [0, 0, 1, 1], [], []>} : vector<16x32xf32>, vector<32x1xf32>, vector<16x1xf32> -> vector<16x1xf32>
    %166 = vector.shape_cast %165 : vector<16x1xf32> to vector<2x8x1xf32>
    %167 = arith.addf %166, %1 : vector<2x8x1xf32>
    %cst_72 = arith.constant dense<0xFF800000> : vector<2x1xf32>
    %168 = vector.multi_reduction <maximumf>, %167, %cst_72 [1] : vector<2x8x1xf32> to vector<2x1xf32>
    %169 = vector.shape_cast %168 : vector<2x1xf32> to vector<2x1x1xf32>
    %170 = vector.broadcast %169 : vector<2x1x1xf32> to vector<2x8x1xf32>
    %171 = arith.subf %167, %170 : vector<2x8x1xf32>
    %172 = math.exp %171 : vector<2x8x1xf32>
    %cst_73 = arith.constant dense<0.000000e+00> : vector<2x1xf32>
    %173 = vector.multi_reduction <add>, %172, %cst_73 [1] : vector<2x8x1xf32> to vector<2x1xf32>
    %174 = vector.shape_cast %173 : vector<2x1xf32> to vector<2x1x1xf32>
    %175 = tpu.reciprocal %174 {approx = true} : vector<2x1x1xf32> -> vector<2x1x1xf32>
    %176 = vector.broadcast %175 : vector<2x1x1xf32> to vector<2x8x1xf32>
    %177 = arith.mulf %172, %176 : vector<2x8x1xf32>
    %178 = vector.broadcast %177 : vector<2x8x1xf32> to vector<2x8x64xf32>
    %179 = arith.mulf %178, %0 : vector<2x8x64xf32>
    %cst_74 = arith.constant dense<0.000000e+00> : vector<2x64xf32>
    %180 = vector.multi_reduction <add>, %179, %cst_74 [1] : vector<2x8x64xf32> to vector<2x64xf32>
    %181 = vector.extract_strided_slice %23 {offsets = [4, 0], sizes = [2, 96], strides = [1, 1]} : vector<16x96xf32> to vector<2x96xf32>
    %cst_75 = arith.constant dense<0.000000e+00> : vector<2x96xf32>
    %182 = tpu.matmul %180, %4, %cst_75 {dimension_numbers = #tpu.dot_dimension_numbers<[1], [0], [0], [1], [0, 0, 1, 1], [], []>} : vector<2x64xf32>, vector<64x96xf32>, vector<2x96xf32> -> vector<2x96xf32>
    %183 = arith.addf %181, %182 : vector<2x96xf32>
    %184 = vector.extract_strided_slice %183 {offsets = [0, 0], sizes = [2, 32], strides = [1, 1]} : vector<2x96xf32> to vector<2x32xf32>
    %185 = vector.extract_strided_slice %158 {offsets = [0, 0], sizes = [2, 32], strides = [1, 1]} : vector<2x96xf32> to vector<2x32xf32>
    %186 = arith.addf %184, %185 : vector<2x32xf32>
    %187 = arith.negf %186 : vector<2x32xf32>
    %188 = math.exp %187 : vector<2x32xf32>
    %cst_76 = arith.constant 1.000000e+00 : f32
    %189 = vector.broadcast %cst_76 : f32 to vector<2x32xf32>
    %190 = arith.addf %189, %188 : vector<2x32xf32>
    %191 = arith.divf %189, %190 : vector<2x32xf32>
    %192 = vector.extract_strided_slice %183 {offsets = [0, 32], sizes = [2, 32], strides = [1, 1]} : vector<2x96xf32> to vector<2x32xf32>
    %193 = vector.extract_strided_slice %158 {offsets = [0, 32], sizes = [2, 32], strides = [1, 1]} : vector<2x96xf32> to vector<2x32xf32>
    %194 = arith.addf %192, %193 : vector<2x32xf32>
    %195 = arith.negf %194 : vector<2x32xf32>
    %196 = math.exp %195 : vector<2x32xf32>
    %cst_77 = arith.constant 1.000000e+00 : f32
    %197 = vector.broadcast %cst_77 : f32 to vector<2x32xf32>
    %198 = arith.addf %197, %196 : vector<2x32xf32>
    %199 = arith.divf %197, %198 : vector<2x32xf32>
    %200 = vector.extract_strided_slice %183 {offsets = [0, 64], sizes = [2, 32], strides = [1, 1]} : vector<2x96xf32> to vector<2x32xf32>
    %201 = vector.extract_strided_slice %158 {offsets = [0, 64], sizes = [2, 32], strides = [1, 1]} : vector<2x96xf32> to vector<2x32xf32>
    %202 = arith.mulf %191, %201 : vector<2x32xf32>
    %203 = arith.addf %200, %202 : vector<2x32xf32>
    %204 = math.tanh %203 : vector<2x32xf32>
    %cst_78 = arith.constant 1.000000e+00 : f32
    %205 = vector.broadcast %cst_78 : f32 to vector<2x32xf32>
    %206 = arith.subf %205, %199 : vector<2x32xf32>
    %207 = arith.mulf %206, %204 : vector<2x32xf32>
    %208 = arith.mulf %199, %145 : vector<2x32xf32>
    %209 = arith.addf %207, %208 : vector<2x32xf32>
    %210 = vector.extract_strided_slice %25 {offsets = [4, 0], sizes = [2, 32], strides = [1, 1]} : vector<16x32xf32> to vector<2x32xf32>
    %cst_79 = arith.constant dense<0.000000e+00> : vector<2x32xf32>
    %211 = tpu.matmul %209, %6, %cst_79 {dimension_numbers = #tpu.dot_dimension_numbers<[1], [0], [0], [1], [0, 0, 1, 1], [], []>} : vector<2x32xf32>, vector<32x32xf32>, vector<2x32xf32> -> vector<2x32xf32>
    %212 = arith.addf %210, %211 : vector<2x32xf32>
    %cst_80 = arith.constant dense<0.000000e+00> : vector<2x32xf32>
    %213 = tpu.matmul %180, %7, %cst_80 {dimension_numbers = #tpu.dot_dimension_numbers<[1], [0], [0], [1], [0, 0, 1, 1], [], []>} : vector<2x64xf32>, vector<64x32xf32>, vector<2x32xf32> -> vector<2x32xf32>
    %214 = arith.addf %212, %213 : vector<2x32xf32>
    %c0_81 = arith.constant 0 : index
    %c64 = arith.constant 64 : index
    %215 = vector.load %arg16[%c0_81, %c64] : memref<2x256xf32, #tpu.memory_space<vmem>>, vector<2x32xf32>
    tpu.vector_store %arg16[%c0_81, %c64], %209 {strides = array<i32>} : memref<2x256xf32, #tpu.memory_space<vmem>>, vector<2x32xf32>,
    %c0_82 = arith.constant 0 : index
    %c64_83 = arith.constant 64 : index
    %216 = vector.load %arg18[%c0_82, %c64_83] : memref<2x256xf32, #tpu.memory_space<vmem>>, vector<2x32xf32>
    tpu.vector_store %arg18[%c0_82, %c64_83], %214 {strides = array<i32>} : memref<2x256xf32, #tpu.memory_space<vmem>>, vector<2x32xf32>,
    %c0_84 = arith.constant 0 : index
    %c0_85 = arith.constant 0 : index
    %c2 = arith.constant 2 : index
    %217 = vector.load %arg19[%c0_84, %c0_85, %c2] : memref<2x8x8xf32, #tpu.memory_space<vmem>>, vector<2x8x1xf32>
    tpu.vector_store %arg19[%c0_84, %c0_85, %c2], %177 {strides = array<i32>} : memref<2x8x8xf32, #tpu.memory_space<vmem>>, vector<2x8x1xf32>,
    %cst_86 = arith.constant dense<0.000000e+00> : vector<2x128xf32>
    %218 = tpu.matmul %209, %2, %cst_86 {dimension_numbers = #tpu.dot_dimension_numbers<[1], [0], [0], [1], [0, 0, 1, 1], [], []>} : vector<2x32xf32>, vector<32x128xf32>, vector<2x128xf32> -> vector<2x128xf32>
    %219 = vector.extract_strided_slice %218 {offsets = [0, 0], sizes = [2, 32], strides = [1, 1]} : vector<2x128xf32> to vector<2x32xf32>
    %220 = vector.extract_strided_slice %218 {offsets = [0, 32], sizes = [2, 96], strides = [1, 1]} : vector<2x128xf32> to vector<2x96xf32>
    %221 = vector.broadcast %5 : vector<1x96xf32> to vector<2x96xf32>
    %222 = arith.addf %220, %221 : vector<2x96xf32>
    %223 = vector.shape_cast %219 : vector<2x32xf32> to vector<2x1x32xf32>
    %224 = vector.shape_cast %223 : vector<2x1x32xf32> to vector<2x1x32xf32>
    %225 = vector.broadcast %224 : vector<2x1x32xf32> to vector<2x8x32xf32>
    %226 = vector.shape_cast %225 : vector<2x8x32xf32> to vector<16x32xf32>
    %227 = arith.addf %226, %17 : vector<16x32xf32>
    %228 = math.tanh %227 : vector<16x32xf32>
    %cst_87 = arith.constant dense<0.000000e+00> : vector<16x1xf32>
    %229 = tpu.matmul %228, %3, %cst_87 {dimension_numbers = #tpu.dot_dimension_numbers<[1], [0], [0], [1], [0, 0, 1, 1], [], []>} : vector<16x32xf32>, vector<32x1xf32>, vector<16x1xf32> -> vector<16x1xf32>
    %230 = vector.shape_cast %229 : vector<16x1xf32> to vector<2x8x1xf32>
    %231 = arith.addf %230, %1 : vector<2x8x1xf32>
    %cst_88 = arith.constant dense<0xFF800000> : vector<2x1xf32>
    %232 = vector.multi_reduction <maximumf>, %231, %cst_88 [1] : vector<2x8x1xf32> to vector<2x1xf32>
    %233 = vector.shape_cast %232 : vector<2x1xf32> to vector<2x1x1xf32>
    %234 = vector.broadcast %233 : vector<2x1x1xf32> to vector<2x8x1xf32>
    %235 = arith.subf %231, %234 : vector<2x8x1xf32>
    %236 = math.exp %235 : vector<2x8x1xf32>
    %cst_89 = arith.constant dense<0.000000e+00> : vector<2x1xf32>
    %237 = vector.multi_reduction <add>, %236, %cst_89 [1] : vector<2x8x1xf32> to vector<2x1xf32>
    %238 = vector.shape_cast %237 : vector<2x1xf32> to vector<2x1x1xf32>
    %239 = tpu.reciprocal %238 {approx = true} : vector<2x1x1xf32> -> vector<2x1x1xf32>
    %240 = vector.broadcast %239 : vector<2x1x1xf32> to vector<2x8x1xf32>
    %241 = arith.mulf %236, %240 : vector<2x8x1xf32>
    %242 = vector.broadcast %241 : vector<2x8x1xf32> to vector<2x8x64xf32>
    %243 = arith.mulf %242, %0 : vector<2x8x64xf32>
    %cst_90 = arith.constant dense<0.000000e+00> : vector<2x64xf32>
    %244 = vector.multi_reduction <add>, %243, %cst_90 [1] : vector<2x8x64xf32> to vector<2x64xf32>
    %245 = vector.extract_strided_slice %23 {offsets = [6, 0], sizes = [2, 96], strides = [1, 1]} : vector<16x96xf32> to vector<2x96xf32>
    %cst_91 = arith.constant dense<0.000000e+00> : vector<2x96xf32>
    %246 = tpu.matmul %244, %4, %cst_91 {dimension_numbers = #tpu.dot_dimension_numbers<[1], [0], [0], [1], [0, 0, 1, 1], [], []>} : vector<2x64xf32>, vector<64x96xf32>, vector<2x96xf32> -> vector<2x96xf32>
    %247 = arith.addf %245, %246 : vector<2x96xf32>
    %248 = vector.extract_strided_slice %247 {offsets = [0, 0], sizes = [2, 32], strides = [1, 1]} : vector<2x96xf32> to vector<2x32xf32>
    %249 = vector.extract_strided_slice %222 {offsets = [0, 0], sizes = [2, 32], strides = [1, 1]} : vector<2x96xf32> to vector<2x32xf32>
    %250 = arith.addf %248, %249 : vector<2x32xf32>
    %251 = arith.negf %250 : vector<2x32xf32>
    %252 = math.exp %251 : vector<2x32xf32>
    %cst_92 = arith.constant 1.000000e+00 : f32
    %253 = vector.broadcast %cst_92 : f32 to vector<2x32xf32>
    %254 = arith.addf %253, %252 : vector<2x32xf32>
    %255 = arith.divf %253, %254 : vector<2x32xf32>
    %256 = vector.extract_strided_slice %247 {offsets = [0, 32], sizes = [2, 32], strides = [1, 1]} : vector<2x96xf32> to vector<2x32xf32>
    %257 = vector.extract_strided_slice %222 {offsets = [0, 32], sizes = [2, 32], strides = [1, 1]} : vector<2x96xf32> to vector<2x32xf32>
    %258 = arith.addf %256, %257 : vector<2x32xf32>
    %259 = arith.negf %258 : vector<2x32xf32>
    %260 = math.exp %259 : vector<2x32xf32>
    %cst_93 = arith.constant 1.000000e+00 : f32
    %261 = vector.broadcast %cst_93 : f32 to vector<2x32xf32>
    %262 = arith.addf %261, %260 : vector<2x32xf32>
    %263 = arith.divf %261, %262 : vector<2x32xf32>
    %264 = vector.extract_strided_slice %247 {offsets = [0, 64], sizes = [2, 32], strides = [1, 1]} : vector<2x96xf32> to vector<2x32xf32>
    %265 = vector.extract_strided_slice %222 {offsets = [0, 64], sizes = [2, 32], strides = [1, 1]} : vector<2x96xf32> to vector<2x32xf32>
    %266 = arith.mulf %255, %265 : vector<2x32xf32>
    %267 = arith.addf %264, %266 : vector<2x32xf32>
    %268 = math.tanh %267 : vector<2x32xf32>
    %cst_94 = arith.constant 1.000000e+00 : f32
    %269 = vector.broadcast %cst_94 : f32 to vector<2x32xf32>
    %270 = arith.subf %269, %263 : vector<2x32xf32>
    %271 = arith.mulf %270, %268 : vector<2x32xf32>
    %272 = arith.mulf %263, %209 : vector<2x32xf32>
    %273 = arith.addf %271, %272 : vector<2x32xf32>
    %274 = vector.extract_strided_slice %25 {offsets = [6, 0], sizes = [2, 32], strides = [1, 1]} : vector<16x32xf32> to vector<2x32xf32>
    %cst_95 = arith.constant dense<0.000000e+00> : vector<2x32xf32>
    %275 = tpu.matmul %273, %6, %cst_95 {dimension_numbers = #tpu.dot_dimension_numbers<[1], [0], [0], [1], [0, 0, 1, 1], [], []>} : vector<2x32xf32>, vector<32x32xf32>, vector<2x32xf32> -> vector<2x32xf32>
    %276 = arith.addf %274, %275 : vector<2x32xf32>
    %cst_96 = arith.constant dense<0.000000e+00> : vector<2x32xf32>
    %277 = tpu.matmul %244, %7, %cst_96 {dimension_numbers = #tpu.dot_dimension_numbers<[1], [0], [0], [1], [0, 0, 1, 1], [], []>} : vector<2x64xf32>, vector<64x32xf32>, vector<2x32xf32> -> vector<2x32xf32>
    %278 = arith.addf %276, %277 : vector<2x32xf32>
    %c0_97 = arith.constant 0 : index
    %c96 = arith.constant 96 : index
    %279 = vector.load %arg16[%c0_97, %c96] : memref<2x256xf32, #tpu.memory_space<vmem>>, vector<2x32xf32>
    tpu.vector_store %arg16[%c0_97, %c96], %273 {strides = array<i32>} : memref<2x256xf32, #tpu.memory_space<vmem>>, vector<2x32xf32>,
    %c0_98 = arith.constant 0 : index
    %c96_99 = arith.constant 96 : index
    %280 = vector.load %arg18[%c0_98, %c96_99] : memref<2x256xf32, #tpu.memory_space<vmem>>, vector<2x32xf32>
    tpu.vector_store %arg18[%c0_98, %c96_99], %278 {strides = array<i32>} : memref<2x256xf32, #tpu.memory_space<vmem>>, vector<2x32xf32>,
    %c0_100 = arith.constant 0 : index
    %c0_101 = arith.constant 0 : index
    %c3 = arith.constant 3 : index
    %281 = vector.load %arg19[%c0_100, %c0_101, %c3] : memref<2x8x8xf32, #tpu.memory_space<vmem>>, vector<2x8x1xf32>
    tpu.vector_store %arg19[%c0_100, %c0_101, %c3], %241 {strides = array<i32>} : memref<2x8x8xf32, #tpu.memory_space<vmem>>, vector<2x8x1xf32>,
    %cst_102 = arith.constant dense<0.000000e+00> : vector<2x128xf32>
    %282 = tpu.matmul %273, %2, %cst_102 {dimension_numbers = #tpu.dot_dimension_numbers<[1], [0], [0], [1], [0, 0, 1, 1], [], []>} : vector<2x32xf32>, vector<32x128xf32>, vector<2x128xf32> -> vector<2x128xf32>
    %283 = vector.extract_strided_slice %282 {offsets = [0, 0], sizes = [2, 32], strides = [1, 1]} : vector<2x128xf32> to vector<2x32xf32>
    %284 = vector.extract_strided_slice %282 {offsets = [0, 32], sizes = [2, 96], strides = [1, 1]} : vector<2x128xf32> to vector<2x96xf32>
    %285 = vector.broadcast %5 : vector<1x96xf32> to vector<2x96xf32>
    %286 = arith.addf %284, %285 : vector<2x96xf32>
    %287 = vector.shape_cast %283 : vector<2x32xf32> to vector<2x1x32xf32>
    %288 = vector.shape_cast %287 : vector<2x1x32xf32> to vector<2x1x32xf32>
    %289 = vector.broadcast %288 : vector<2x1x32xf32> to vector<2x8x32xf32>
    %290 = vector.shape_cast %289 : vector<2x8x32xf32> to vector<16x32xf32>
    %291 = arith.addf %290, %17 : vector<16x32xf32>
    %292 = math.tanh %291 : vector<16x32xf32>
    %cst_103 = arith.constant dense<0.000000e+00> : vector<16x1xf32>
    %293 = tpu.matmul %292, %3, %cst_103 {dimension_numbers = #tpu.dot_dimension_numbers<[1], [0], [0], [1], [0, 0, 1, 1], [], []>} : vector<16x32xf32>, vector<32x1xf32>, vector<16x1xf32> -> vector<16x1xf32>
    %294 = vector.shape_cast %293 : vector<16x1xf32> to vector<2x8x1xf32>
    %295 = arith.addf %294, %1 : vector<2x8x1xf32>
    %cst_104 = arith.constant dense<0xFF800000> : vector<2x1xf32>
    %296 = vector.multi_reduction <maximumf>, %295, %cst_104 [1] : vector<2x8x1xf32> to vector<2x1xf32>
    %297 = vector.shape_cast %296 : vector<2x1xf32> to vector<2x1x1xf32>
    %298 = vector.broadcast %297 : vector<2x1x1xf32> to vector<2x8x1xf32>
    %299 = arith.subf %295, %298 : vector<2x8x1xf32>
    %300 = math.exp %299 : vector<2x8x1xf32>
    %cst_105 = arith.constant dense<0.000000e+00> : vector<2x1xf32>
    %301 = vector.multi_reduction <add>, %300, %cst_105 [1] : vector<2x8x1xf32> to vector<2x1xf32>
    %302 = vector.shape_cast %301 : vector<2x1xf32> to vector<2x1x1xf32>
    %303 = tpu.reciprocal %302 {approx = true} : vector<2x1x1xf32> -> vector<2x1x1xf32>
    %304 = vector.broadcast %303 : vector<2x1x1xf32> to vector<2x8x1xf32>
    %305 = arith.mulf %300, %304 : vector<2x8x1xf32>
    %306 = vector.broadcast %305 : vector<2x8x1xf32> to vector<2x8x64xf32>
    %307 = arith.mulf %306, %0 : vector<2x8x64xf32>
    %cst_106 = arith.constant dense<0.000000e+00> : vector<2x64xf32>
    %308 = vector.multi_reduction <add>, %307, %cst_106 [1] : vector<2x8x64xf32> to vector<2x64xf32>
    %309 = vector.extract_strided_slice %23 {offsets = [8, 0], sizes = [2, 96], strides = [1, 1]} : vector<16x96xf32> to vector<2x96xf32>
    %cst_107 = arith.constant dense<0.000000e+00> : vector<2x96xf32>
    %310 = tpu.matmul %308, %4, %cst_107 {dimension_numbers = #tpu.dot_dimension_numbers<[1], [0], [0], [1], [0, 0, 1, 1], [], []>} : vector<2x64xf32>, vector<64x96xf32>, vector<2x96xf32> -> vector<2x96xf32>
    %311 = arith.addf %309, %310 : vector<2x96xf32>
    %312 = vector.extract_strided_slice %311 {offsets = [0, 0], sizes = [2, 32], strides = [1, 1]} : vector<2x96xf32> to vector<2x32xf32>
    %313 = vector.extract_strided_slice %286 {offsets = [0, 0], sizes = [2, 32], strides = [1, 1]} : vector<2x96xf32> to vector<2x32xf32>
    %314 = arith.addf %312, %313 : vector<2x32xf32>
    %315 = arith.negf %314 : vector<2x32xf32>
    %316 = math.exp %315 : vector<2x32xf32>
    %cst_108 = arith.constant 1.000000e+00 : f32
    %317 = vector.broadcast %cst_108 : f32 to vector<2x32xf32>
    %318 = arith.addf %317, %316 : vector<2x32xf32>
    %319 = arith.divf %317, %318 : vector<2x32xf32>
    %320 = vector.extract_strided_slice %311 {offsets = [0, 32], sizes = [2, 32], strides = [1, 1]} : vector<2x96xf32> to vector<2x32xf32>
    %321 = vector.extract_strided_slice %286 {offsets = [0, 32], sizes = [2, 32], strides = [1, 1]} : vector<2x96xf32> to vector<2x32xf32>
    %322 = arith.addf %320, %321 : vector<2x32xf32>
    %323 = arith.negf %322 : vector<2x32xf32>
    %324 = math.exp %323 : vector<2x32xf32>
    %cst_109 = arith.constant 1.000000e+00 : f32
    %325 = vector.broadcast %cst_109 : f32 to vector<2x32xf32>
    %326 = arith.addf %325, %324 : vector<2x32xf32>
    %327 = arith.divf %325, %326 : vector<2x32xf32>
    %328 = vector.extract_strided_slice %311 {offsets = [0, 64], sizes = [2, 32], strides = [1, 1]} : vector<2x96xf32> to vector<2x32xf32>
    %329 = vector.extract_strided_slice %286 {offsets = [0, 64], sizes = [2, 32], strides = [1, 1]} : vector<2x96xf32> to vector<2x32xf32>
    %330 = arith.mulf %319, %329 : vector<2x32xf32>
    %331 = arith.addf %328, %330 : vector<2x32xf32>
    %332 = math.tanh %331 : vector<2x32xf32>
    %cst_110 = arith.constant 1.000000e+00 : f32
    %333 = vector.broadcast %cst_110 : f32 to vector<2x32xf32>
    %334 = arith.subf %333, %327 : vector<2x32xf32>
    %335 = arith.mulf %334, %332 : vector<2x32xf32>
    %336 = arith.mulf %327, %273 : vector<2x32xf32>
    %337 = arith.addf %335, %336 : vector<2x32xf32>
    %338 = vector.extract_strided_slice %25 {offsets = [8, 0], sizes = [2, 32], strides = [1, 1]} : vector<16x32xf32> to vector<2x32xf32>
    %cst_111 = arith.constant dense<0.000000e+00> : vector<2x32xf32>
    %339 = tpu.matmul %337, %6, %cst_111 {dimension_numbers = #tpu.dot_dimension_numbers<[1], [0], [0], [1], [0, 0, 1, 1], [], []>} : vector<2x32xf32>, vector<32x32xf32>, vector<2x32xf32> -> vector<2x32xf32>
    %340 = arith.addf %338, %339 : vector<2x32xf32>
    %cst_112 = arith.constant dense<0.000000e+00> : vector<2x32xf32>
    %341 = tpu.matmul %308, %7, %cst_112 {dimension_numbers = #tpu.dot_dimension_numbers<[1], [0], [0], [1], [0, 0, 1, 1], [], []>} : vector<2x64xf32>, vector<64x32xf32>, vector<2x32xf32> -> vector<2x32xf32>
    %342 = arith.addf %340, %341 : vector<2x32xf32>
    %c0_113 = arith.constant 0 : index
    %c128 = arith.constant 128 : index
    %343 = vector.load %arg16[%c0_113, %c128] : memref<2x256xf32, #tpu.memory_space<vmem>>, vector<2x32xf32>
    tpu.vector_store %arg16[%c0_113, %c128], %337 {strides = array<i32>} : memref<2x256xf32, #tpu.memory_space<vmem>>, vector<2x32xf32>,
    %c0_114 = arith.constant 0 : index
    %c128_115 = arith.constant 128 : index
    %344 = vector.load %arg18[%c0_114, %c128_115] : memref<2x256xf32, #tpu.memory_space<vmem>>, vector<2x32xf32>
    tpu.vector_store %arg18[%c0_114, %c128_115], %342 {strides = array<i32>} : memref<2x256xf32, #tpu.memory_space<vmem>>, vector<2x32xf32>,
    %c0_116 = arith.constant 0 : index
    %c0_117 = arith.constant 0 : index
    %c4 = arith.constant 4 : index
    %345 = vector.load %arg19[%c0_116, %c0_117, %c4] : memref<2x8x8xf32, #tpu.memory_space<vmem>>, vector<2x8x1xf32>
    tpu.vector_store %arg19[%c0_116, %c0_117, %c4], %305 {strides = array<i32>} : memref<2x8x8xf32, #tpu.memory_space<vmem>>, vector<2x8x1xf32>,
    %cst_118 = arith.constant dense<0.000000e+00> : vector<2x128xf32>
    %346 = tpu.matmul %337, %2, %cst_118 {dimension_numbers = #tpu.dot_dimension_numbers<[1], [0], [0], [1], [0, 0, 1, 1], [], []>} : vector<2x32xf32>, vector<32x128xf32>, vector<2x128xf32> -> vector<2x128xf32>
    %347 = vector.extract_strided_slice %346 {offsets = [0, 0], sizes = [2, 32], strides = [1, 1]} : vector<2x128xf32> to vector<2x32xf32>
    %348 = vector.extract_strided_slice %346 {offsets = [0, 32], sizes = [2, 96], strides = [1, 1]} : vector<2x128xf32> to vector<2x96xf32>
    %349 = vector.broadcast %5 : vector<1x96xf32> to vector<2x96xf32>
    %350 = arith.addf %348, %349 : vector<2x96xf32>
    %351 = vector.shape_cast %347 : vector<2x32xf32> to vector<2x1x32xf32>
    %352 = vector.shape_cast %351 : vector<2x1x32xf32> to vector<2x1x32xf32>
    %353 = vector.broadcast %352 : vector<2x1x32xf32> to vector<2x8x32xf32>
    %354 = vector.shape_cast %353 : vector<2x8x32xf32> to vector<16x32xf32>
    %355 = arith.addf %354, %17 : vector<16x32xf32>
    %356 = math.tanh %355 : vector<16x32xf32>
    %cst_119 = arith.constant dense<0.000000e+00> : vector<16x1xf32>
    %357 = tpu.matmul %356, %3, %cst_119 {dimension_numbers = #tpu.dot_dimension_numbers<[1], [0], [0], [1], [0, 0, 1, 1], [], []>} : vector<16x32xf32>, vector<32x1xf32>, vector<16x1xf32> -> vector<16x1xf32>
    %358 = vector.shape_cast %357 : vector<16x1xf32> to vector<2x8x1xf32>
    %359 = arith.addf %358, %1 : vector<2x8x1xf32>
    %cst_120 = arith.constant dense<0xFF800000> : vector<2x1xf32>
    %360 = vector.multi_reduction <maximumf>, %359, %cst_120 [1] : vector<2x8x1xf32> to vector<2x1xf32>
    %361 = vector.shape_cast %360 : vector<2x1xf32> to vector<2x1x1xf32>
    %362 = vector.broadcast %361 : vector<2x1x1xf32> to vector<2x8x1xf32>
    %363 = arith.subf %359, %362 : vector<2x8x1xf32>
    %364 = math.exp %363 : vector<2x8x1xf32>
    %cst_121 = arith.constant dense<0.000000e+00> : vector<2x1xf32>
    %365 = vector.multi_reduction <add>, %364, %cst_121 [1] : vector<2x8x1xf32> to vector<2x1xf32>
    %366 = vector.shape_cast %365 : vector<2x1xf32> to vector<2x1x1xf32>
    %367 = tpu.reciprocal %366 {approx = true} : vector<2x1x1xf32> -> vector<2x1x1xf32>
    %368 = vector.broadcast %367 : vector<2x1x1xf32> to vector<2x8x1xf32>
    %369 = arith.mulf %364, %368 : vector<2x8x1xf32>
    %370 = vector.broadcast %369 : vector<2x8x1xf32> to vector<2x8x64xf32>
    %371 = arith.mulf %370, %0 : vector<2x8x64xf32>
    %cst_122 = arith.constant dense<0.000000e+00> : vector<2x64xf32>
    %372 = vector.multi_reduction <add>, %371, %cst_122 [1] : vector<2x8x64xf32> to vector<2x64xf32>
    %373 = vector.extract_strided_slice %23 {offsets = [10, 0], sizes = [2, 96], strides = [1, 1]} : vector<16x96xf32> to vector<2x96xf32>
    %cst_123 = arith.constant dense<0.000000e+00> : vector<2x96xf32>
    %374 = tpu.matmul %372, %4, %cst_123 {dimension_numbers = #tpu.dot_dimension_numbers<[1], [0], [0], [1], [0, 0, 1, 1], [], []>} : vector<2x64xf32>, vector<64x96xf32>, vector<2x96xf32> -> vector<2x96xf32>
    %375 = arith.addf %373, %374 : vector<2x96xf32>
    %376 = vector.extract_strided_slice %375 {offsets = [0, 0], sizes = [2, 32], strides = [1, 1]} : vector<2x96xf32> to vector<2x32xf32>
    %377 = vector.extract_strided_slice %350 {offsets = [0, 0], sizes = [2, 32], strides = [1, 1]} : vector<2x96xf32> to vector<2x32xf32>
    %378 = arith.addf %376, %377 : vector<2x32xf32>
    %379 = arith.negf %378 : vector<2x32xf32>
    %380 = math.exp %379 : vector<2x32xf32>
    %cst_124 = arith.constant 1.000000e+00 : f32
    %381 = vector.broadcast %cst_124 : f32 to vector<2x32xf32>
    %382 = arith.addf %381, %380 : vector<2x32xf32>
    %383 = arith.divf %381, %382 : vector<2x32xf32>
    %384 = vector.extract_strided_slice %375 {offsets = [0, 32], sizes = [2, 32], strides = [1, 1]} : vector<2x96xf32> to vector<2x32xf32>
    %385 = vector.extract_strided_slice %350 {offsets = [0, 32], sizes = [2, 32], strides = [1, 1]} : vector<2x96xf32> to vector<2x32xf32>
    %386 = arith.addf %384, %385 : vector<2x32xf32>
    %387 = arith.negf %386 : vector<2x32xf32>
    %388 = math.exp %387 : vector<2x32xf32>
    %cst_125 = arith.constant 1.000000e+00 : f32
    %389 = vector.broadcast %cst_125 : f32 to vector<2x32xf32>
    %390 = arith.addf %389, %388 : vector<2x32xf32>
    %391 = arith.divf %389, %390 : vector<2x32xf32>
    %392 = vector.extract_strided_slice %375 {offsets = [0, 64], sizes = [2, 32], strides = [1, 1]} : vector<2x96xf32> to vector<2x32xf32>
    %393 = vector.extract_strided_slice %350 {offsets = [0, 64], sizes = [2, 32], strides = [1, 1]} : vector<2x96xf32> to vector<2x32xf32>
    %394 = arith.mulf %383, %393 : vector<2x32xf32>
    %395 = arith.addf %392, %394 : vector<2x32xf32>
    %396 = math.tanh %395 : vector<2x32xf32>
    %cst_126 = arith.constant 1.000000e+00 : f32
    %397 = vector.broadcast %cst_126 : f32 to vector<2x32xf32>
    %398 = arith.subf %397, %391 : vector<2x32xf32>
    %399 = arith.mulf %398, %396 : vector<2x32xf32>
    %400 = arith.mulf %391, %337 : vector<2x32xf32>
    %401 = arith.addf %399, %400 : vector<2x32xf32>
    %402 = vector.extract_strided_slice %25 {offsets = [10, 0], sizes = [2, 32], strides = [1, 1]} : vector<16x32xf32> to vector<2x32xf32>
    %cst_127 = arith.constant dense<0.000000e+00> : vector<2x32xf32>
    %403 = tpu.matmul %401, %6, %cst_127 {dimension_numbers = #tpu.dot_dimension_numbers<[1], [0], [0], [1], [0, 0, 1, 1], [], []>} : vector<2x32xf32>, vector<32x32xf32>, vector<2x32xf32> -> vector<2x32xf32>
    %404 = arith.addf %402, %403 : vector<2x32xf32>
    %cst_128 = arith.constant dense<0.000000e+00> : vector<2x32xf32>
    %405 = tpu.matmul %372, %7, %cst_128 {dimension_numbers = #tpu.dot_dimension_numbers<[1], [0], [0], [1], [0, 0, 1, 1], [], []>} : vector<2x64xf32>, vector<64x32xf32>, vector<2x32xf32> -> vector<2x32xf32>
    %406 = arith.addf %404, %405 : vector<2x32xf32>
    %c0_129 = arith.constant 0 : index
    %c160 = arith.constant 160 : index
    %407 = vector.load %arg16[%c0_129, %c160] : memref<2x256xf32, #tpu.memory_space<vmem>>, vector<2x32xf32>
    tpu.vector_store %arg16[%c0_129, %c160], %401 {strides = array<i32>} : memref<2x256xf32, #tpu.memory_space<vmem>>, vector<2x32xf32>,
    %c0_130 = arith.constant 0 : index
    %c160_131 = arith.constant 160 : index
    %408 = vector.load %arg18[%c0_130, %c160_131] : memref<2x256xf32, #tpu.memory_space<vmem>>, vector<2x32xf32>
    tpu.vector_store %arg18[%c0_130, %c160_131], %406 {strides = array<i32>} : memref<2x256xf32, #tpu.memory_space<vmem>>, vector<2x32xf32>,
    %c0_132 = arith.constant 0 : index
    %c0_133 = arith.constant 0 : index
    %c5 = arith.constant 5 : index
    %409 = vector.load %arg19[%c0_132, %c0_133, %c5] : memref<2x8x8xf32, #tpu.memory_space<vmem>>, vector<2x8x1xf32>
    tpu.vector_store %arg19[%c0_132, %c0_133, %c5], %369 {strides = array<i32>} : memref<2x8x8xf32, #tpu.memory_space<vmem>>, vector<2x8x1xf32>,
    %cst_134 = arith.constant dense<0.000000e+00> : vector<2x128xf32>
    %410 = tpu.matmul %401, %2, %cst_134 {dimension_numbers = #tpu.dot_dimension_numbers<[1], [0], [0], [1], [0, 0, 1, 1], [], []>} : vector<2x32xf32>, vector<32x128xf32>, vector<2x128xf32> -> vector<2x128xf32>
    %411 = vector.extract_strided_slice %410 {offsets = [0, 0], sizes = [2, 32], strides = [1, 1]} : vector<2x128xf32> to vector<2x32xf32>
    %412 = vector.extract_strided_slice %410 {offsets = [0, 32], sizes = [2, 96], strides = [1, 1]} : vector<2x128xf32> to vector<2x96xf32>
    %413 = vector.broadcast %5 : vector<1x96xf32> to vector<2x96xf32>
    %414 = arith.addf %412, %413 : vector<2x96xf32>
    %415 = vector.shape_cast %411 : vector<2x32xf32> to vector<2x1x32xf32>
    %416 = vector.shape_cast %415 : vector<2x1x32xf32> to vector<2x1x32xf32>
    %417 = vector.broadcast %416 : vector<2x1x32xf32> to vector<2x8x32xf32>
    %418 = vector.shape_cast %417 : vector<2x8x32xf32> to vector<16x32xf32>
    %419 = arith.addf %418, %17 : vector<16x32xf32>
    %420 = math.tanh %419 : vector<16x32xf32>
    %cst_135 = arith.constant dense<0.000000e+00> : vector<16x1xf32>
    %421 = tpu.matmul %420, %3, %cst_135 {dimension_numbers = #tpu.dot_dimension_numbers<[1], [0], [0], [1], [0, 0, 1, 1], [], []>} : vector<16x32xf32>, vector<32x1xf32>, vector<16x1xf32> -> vector<16x1xf32>
    %422 = vector.shape_cast %421 : vector<16x1xf32> to vector<2x8x1xf32>
    %423 = arith.addf %422, %1 : vector<2x8x1xf32>
    %cst_136 = arith.constant dense<0xFF800000> : vector<2x1xf32>
    %424 = vector.multi_reduction <maximumf>, %423, %cst_136 [1] : vector<2x8x1xf32> to vector<2x1xf32>
    %425 = vector.shape_cast %424 : vector<2x1xf32> to vector<2x1x1xf32>
    %426 = vector.broadcast %425 : vector<2x1x1xf32> to vector<2x8x1xf32>
    %427 = arith.subf %423, %426 : vector<2x8x1xf32>
    %428 = math.exp %427 : vector<2x8x1xf32>
    %cst_137 = arith.constant dense<0.000000e+00> : vector<2x1xf32>
    %429 = vector.multi_reduction <add>, %428, %cst_137 [1] : vector<2x8x1xf32> to vector<2x1xf32>
    %430 = vector.shape_cast %429 : vector<2x1xf32> to vector<2x1x1xf32>
    %431 = tpu.reciprocal %430 {approx = true} : vector<2x1x1xf32> -> vector<2x1x1xf32>
    %432 = vector.broadcast %431 : vector<2x1x1xf32> to vector<2x8x1xf32>
    %433 = arith.mulf %428, %432 : vector<2x8x1xf32>
    %434 = vector.broadcast %433 : vector<2x8x1xf32> to vector<2x8x64xf32>
    %435 = arith.mulf %434, %0 : vector<2x8x64xf32>
    %cst_138 = arith.constant dense<0.000000e+00> : vector<2x64xf32>
    %436 = vector.multi_reduction <add>, %435, %cst_138 [1] : vector<2x8x64xf32> to vector<2x64xf32>
    %437 = vector.extract_strided_slice %23 {offsets = [12, 0], sizes = [2, 96], strides = [1, 1]} : vector<16x96xf32> to vector<2x96xf32>
    %cst_139 = arith.constant dense<0.000000e+00> : vector<2x96xf32>
    %438 = tpu.matmul %436, %4, %cst_139 {dimension_numbers = #tpu.dot_dimension_numbers<[1], [0], [0], [1], [0, 0, 1, 1], [], []>} : vector<2x64xf32>, vector<64x96xf32>, vector<2x96xf32> -> vector<2x96xf32>
    %439 = arith.addf %437, %438 : vector<2x96xf32>
    %440 = vector.extract_strided_slice %439 {offsets = [0, 0], sizes = [2, 32], strides = [1, 1]} : vector<2x96xf32> to vector<2x32xf32>
    %441 = vector.extract_strided_slice %414 {offsets = [0, 0], sizes = [2, 32], strides = [1, 1]} : vector<2x96xf32> to vector<2x32xf32>
    %442 = arith.addf %440, %441 : vector<2x32xf32>
    %443 = arith.negf %442 : vector<2x32xf32>
    %444 = math.exp %443 : vector<2x32xf32>
    %cst_140 = arith.constant 1.000000e+00 : f32
    %445 = vector.broadcast %cst_140 : f32 to vector<2x32xf32>
    %446 = arith.addf %445, %444 : vector<2x32xf32>
    %447 = arith.divf %445, %446 : vector<2x32xf32>
    %448 = vector.extract_strided_slice %439 {offsets = [0, 32], sizes = [2, 32], strides = [1, 1]} : vector<2x96xf32> to vector<2x32xf32>
    %449 = vector.extract_strided_slice %414 {offsets = [0, 32], sizes = [2, 32], strides = [1, 1]} : vector<2x96xf32> to vector<2x32xf32>
    %450 = arith.addf %448, %449 : vector<2x32xf32>
    %451 = arith.negf %450 : vector<2x32xf32>
    %452 = math.exp %451 : vector<2x32xf32>
    %cst_141 = arith.constant 1.000000e+00 : f32
    %453 = vector.broadcast %cst_141 : f32 to vector<2x32xf32>
    %454 = arith.addf %453, %452 : vector<2x32xf32>
    %455 = arith.divf %453, %454 : vector<2x32xf32>
    %456 = vector.extract_strided_slice %439 {offsets = [0, 64], sizes = [2, 32], strides = [1, 1]} : vector<2x96xf32> to vector<2x32xf32>
    %457 = vector.extract_strided_slice %414 {offsets = [0, 64], sizes = [2, 32], strides = [1, 1]} : vector<2x96xf32> to vector<2x32xf32>
    %458 = arith.mulf %447, %457 : vector<2x32xf32>
    %459 = arith.addf %456, %458 : vector<2x32xf32>
    %460 = math.tanh %459 : vector<2x32xf32>
    %cst_142 = arith.constant 1.000000e+00 : f32
    %461 = vector.broadcast %cst_142 : f32 to vector<2x32xf32>
    %462 = arith.subf %461, %455 : vector<2x32xf32>
    %463 = arith.mulf %462, %460 : vector<2x32xf32>
    %464 = arith.mulf %455, %401 : vector<2x32xf32>
    %465 = arith.addf %463, %464 : vector<2x32xf32>
    %466 = vector.extract_strided_slice %25 {offsets = [12, 0], sizes = [2, 32], strides = [1, 1]} : vector<16x32xf32> to vector<2x32xf32>
    %cst_143 = arith.constant dense<0.000000e+00> : vector<2x32xf32>
    %467 = tpu.matmul %465, %6, %cst_143 {dimension_numbers = #tpu.dot_dimension_numbers<[1], [0], [0], [1], [0, 0, 1, 1], [], []>} : vector<2x32xf32>, vector<32x32xf32>, vector<2x32xf32> -> vector<2x32xf32>
    %468 = arith.addf %466, %467 : vector<2x32xf32>
    %cst_144 = arith.constant dense<0.000000e+00> : vector<2x32xf32>
    %469 = tpu.matmul %436, %7, %cst_144 {dimension_numbers = #tpu.dot_dimension_numbers<[1], [0], [0], [1], [0, 0, 1, 1], [], []>} : vector<2x64xf32>, vector<64x32xf32>, vector<2x32xf32> -> vector<2x32xf32>
    %470 = arith.addf %468, %469 : vector<2x32xf32>
    %c0_145 = arith.constant 0 : index
    %c192 = arith.constant 192 : index
    %471 = vector.load %arg16[%c0_145, %c192] : memref<2x256xf32, #tpu.memory_space<vmem>>, vector<2x32xf32>
    tpu.vector_store %arg16[%c0_145, %c192], %465 {strides = array<i32>} : memref<2x256xf32, #tpu.memory_space<vmem>>, vector<2x32xf32>,
    %c0_146 = arith.constant 0 : index
    %c192_147 = arith.constant 192 : index
    %472 = vector.load %arg18[%c0_146, %c192_147] : memref<2x256xf32, #tpu.memory_space<vmem>>, vector<2x32xf32>
    tpu.vector_store %arg18[%c0_146, %c192_147], %470 {strides = array<i32>} : memref<2x256xf32, #tpu.memory_space<vmem>>, vector<2x32xf32>,
    %c0_148 = arith.constant 0 : index
    %c0_149 = arith.constant 0 : index
    %c6 = arith.constant 6 : index
    %473 = vector.load %arg19[%c0_148, %c0_149, %c6] : memref<2x8x8xf32, #tpu.memory_space<vmem>>, vector<2x8x1xf32>
    tpu.vector_store %arg19[%c0_148, %c0_149, %c6], %433 {strides = array<i32>} : memref<2x8x8xf32, #tpu.memory_space<vmem>>, vector<2x8x1xf32>,
    %cst_150 = arith.constant dense<0.000000e+00> : vector<2x128xf32>
    %474 = tpu.matmul %465, %2, %cst_150 {dimension_numbers = #tpu.dot_dimension_numbers<[1], [0], [0], [1], [0, 0, 1, 1], [], []>} : vector<2x32xf32>, vector<32x128xf32>, vector<2x128xf32> -> vector<2x128xf32>
    %475 = vector.extract_strided_slice %474 {offsets = [0, 0], sizes = [2, 32], strides = [1, 1]} : vector<2x128xf32> to vector<2x32xf32>
    %476 = vector.extract_strided_slice %474 {offsets = [0, 32], sizes = [2, 96], strides = [1, 1]} : vector<2x128xf32> to vector<2x96xf32>
    %477 = vector.broadcast %5 : vector<1x96xf32> to vector<2x96xf32>
    %478 = arith.addf %476, %477 : vector<2x96xf32>
    %479 = vector.shape_cast %475 : vector<2x32xf32> to vector<2x1x32xf32>
    %480 = vector.shape_cast %479 : vector<2x1x32xf32> to vector<2x1x32xf32>
    %481 = vector.broadcast %480 : vector<2x1x32xf32> to vector<2x8x32xf32>
    %482 = vector.shape_cast %481 : vector<2x8x32xf32> to vector<16x32xf32>
    %483 = arith.addf %482, %17 : vector<16x32xf32>
    %484 = math.tanh %483 : vector<16x32xf32>
    %cst_151 = arith.constant dense<0.000000e+00> : vector<16x1xf32>
    %485 = tpu.matmul %484, %3, %cst_151 {dimension_numbers = #tpu.dot_dimension_numbers<[1], [0], [0], [1], [0, 0, 1, 1], [], []>} : vector<16x32xf32>, vector<32x1xf32>, vector<16x1xf32> -> vector<16x1xf32>
    %486 = vector.shape_cast %485 : vector<16x1xf32> to vector<2x8x1xf32>
    %487 = arith.addf %486, %1 : vector<2x8x1xf32>
    %cst_152 = arith.constant dense<0xFF800000> : vector<2x1xf32>
    %488 = vector.multi_reduction <maximumf>, %487, %cst_152 [1] : vector<2x8x1xf32> to vector<2x1xf32>
    %489 = vector.shape_cast %488 : vector<2x1xf32> to vector<2x1x1xf32>
    %490 = vector.broadcast %489 : vector<2x1x1xf32> to vector<2x8x1xf32>
    %491 = arith.subf %487, %490 : vector<2x8x1xf32>
    %492 = math.exp %491 : vector<2x8x1xf32>
    %cst_153 = arith.constant dense<0.000000e+00> : vector<2x1xf32>
    %493 = vector.multi_reduction <add>, %492, %cst_153 [1] : vector<2x8x1xf32> to vector<2x1xf32>
    %494 = vector.shape_cast %493 : vector<2x1xf32> to vector<2x1x1xf32>
    %495 = tpu.reciprocal %494 {approx = true} : vector<2x1x1xf32> -> vector<2x1x1xf32>
    %496 = vector.broadcast %495 : vector<2x1x1xf32> to vector<2x8x1xf32>
    %497 = arith.mulf %492, %496 : vector<2x8x1xf32>
    %498 = vector.broadcast %497 : vector<2x8x1xf32> to vector<2x8x64xf32>
    %499 = arith.mulf %498, %0 : vector<2x8x64xf32>
    %cst_154 = arith.constant dense<0.000000e+00> : vector<2x64xf32>
    %500 = vector.multi_reduction <add>, %499, %cst_154 [1] : vector<2x8x64xf32> to vector<2x64xf32>
    %501 = vector.extract_strided_slice %23 {offsets = [14, 0], sizes = [2, 96], strides = [1, 1]} : vector<16x96xf32> to vector<2x96xf32>
    %cst_155 = arith.constant dense<0.000000e+00> : vector<2x96xf32>
    %502 = tpu.matmul %500, %4, %cst_155 {dimension_numbers = #tpu.dot_dimension_numbers<[1], [0], [0], [1], [0, 0, 1, 1], [], []>} : vector<2x64xf32>, vector<64x96xf32>, vector<2x96xf32> -> vector<2x96xf32>
    %503 = arith.addf %501, %502 : vector<2x96xf32>
    %504 = vector.extract_strided_slice %503 {offsets = [0, 0], sizes = [2, 32], strides = [1, 1]} : vector<2x96xf32> to vector<2x32xf32>
    %505 = vector.extract_strided_slice %478 {offsets = [0, 0], sizes = [2, 32], strides = [1, 1]} : vector<2x96xf32> to vector<2x32xf32>
    %506 = arith.addf %504, %505 : vector<2x32xf32>
    %507 = arith.negf %506 : vector<2x32xf32>
    %508 = math.exp %507 : vector<2x32xf32>
    %cst_156 = arith.constant 1.000000e+00 : f32
    %509 = vector.broadcast %cst_156 : f32 to vector<2x32xf32>
    %510 = arith.addf %509, %508 : vector<2x32xf32>
    %511 = arith.divf %509, %510 : vector<2x32xf32>
    %512 = vector.extract_strided_slice %503 {offsets = [0, 32], sizes = [2, 32], strides = [1, 1]} : vector<2x96xf32> to vector<2x32xf32>
    %513 = vector.extract_strided_slice %478 {offsets = [0, 32], sizes = [2, 32], strides = [1, 1]} : vector<2x96xf32> to vector<2x32xf32>
    %514 = arith.addf %512, %513 : vector<2x32xf32>
    %515 = arith.negf %514 : vector<2x32xf32>
    %516 = math.exp %515 : vector<2x32xf32>
    %cst_157 = arith.constant 1.000000e+00 : f32
    %517 = vector.broadcast %cst_157 : f32 to vector<2x32xf32>
    %518 = arith.addf %517, %516 : vector<2x32xf32>
    %519 = arith.divf %517, %518 : vector<2x32xf32>
    %520 = vector.extract_strided_slice %503 {offsets = [0, 64], sizes = [2, 32], strides = [1, 1]} : vector<2x96xf32> to vector<2x32xf32>
    %521 = vector.extract_strided_slice %478 {offsets = [0, 64], sizes = [2, 32], strides = [1, 1]} : vector<2x96xf32> to vector<2x32xf32>
    %522 = arith.mulf %511, %521 : vector<2x32xf32>
    %523 = arith.addf %520, %522 : vector<2x32xf32>
    %524 = math.tanh %523 : vector<2x32xf32>
    %cst_158 = arith.constant 1.000000e+00 : f32
    %525 = vector.broadcast %cst_158 : f32 to vector<2x32xf32>
    %526 = arith.subf %525, %519 : vector<2x32xf32>
    %527 = arith.mulf %526, %524 : vector<2x32xf32>
    %528 = arith.mulf %519, %465 : vector<2x32xf32>
    %529 = arith.addf %527, %528 : vector<2x32xf32>
    %530 = vector.extract_strided_slice %25 {offsets = [14, 0], sizes = [2, 32], strides = [1, 1]} : vector<16x32xf32> to vector<2x32xf32>
    %cst_159 = arith.constant dense<0.000000e+00> : vector<2x32xf32>
    %531 = tpu.matmul %529, %6, %cst_159 {dimension_numbers = #tpu.dot_dimension_numbers<[1], [0], [0], [1], [0, 0, 1, 1], [], []>} : vector<2x32xf32>, vector<32x32xf32>, vector<2x32xf32> -> vector<2x32xf32>
    %532 = arith.addf %530, %531 : vector<2x32xf32>
    %cst_160 = arith.constant dense<0.000000e+00> : vector<2x32xf32>
    %533 = tpu.matmul %500, %7, %cst_160 {dimension_numbers = #tpu.dot_dimension_numbers<[1], [0], [0], [1], [0, 0, 1, 1], [], []>} : vector<2x64xf32>, vector<64x32xf32>, vector<2x32xf32> -> vector<2x32xf32>
    %534 = arith.addf %532, %533 : vector<2x32xf32>
    %c0_161 = arith.constant 0 : index
    %c224 = arith.constant 224 : index
    %535 = vector.load %arg16[%c0_161, %c224] : memref<2x256xf32, #tpu.memory_space<vmem>>, vector<2x32xf32>
    tpu.vector_store %arg16[%c0_161, %c224], %529 {strides = array<i32>} : memref<2x256xf32, #tpu.memory_space<vmem>>, vector<2x32xf32>,
    %c0_162 = arith.constant 0 : index
    %c224_163 = arith.constant 224 : index
    %536 = vector.load %arg18[%c0_162, %c224_163] : memref<2x256xf32, #tpu.memory_space<vmem>>, vector<2x32xf32>
    tpu.vector_store %arg18[%c0_162, %c224_163], %534 {strides = array<i32>} : memref<2x256xf32, #tpu.memory_space<vmem>>, vector<2x32xf32>,
    %c0_164 = arith.constant 0 : index
    %c0_165 = arith.constant 0 : index
    %c7 = arith.constant 7 : index
    %537 = vector.load %arg19[%c0_164, %c0_165, %c7] : memref<2x8x8xf32, #tpu.memory_space<vmem>>, vector<2x8x1xf32>
    tpu.vector_store %arg19[%c0_164, %c0_165, %c7], %497 {strides = array<i32>} : memref<2x8x8xf32, #tpu.memory_space<vmem>>, vector<2x8x1xf32>,
    %c0_166 = arith.constant 0 : index
    %c0_167 = arith.constant 0 : index
    %c0_168 = arith.constant 0 : index
    %538 = vector.load %arg17[%c0_166, %c0_167, %c0_168] : memref<1x2x32xf32, #tpu.memory_space<vmem>>, vector<1x2x32xf32>
    %539 = vector.shape_cast %538 : vector<1x2x32xf32> to vector<2x32xf32>
    %540 = vector.shape_cast %529 : vector<2x32xf32> to vector<1x2x32xf32>
    tpu.vector_store %arg17[%c0_166, %c0_167, %c0_168], %540 {strides = array<i32>} : memref<1x2x32xf32, #tpu.memory_space<vmem>>, vector<1x2x32xf32>,
    return
  }
}

</mosaic_0001>

<bundles_post_ra>
// kernel: tpu_custom_call.1
= control target key start
LH: loop header
LB: loop body
LE: loop exit
PB: predicated region body
PF: predicated region fallthrough
CT: control target
= control target key end

     0   :  { %s7829_s0 = inlined_call_operand.vmem [shape: f32[16,32], index: 0, kind: input, shape index: {}]   ;;  %s7830_s1 = inlined_call_operand.vmem [shape: f32[2,8,64], index: 1, kind: input, shape index: {}]   ;;  %s7831_s2 = inlined_call_operand.vmem [shape: f32[2,64], index: 2, kind: input, shape index: {}]   ;;  %s7832_s3 = inlined_call_operand.vmem [shape: f32[2,8,1], index: 3, kind: input, shape index: {}]   ;;  %s7833_s4 = inlined_call_operand.vmem [shape: f32[64,32], index: 4, kind: input, shape index: {}]   ;;  %s7834_s5 = inlined_call_operand.vmem [shape: f32[1,32], index: 5, kind: input, shape index: {}]   ;;  %s7835_s6 = inlined_call_operand.vmem [shape: f32[64,32], index: 6, kind: input, shape index: {}]   ;;  %s7836_s7 = inlined_call_operand.vmem [shape: f32[32,128], index: 7, kind: input, shape index: {}]   ;;  %s7837_s8 = inlined_call_operand.vmem [shape: f32[32,1], index: 8, kind: input, shape index: {}]   ;;  %s7838_s9 = inlined_call_operand.vmem [shape: f32[32,96], index: 9, kind: input, shape index: {}]   ;;  %s7839_s10 = inlined_call_operand.vmem [shape: f32[64,96], index: 10, kind: input, shape index: {}]   ;;  %s7840_s11 = inlined_call_operand.vmem [shape: f32[1,96], index: 11, kind: input, shape index: {}]   ;;  %s7841_s12 = inlined_call_operand.vmem [shape: f32[1,96], index: 12, kind: input, shape index: {}]   ;;  %s7842_s13 = inlined_call_operand.vmem [shape: f32[32,32], index: 13, kind: input, shape index: {}]   ;;  %s7843_s14 = inlined_call_operand.vmem [shape: f32[32,32], index: 14, kind: input, shape index: {}]   ;;  %s7844_s15 = inlined_call_operand.vmem [shape: f32[64,32], index: 15, kind: input, shape index: {}]   ;;  %s7845_s16 = inlined_call_operand.hbm [shape: f32[2,256], index: 16, kind: output, shape index: {0}]   ;;  %s7846_s17 = inlined_call_operand.hbm [shape: f32[1,2,32], index: 17, kind: output, shape index: {1}]   ;;  %s7847_s18 = inlined_call_operand.hbm [shape: f32[2,256], index: 18, kind: output, shape index: {2}]   ;;  %s7848_s19 = inlined_call_operand.hbm [shape: f32[2,8,8], index: 19, kind: output, shape index: {3}]  }
   0x1   :  { %7860 = sst [smem:[#allocation17_spill]] %s7829_s0 }
   0x2   :  { %7861 = sst [smem:[#allocation18_spill]] %s7830_s1 }
   0x3   :  { %7862 = sst [smem:[#allocation19_spill]] %s7831_s2 }
   0x4   :  { %7863 = sst [smem:[#allocation20_spill]] %s7832_s3 }
   0x5   :  { %25 = vsyncpa [#allocation3], 0 }
   0x6   :  { %26 = vsyncpa [#allocation5], 0  ;;  %v94_v0 = vld [vmem:[%s7833_s4] sm:$0xff]  ;;  %v95_v1 = vld [vmem:[%s7833_s4 + $0x8] sm:$0xff]  ;;  %v7853_v3 = vmov 0.0|0.0   ;;  %vm6575_vm0 = vmmov 0  }
   0x7   :  { %v96_v2 = vld [vmem:[%s7833_s4 + $0x10] sm:$0xff]  ;;  %5900 = vmatprep.subr.bf16.mxu0 %v7853_v3  ;;  %v5901_v4 = vpack.c.bf16 %v95_v1, %v94_v0  ;;  %v97_v5 = vld [vmem:[%s7833_s4 + $0x18] sm:$0xff]  ;;  %v7855_v6 = vmov 0.0  }
   0x8   :  { %5288 = vmatprep.mubr.msk.f32.mxu0 %vm6575_vm0, %v7855_v6  ;;  %v5904_v7 = vpack.c.bf16 %v97_v5, %v96_v2 }
   0x9   :  { %5902 = vmatpush3.bf16.msra.mxu0 %v5901_v4 }
   0xa   :  { %27 = vsyncpa [#allocation8], 0  ;;  %5903 = vmatprep.subr.bf16.mxu0 %v7853_v3  ;;  %v98_v8 = vld [vmem:[%s7833_s4 + $0x20] sm:$0xff]  ;;  %v99_v9 = vld [vmem:[%s7833_s4 + $0x28] sm:$0xff]  ;;  %s7864_s21 = sld [smem:[#allocation19_spill]]  ;;  %vm109_vm1 = vcmask 523264   ;;  %v533_v1 = vlaneseq }
   0xb   :  { %v5907_v10 = vpack.c.bf16 %v99_v9, %v98_v8  ;;  %v100_v11 = vld [vmem:[%s7833_s4 + $0x30] sm:$0xff]  ;;  %v101_v12 = vld [vmem:[%s7833_s4 + $0x38] sm:$0xff]  ;;  %v184_v15 = vld [vmem:[%s7835_s6] sm:$0xff]  ;;  %s7865_s27 = sld [smem:[#allocation18_spill]]  ;;  %s6577_s22 = smov 32   ;;  %vm286_vm2 = vcmask 261120  }
   0xc   :  { %v5910_v13 = vpack.c.bf16 %v101_v12, %v100_v11  ;;  %v185_v16 = vld [vmem:[%s7835_s6 + $0x8] sm:$0xff]  ;;  %v186_v18 = vld [vmem:[%s7835_s6 + $0x10] sm:$0xff]  ;;  %v187_v19 = vld [vmem:[%s7835_s6 + $0x18] sm:$0xff]  ;;  %s7866_s0 = sld [smem:[#allocation17_spill]]  ;;  %v6578_v63 = vmov 1966171168  }
   0xd   :  { %5905 = vmatpush3.bf16.msra.mxu0 %v5904_v7  ;;  %v5912_v17 = vpack.c.bf16 %v185_v16, %v184_v15  ;;  %v64_v20 = vld [vmem:[%s7836_s7] sm:$0xff]  ;;  %v5916_v21 = vpack.c.bf16 %v187_v19, %v186_v18  ;;  %v65_v22 = vld [vmem:[%s7836_s7 + $0x8] sm:$0xff]  ;;  %v66_v27 = vld [vmem:[%s7836_s7 + $0x10] sm:$0xff]  ;;  %v531_v0 = vunpack.c.l.s4 %v6578_v63  ;;  %v6863_v4 = vshrl.u32 %v533_v1, 7  ;;  %s7867_s29 = sld [smem:[#allocation20_spill]]  ;;  %s6586_s3 = smov 4  }
   0xe   :  { %5906 = vmatprep.subr.bf16.mxu0 %v7853_v3  ;;  %v188_v23 = vld [vmem:[%s7835_s6 + $0x20] sm:$0xff]  ;;  %v189_v24 = vld [vmem:[%s7835_s6 + $0x28] sm:$0xff]  ;;  %v6757_v25 = vpack.c.bf16 %v65_v22, %v64_v20  ;;  %v67_v28 = vld [vmem:[%s7836_s7 + $0x18] sm:$0xff]  ;;  %vm649_vm3 = vcmask 7168   ;;  %vm716_vm4 = vcmask 1041409   ;;  %vm980_vm5 = vcmask 254976  }
   0xf   :  { %5913 = vmatprep.subr.bf16.mxu1 %v5912_v17  ;;  %v5920_v26 = vpack.c.bf16 %v189_v24, %v188_v23  ;;  %v6766_v29 = vpack.c.bf16 %v67_v28, %v66_v27  ;;  %v190_v30 = vld [vmem:[%s7835_s6 + $0x30] sm:$0xff]  ;;  %v191_v31 = vld [vmem:[%s7835_s6 + $0x38] sm:$0xff]  ;;  %v4913_v34 = vld [vmem:[%s7841_s12] ss:$0 sm:$0xff]  ;;  %v532_v2 = vunpack.c.0.s8 %v531_v0  ;;  %v6875_v11 = vsub.s32 0, %v6863_v4  ;;  %s6587_s7 = smov 5  }
  0x10   :  { %v93_v14 = vld [vmem:[%s7864_s21] sm:$0x3]  ;;  %5915 = vmatpush3.bf16.msra.mxu1 %v5912_v17  ;;  %v5924_v32 = vpack.c.bf16 %v191_v31, %v190_v30  ;;  %v276_v36 = vld [vmem:[%s7838_s9 + $0x8] sm:$0xff]  ;;  %525 = vrot.lane.b32.xlu1 %v4913_v34, %s6577_s22  ;;  %v277_v44 = vld [vmem:[%s7838_s9 + $0x10] sm:$0xff]  ;;  %v6580_v30 = vmov 0   ;;  %s6588_s26 = smov 6  }
  0x11   :  { %5908 = vmatpush3.bf16.msra.mxu0 %v5907_v10  ;;  %5917 = vmatprep.subr.bf16.mxu1 %v5916_v21  ;;  %v6780_v33 = vld [vmem:[%s7865_s27] sm:$0xff]  ;;  %v6796_v37 = vld [vmem:[%s7865_s27 + $0x8] sm:$0xff]  ;;  %v278_v45 = vld [vmem:[%s7838_s9 + $0x18] sm:$0xff]  ;;  %v6866_v5 = vsub.s32 %v532_v2, %v6863_v4  ;;  %vm1535_vm6 = vcmask 15368   ;;  %vm2090_vm7 = vcmask 23568   ;;  %vm2647_vm8 = vcmask 31768  }
  0x12   :  { %5909 = vmatprep.subr.bf16.mxu0 %v7853_v3  ;;  %5307 = vmatprep.mubr.msk.f32.mxu1 %vm109_vm1, %v6780_v33  ;;  %v275_v35 = vld [vmem:[%s7838_s9] sm:$0xff]  ;;  %v5932_v46 = vpack.c.bf16 %v278_v45, %v277_v44  ;;  %v369_v48 = vld [vmem:[%s7842_s13 + $0x8] sm:$0xff]  ;;  %v370_v54 = vld [vmem:[%s7842_s13 + $0x10] sm:$0xff]  ;;  %vm1514_vm9 = vcmask 517376   ;;  %vm3176_vm10 = vcmask 39968   ;;  %vm3728_vm11 = vcmask 48168  }
  0x13   :  { %v5928_v38 = vpack.c.bf16 %v276_v36, %v275_v35  ;;  %v4903_v39 = vld [vmem:[%s7834_s5] ss:$0 sm:$0xff]  ;;  %v274_v52 = vld [vmem:[%s7866_s0 + $0x8] sm:$0xff]  ;;  %v371_v55 = vld [vmem:[%s7842_s13 + $0x18] sm:$0xff]  ;;  %6324 = vset.pattern.permute.xlu0 %v6580_v30  ;;  %6325 = vset.pattern.permute.xlu1 %v6580_v30  ;;  %s6585_s5 = smov 3   ;;  %vm2069_vm12 = vcmask 779776  }
  0x14   :  { %5919 = vmatpush3.bf16.msra.mxu1 %v5916_v21  ;;  %v368_v47 = vld [vmem:[%s7842_s13] sm:$0xff]  ;;  %v5940_v56 = vpack.c.bf16 %v371_v55, %v370_v54  ;;  %v69_v58 = vld [vmem:[%s7837_s8 + $0x8] sm:$0xff]  ;;  %v70_v59 = vld [vmem:[%s7837_s8 + $0x10] sm:$0xff]  ;;  %s6584_s13 = smov 2   ;;  %vm4282_vm13 = vcmask 56368   ;;  %vm4844_vm14 = vcmask 261126  }
  0x15   :  { %5911 = vmatpush3.bf16.msra.mxu0 %v5910_v13  ;;  %5921 = vmatprep.subr.bf16.mxu1 %v5920_v26  ;;  %v273_v49 = vld [vmem:[%s7866_s0] sm:$0xff]  ;;  %v5936_v50 = vpack.c.bf16 %v369_v48, %v368_v47  ;;  %v71_v61 = vld [vmem:[%s7837_s8 + $0x18] sm:$0xff]  ;;  %v6906_v31 = vld [vmem:[%s7867_s29 + $0x8] sm:$0xff]  ;;  %vm2625_vm15 = vcmask 1042176  }
  0x16   :  { %5944 = vmatprep.subr.bf16.mxu0 %v7853_v3  ;;  %v68_v57 = vld [vmem:[%s7837_s8] sm:$0xff]  ;;  %v6855_v62 = vpack.c.bf16 %v71_v61, %v70_v59  ;;  %s6579_s8 = smov 96  }
  0x17   :  { %v6850_v60 = vpack.c.bf16 %v69_v58, %v68_v57  ;;  %v6892_v22 = vld [vmem:[%s7840_s11] ss:$0 sm:$0xff]  ;;  %s6591_s11 = smov [#allocation2]  }
  0x18   :  { %5289 = vmatmul.mubr.msk.f32.vlgmr.msra.gmra.mrb[0].mxu0 %vm109_vm1, %v93_v14  ;;  %5923 = vmatpush3.bf16.msra.mxu1 %v5920_v26 }
  0x19   :  { %5340 = vmatprep.mubr.msk.f32.mxu0 %vm6575_vm0, %v7855_v6  ;;  %5946 = vmatpush3.bf16.msra.mxu0 %v6757_v25 }
  0x1a   :  { %5947 = vmatprep.subr.bf16.mxu0 %v7853_v3  ;;  %5925 = vmatprep.subr.bf16.mxu1 %v5924_v32 }
  0x1c   :  { %5927 = vmatpush3.bf16.msra.mxu1 %v5924_v32  ;;  %v6911_v32 = vld [vmem:[%s7867_s29] sm:$0xff] }
  0x1d   :  { %5949 = vmatpush3.bf16.msra.mxu0 %v6766_v29  ;;  %5929 = vmatprep.subr.bf16.mxu1 %v5928_v38 }
  0x1e   :  { %5958 = vmatprep.subr.bf16.mxu0 %v7853_v3 }
  0x1f   :  { %5308 = vmatmul.mubr.msk.f32.vlgmr.msra.gmra.mrb[0].mxu1 %vm109_vm1, %v6796_v37 }
  0x20   :  { %5931 = vmatpush3.bf16.msra.mxu1 %v5928_v38  ;;  %5318 = vmatprep.mubr.msk.f32.mxu1 %vm286_vm2, %v273_v49 }
  0x21   :  { %5933 = vmatprep.subr.bf16.mxu1 %v5932_v46 }
  0x24   :  { %5935 = vmatpush3.bf16.msra.mxu1 %v5932_v46 }
  0x25   :  { %5937 = vmatprep.subr.bf16.mxu1 %v5936_v50 }
  0x27   :  { %5319 = vmatmul.mubr.msk.f32.vlgmr.msra.gmra.mrb[2].mxu1 %vm286_vm2, %v274_v52 }
  0x28   :  { %5939 = vmatpush3.bf16.msra.mxu1 %v5936_v50  ;;  %5329 = vmatprep.mubr.msk.f32.mxu1 %vm286_vm2, %v273_v49 }
  0x29   :  { %5941 = vmatprep.subr.bf16.mxu1 %v5940_v56 }
  0x2c   :  { %5943 = vmatpush3.bf16.msra.mxu1 %v5940_v56 }
  0x2d   :  { %5951 = vmatprep.subr.bf16.mxu1 %v6850_v60 }
  0x2f   :  { %5330 = vmatmul.mubr.msk.f32.vlgmr.msra.gmra.mrb[4].mxu1 %vm286_vm2, %v274_v52 }
  0x30   :  { %5953 = vmatpush3.bf16.msra.mxu1 %v6850_v60 }
  0x31   :  { %5955 = vmatprep.subr.bf16.mxu1 %v6855_v62 }
  0x34   :  { %5957 = vmatpush3.bf16.msra.mxu1 %v6855_v62 }
  0x35   :  { %5970 = vmatprep.subr.bf16.mxu1 %v7853_v3 }
  0x82   :  { %v6868_v7 = vpop.permute.xlu1 %525 }
  0xeb   :  { %v179_v40 = vpop.f32.mrb[0].mxu0 }
  0xec   :  { %v180_v41 = vadd.f32 %v4903_v39, %v179_v40  ;;  %v5290_v42 = vpop.f32.mrb[1].mxu0 }
  0xee   :  { %6326 = vtanh.f32 %v180_v41 }
  0xf2   :  { %v6825_v51 = vpop.f32.mrb[0].mxu1 }
  0xf3   :  { %v6831_v53 = vpop.f32.mrb[1].mxu1 }
  0xf8   :  { %v6804_v43 = vpop.eup %6326 }
  0xf9   :  { %5341 = vmatmul.mubr.msk.f32.vlgmr.msra.gmra.mrb[2].mxu0 %vm286_vm2, %v6804_v43 }
  0xfa   :  { %5370 = vmatprep.mubr.msk.f32.mxu0 %vm6575_vm0, %v7855_v6  ;;  %v5320_v23 = vpop.f32.mrb[2].mxu1 }
  0xfb   :  { %v6895_v24 = vadd.f32 %v5320_v23, %v6892_v22  ;;  %v6897_v26 = vpop.f32.mrb[3].mxu1 }
 0x102   :  { %v6899_v27 = vpop.f32.mrb[4].mxu1 }
 0x103   :  { %v6901_v28 = vpop.f32.mrb[5].mxu1 }
 0x1cc   :  { %v516_v8 = vpop.f32.mrb[2].mxu0 }
 0x1cd   :  { %v6871_v9 = vadd.f32 %v6868_v7, %v516_v8  ;;  %v536_v10 = vrot.slane %v516_v8, %v6866_v5  ;;  %v5342_v12 = vpop.f32.mrb[3].mxu0 }
 0x1cf   :  { %v537_v13 = vcombine.high %v536_v10, %v536_v10  ;;  %v544_v14 = vrot.slane %v536_v10, %v6866_v5  ;;  %792 = vrot.lane.b32.xlu1 %v6871_v9, %s6579_s8 }
 0x1d1   :  { %v551_v15 = vrot.slane %v537_v13, %v6866_v5  ;;  %v555_v16 = vrot.slane %v544_v14, %v6875_v11 }
 0x1d3   :  { %v559_v17 = vrot.slane %v551_v15, %v6875_v11  ;;  %v562_v18 = vadd.f32 %v555_v16, %v6831_v53 }
 0x1d5   :  { %v563_v19 = vadd.f32 %v6825_v51, %v559_v17  ;;  %6328 = vtanh.f32 %v562_v18 }
 0x1d7   :  { %6330 = vtanh.f32 %v563_v19 }
 0x1df   :  { %v6329_v20 = vpop.eup %6328 }
 0x1e0   :  { %5351 = vmatprep.mubr.msk.f32.mxu1 %vm286_vm2, %v6329_v20 }
 0x1e1   :  { %v6331_v21 = vpop.eup %6330 }
 0x1e2   :  { %5352 = vmatmul.mubr.msk.f32.vlgmr.msra.gmra.mrb[6].mxu1 %vm286_vm2, %v6331_v21 }
 0x1e3   :  { %5381 = vmatprep.mubr.msk.f32.mxu1 %vm6575_vm0, %v7855_v6 }
 0x2b5   :  { %v5353_v34 = vpop.f32.mrb[6].mxu1 }
 0x2b6   :  { %v648_v35 = vadd.f32 %v5353_v34, %v6906_v31  ;;  %v638_v36 = vpop.f32.mrb[7].mxu1 }
 0x2b7   :  { %v647_v38 = vadd.f32 %v638_v36, %v6911_v32  ;;  %v73_v36 = vld [vmem:[%s7839_s10 + $0x8] sm:$0xff] }
 0x2b8   :  { %v657_v39 = vsel %vm649_vm3, %v648_v35, -inf }
 0x2b9   :  { %v658_v40 = vrot.slane %v657_v39, 4  ;;  %v650_v41 = vsel %vm649_vm3, %v647_v38, -inf }
 0x2ba   :  { %v651_v42 = vrot.slane %v650_v41, 4 }
 0x2bb   :  { %v659_v44 = vmax.f32 %v657_v39, %v658_v40  ;;  %v74_v39 = vld [vmem:[%s7839_s10 + $0x10] sm:$0xff]  ;;  %v75_v40 = vld [vmem:[%s7839_s10 + $0x18] sm:$0xff] }
 0x2bc   :  { %v652_v45 = vmax.f32 %v650_v41, %v651_v42  ;;  %v6937_v41 = vpack.c.bf16 %v75_v40, %v74_v39  ;;  %v76_v42 = vld [vmem:[%s7839_s10 + $0x20] sm:$0xff]  ;;  %v82_v39 = vld [vmem:[%s7843_s14 + $0x8] sm:$0xff]  ;;  %v83_v40 = vld [vmem:[%s7843_s14 + $0x10] sm:$0xff] }
 0x2bd   :  { %v660_v46 = vrot.slane %v659_v44, 2 }
 0x2be   :  { %v653_v47 = vrot.slane %v652_v45, 2 }
 0x2bf   :  { %v661_v48 = vmax.f32 %v659_v44, %v660_v46  ;;  %v77_v44 = vld [vmem:[%s7839_s10 + $0x28] sm:$0xff]  ;;  %v79_v46 = vld [vmem:[%s7839_s10 + $0x38] sm:$0xff] }
 0x2c0   :  { %v654_v49 = vmax.f32 %v652_v45, %v653_v47  ;;  %v6949_v45 = vpack.c.bf16 %v77_v44, %v76_v42 }
 0x2c1   :  { %v662_v50 = vrot.slane %v661_v48, 1 }
 0x2c2   :  { %v655_v52 = vrot.slane %v654_v49, 1 }
 0x2c3   :  { %v663_v54 = vmax.f32 %v661_v48, %v662_v50 }
 0x2c4   :  { %v656_v55 = vmax.f32 %v654_v49, %v655_v52 }
 0x2c5   :  { %v665_v56 = vsub.f32 %v648_v35, %v663_v54  ;;  %v72_v35 = vld [vmem:[%s7839_s10] sm:$0xff] }
 0x2c6   :  { %v664_v57 = vsub.f32 %v647_v38, %v656_v55  ;;  %v6927_v38 = vpack.c.bf16 %v73_v36, %v72_v35  ;;  %v81_v36 = vld [vmem:[%s7843_s14] sm:$0xff] }
 0x2c7   :  { %v668_v58 = vmul.f32 1.442695, %v665_v56  ;;  %v6995_v42 = vpack.c.bf16 %v82_v39, %v81_v36 }
 0x2c8   :  { %v666_v59 = vmul.f32 1.442695, %v664_v57  ;;  %5960 = vmatpush3.bf16.msra.mxu0 %v6927_v38 }
 0x2c9   :  { %6332 = vpow2.f32 %v668_v58  ;;  %5961 = vmatprep.subr.bf16.mxu0 %v7853_v3  ;;  %5972 = vmatpush3.bf16.msra.mxu1 %v6995_v42 }
 0x2ca   :  { %6334 = vpow2.f32 %v666_v59  ;;  %5973 = vmatprep.subr.bf16.mxu1 %v7853_v3 }
 0x2cc   :  { %5963 = vmatpush3.bf16.msra.mxu0 %v6937_v41 }
 0x2cd   :  { %5964 = vmatprep.subr.bf16.mxu0 %v7853_v3 }
 0x2d0   :  { %5966 = vmatpush3.bf16.msra.mxu0 %v6949_v45 }
 0x2d1   :  { %5967 = vmatprep.subr.bf16.mxu0 %v7853_v3 }
 0x2d3   :  { %v6333_v61 = vpop.eup %6332 }
 0x2d4   :  { %v6335_v63 = vpop.eup %6334  ;;  %v677_v0 = vsel %vm649_vm3, %v6333_v61, 0.0 }
 0x2d5   :  { %v678_v1 = vrot.slane %v677_v0, 4  ;;  %v670_v2 = vsel %vm649_vm3, %v6335_v63, 0.0 }
 0x2d6   :  { %v671_v8 = vrot.slane %v670_v2, 4 }
 0x2d7   :  { %v679_v10 = vadd.f32 %v678_v1, %v677_v0 }
 0x2d8   :  { %v672_v12 = vadd.f32 %v671_v8, %v670_v2 }
 0x2d9   :  { %v680_v13 = vrot.slane %v679_v10, 2 }
 0x2da   :  { %v673_v14 = vrot.slane %v672_v12, 2 }
 0x2db   :  { %v681_v15 = vadd.f32 %v680_v13, %v679_v10 }
 0x2dc   :  { %v674_v16 = vadd.f32 %v673_v14, %v672_v12  ;;  %v6980_v14 = vadd.f32 %v6892_v22, %v6897_v26 }
 0x2dd   :  { %v682_v17 = vrot.slane %v681_v15, 1 }
 0x2de   :  { %v675_v18 = vrot.slane %v674_v16, 1 }
 0x2df   :  { %v683_v19 = vadd.f32 %v682_v17, %v681_v15 }
 0x2e0   :  { %v676_v20 = vadd.f32 %v675_v18, %v674_v16  ;;  %v793_v18 = vpop.permute.xlu1 %792 }
 0x2e1   :  { %6336 = vrcp.f32 %v683_v19 }
 0x2e2   :  { %6338 = vrcp.f32 %v676_v20 }
 0x2eb   :  { %v6337_v21 = vpop.eup %6336 }
 0x2ec   :  { %v6339_v23 = vpop.eup %6338  ;;  %v687_v30 = vmul.f32 %v6337_v21, %v6333_v61 }
 0x2ed   :  { %v686_v34 = vmul.f32 %v6339_v23, %v6335_v63 }
 0x2ee   :  { %984 = vst.msk [vmem:[#allocation7 + $0x8] sm:$0xff] %vm649_vm3, %v687_v30 }
 0x2ef   :  { %690 = vperm.xlu0 %6324, %v686_v34   ;;  %983 = vst.msk [vmem:[#allocation7] sm:$0xff] %vm649_vm3, %v686_v34 }
 0x2f3   :  { %695 = vperm.xlu0 %6324, %v687_v30  }
 0x2f7   :  { %802 = vrot.lane.b32.xlu0 %v6871_v9, %s6577_s22  ;;  %v78_v9 = vld [vmem:[%s7839_s10 + $0x30] sm:$0xff]  ;;  %s6581_s10 = smov 64  }
 0x2f8   :  { %v6959_v47 = vpack.c.bf16 %v79_v46, %v78_v9 }
 0x2fa   :  { %5969 = vmatpush3.bf16.msra.mxu0 %v6959_v47 }
 0x2fb   :  { %5988 = vmatprep.subr.bf16.mxu0 %v7853_v3 }
 0x36e   :  { %v691_v48 = vpop.permute.xlu0 %690 }
 0x36f   :  { %v698_v49 = vmul.f32 %v691_v48, %v6780_v33 }
 0x371   :  { %v700_v50 = vsel %vm109_vm1, %v698_v49, 0.0 }
 0x372   :  { %v701_v52 = vrot.slane %v700_v50, 4  ;;  %v696_v54 = vpop.permute.xlu0 %695 }
 0x373   :  { %v699_v55 = vmul.f32 %v696_v54, %v6796_v37 }
 0x374   :  { %v702_v56 = vadd.f32 %v701_v52, %v700_v50 }
 0x375   :  { %v707_v57 = vsel %vm109_vm1, %v699_v55, 0.0  ;;  %v85_v55 = vld [vmem:[%s7844_s15] sm:$0xff] }
 0x376   :  { %v703_v58 = vrot.slane %v702_v56, 2  ;;  %v708_v59 = vrot.slane %v707_v57, 4  ;;  %v803_v34 = vpop.permute.xlu0 %802 }
 0x378   :  { %v704_v61 = vadd.f32 %v703_v58, %v702_v56  ;;  %v709_v63 = vadd.f32 %v708_v59, %v707_v57  ;;  %v86_v56 = vld [vmem:[%s7844_s15 + $0x8] sm:$0xff]  ;;  %v87_v58 = vld [vmem:[%s7844_s15 + $0x10] sm:$0xff]  ;;  %v88_v59 = vld [vmem:[%s7844_s15 + $0x18] sm:$0xff] }
 0x379   :  { %v7017_v57 = vpack.c.bf16 %v86_v56, %v85_v55 }
 0x37a   :  { %v710_v0 = vrot.slane %v709_v63, 2  ;;  %v705_v1 = vrot.slane %v704_v61, 1 }
 0x37c   :  { %v711_v2 = vadd.f32 %v710_v0, %v709_v63  ;;  %v706_v10 = vadd.f32 %v705_v1, %v704_v61  ;;  %v7028_v63 = vpack.c.bf16 %v88_v59, %v87_v58  ;;  %v89_v0 = vld [vmem:[%s7844_s15 + $0x20] sm:$0xff]  ;;  %v90_v1 = vld [vmem:[%s7844_s15 + $0x28] sm:$0xff] }
 0x37e   :  { %v712_v8 = vrot.slane %v711_v2, 1 }
 0x380   :  { %v713_v12 = vadd.f32 %v712_v8, %v711_v2  ;;  %v7042_v2 = vpack.c.bf16 %v90_v1, %v89_v0  ;;  %v91_v8 = vld [vmem:[%s7844_s15 + $0x30] sm:$0xff] }
 0x382   :  { %v6968_v13 = vsel %vm716_vm4, %v713_v12, %v706_v10  ;;  %v92_v10 = vld [vmem:[%s7844_s15 + $0x38] sm:$0xff]  ;;  %s4852_s15 = sshll.u32 %s6591_s11, 4  ;;  %s4853_s15 = int_to_ptr.vmem [resolvable:$true] %s4852_s15 }
 0x383   :  { %5371 = vmatmul.mubr.msk.f32.vlgmr.msra.gmra.mrb[4].mxu0 %vm109_vm1, %v6968_v13  ;;  %v7054_v12 = vpack.c.bf16 %v92_v10, %v91_v8 }
 0x384   :  { %5990 = vmatpush3.bf16.msra.mxu0 %v6757_v25  ;;  %5411 = vmatprep.mubr.msk.f32.mxu0 %vm6575_vm0, %v7855_v6 }
 0x385   :  { %5991 = vmatprep.subr.bf16.mxu0 %v7853_v3 }
 0x388   :  { %5993 = vmatpush3.bf16.msra.mxu0 %v6766_v29 }
 0x389   :  { %5995 = vmatprep.subr.bf16.mxu0 %v6850_v60 }
 0x456   :  { %v786_v15 = vpop.f32.mrb[4].mxu0 }
 0x457   :  { %v790_v16 = vadd.f32 %v786_v15, %v6980_v14  ;;  %v5372_v17 = vpop.f32.mrb[5].mxu0 }
 0x459   :  { %v795_v19 = vadd.f32 %v793_v18, %v790_v16 }
 0x45b   :  { %v4917_v20 = vmul.f32 -1.442695, %v795_v19 }
 0x45d   :  { %6340 = vpow2.f32 %v4917_v20 }
 0x467   :  { %v6341_v21 = vpop.eup %6340 }
 0x468   :  { %v799_v23 = vadd.f32 1.0, %v6341_v21 }
 0x46a   :  { %6342 = vrcp.f32 %v799_v23 }
 0x474   :  { %v6343_v30 = vpop.eup %6342 }
 0x475   :  { %v805_v35 = vmul.f32 %v6343_v30, %v803_v34  ;;  %v812_v48 = vsub.f32 1.0, %v6343_v30 }
 0x477   :  { %807 = vrot.lane.b32.xlu1 %v805_v35, %s6581_s10 }
 0x47b   :  { %818 = vrot.lane.b32.xlu1 %v6804_v43, %s6577_s22  ;;  %v84_v43 = vld [vmem:[%s7843_s14 + $0x18] sm:$0xff] }
 0x47c   :  { %v7001_v44 = vpack.c.bf16 %v84_v43, %v83_v40 }
 0x47e   :  { %5975 = vmatpush3.bf16.msra.mxu1 %v7001_v44 }
 0x47f   :  { %5976 = vmatprep.subr.bf16.mxu1 %v7853_v3 }
 0x4e9   :  { %v808_v22 = vpop.permute.xlu1 %807 }
 0x4ea   :  { %v810_v26 = vadd.f32 %v808_v22, %v790_v16 }
 0x4ec   :  { %6344 = vtanh.f32 %v810_v26 }
 0x4ed   :  { %v819_v46 = vpop.permute.xlu1 %818 }
 0x4ee   :  { %v821_v50 = vmul.f32 %v6343_v30, %v819_v46 }
 0x4f6   :  { %v6345_v9 = vpop.eup %6344 }
 0x4f7   :  { %814 = vrot.lane.b32.xlu0 %v6345_v9, %s6579_s8 }
 0x569   :  { %v815_v49 = vpop.permute.xlu0 %814 }
 0x56a   :  { %v817_v52 = vmul.f32 %v815_v49, %v812_v48 }
 0x56c   :  { %v7007_v54 = vadd.f32 %v821_v50, %v817_v52 }
 0x56e   :  { %824 = vrot.lane.b32.xlu0 %v7007_v54, %s6579_s8 }
 0x5e0   :  { %v825_v61 = vpop.permute.xlu0 %824 }
 0x5e1   :  { %5382 = vmatmul.mubr.msk.f32.vlgmr.msra.gmra.mrb[8].mxu1 %vm286_vm2, %v825_v61  ;;  %5412 = vmatmul.mubr.msk.f32.vlgmr.msra.gmra.mrb[6].mxu0 %vm286_vm2, %v825_v61 }
 0x5e2   :  { %5978 = vmatpush3.bf16.msra.mxu1 %v7017_v57  ;;  %5400 = vmatprep.mubr.msk.f32.mxu1 %vm6575_vm0, %v7855_v6 }
 0x5e3   :  { %5979 = vmatprep.subr.bf16.mxu1 %v7853_v3  ;;  %5997 = vmatpush3.bf16.msra.mxu0 %v6850_v60 }
 0x5e4   :  { %5999 = vmatprep.subr.bf16.mxu0 %v6855_v62 }
 0x5e6   :  { %5981 = vmatpush3.bf16.msra.mxu1 %v7028_v63 }
 0x5e7   :  { %5982 = vmatprep.subr.bf16.mxu1 %v7853_v3  ;;  %6001 = vmatpush3.bf16.msra.mxu0 %v6855_v62 }
 0x5e8   :  { %6014 = vmatprep.subr.bf16.mxu0 %v7853_v3 }
 0x5ea   :  { %5984 = vmatpush3.bf16.msra.mxu1 %v7042_v2 }
 0x5eb   :  { %5985 = vmatprep.subr.bf16.mxu1 %v7853_v3 }
 0x5ee   :  { %5987 = vmatpush3.bf16.msra.mxu1 %v7054_v12 }
 0x5ef   :  { %6002 = vmatprep.subr.bf16.mxu1 %v7853_v3 }
 0x5f1   :  { %5401 = vmatmul.mubr.msk.f32.vlgmr.msra.gmra.mrb[8].mxu1 %vm109_vm1, %v6968_v13 }
 0x5f2   :  { %6004 = vmatpush3.bf16.msra.mxu1 %v6927_v38  ;;  %5441 = vmatprep.mubr.msk.f32.mxu1 %vm6575_vm0, %v7855_v6 }
 0x5f3   :  { %6005 = vmatprep.subr.bf16.mxu1 %v7853_v3 }
 0x5f6   :  { %6007 = vmatpush3.bf16.msra.mxu1 %v6937_v41 }
 0x5f7   :  { %6008 = vmatprep.subr.bf16.mxu1 %v7853_v3 }
 0x5fa   :  { %6010 = vmatpush3.bf16.msra.mxu1 %v6949_v45 }
 0x5fb   :  { %6011 = vmatprep.subr.bf16.mxu1 %v7853_v3 }
 0x5fe   :  { %6013 = vmatpush3.bf16.msra.mxu1 %v6959_v47 }
 0x5ff   :  { %6032 = vmatprep.subr.bf16.mxu1 %v7853_v3 }
 0x6b4   :  { %v7071_v13 = vpop.f32.mrb[6].mxu0 }
 0x6b5   :  { %v1063_v15 = vrot.slane %v7071_v13, %v6866_v5  ;;  %v5413_v16 = vpop.f32.mrb[7].mxu0 }
 0x6b7   :  { %v1064_v17 = vcombine.high %v1063_v15, %v1063_v15  ;;  %v1071_v18 = vrot.slane %v1063_v15, %v6866_v5 }
 0x6b9   :  { %v1078_v19 = vrot.slane %v1064_v17, %v6866_v5  ;;  %v1082_v20 = vrot.slane %v1071_v18, %v6875_v11 }
 0x6bb   :  { %v1086_v21 = vrot.slane %v1078_v19, %v6875_v11  ;;  %v1089_v23 = vadd.f32 %v1082_v20, %v6831_v53 }
 0x6bd   :  { %v1090_v30 = vadd.f32 %v6825_v51, %v1086_v21  ;;  %6346 = vtanh.f32 %v1089_v23 }
 0x6bf   :  { %6348 = vtanh.f32 %v1090_v30 }
 0x6c4   :  { %v965_v34 = vpop.f32.mrb[8].mxu1 }
 0x6c5   :  { %v6296_v35 = vadd.f32 %v965_v34, %v6901_v28  ;;  %v5402_v22 = vpop.f32.mrb[9].mxu1 }
 0x6c7   :  { %v6347_v26 = vpop.eup %6346  ;;  %982 = vst.msk [vmem:[#allocation6] sm:$0x3] %vm980_vm5, %v6296_v35 }
 0x6c8   :  { %5422 = vmatprep.mubr.msk.f32.mxu0 %vm286_vm2, %v6347_v26 }
 0x6c9   :  { %v6349_v36 = vpop.eup %6348 }
 0x6ca   :  { %5423 = vmatmul.mubr.msk.f32.vlgmr.msra.gmra.mrb[8].mxu0 %vm286_vm2, %v6349_v36 }
 0x6cb   :  { %6016 = vmatpush3.bf16.msra.mxu0 %v6995_v42  ;;  %5452 = vmatprep.mubr.msk.f32.mxu0 %vm6575_vm0, %v7855_v6 }
 0x6cc   :  { %6017 = vmatprep.subr.bf16.mxu0 %v7853_v3 }
 0x6cf   :  { %6019 = vmatpush3.bf16.msra.mxu0 %v7001_v44 }
 0x6d0   :  { %6020 = vmatprep.subr.bf16.mxu0 %v7853_v3 }
 0x79d   :  { %v5424_v39 = vpop.f32.mrb[8].mxu0 }
 0x79e   :  { %v1175_v40 = vadd.f32 %v5424_v39, %v6906_v31  ;;  %v1165_v43 = vpop.f32.mrb[9].mxu0 }
 0x79f   :  { %v1174_v9 = vadd.f32 %v1165_v43, %v6911_v32 }
 0x7a0   :  { %v1183_v46 = vsel %vm649_vm3, %v1175_v40, -inf }
 0x7a1   :  { %v1184_v48 = vrot.slane %v1183_v46, 4  ;;  %v1176_v49 = vsel %vm649_vm3, %v1174_v9, -inf }
 0x7a2   :  { %v1177_v50 = vrot.slane %v1176_v49, 4 }
 0x7a3   :  { %v1185_v52 = vmax.f32 %v1183_v46, %v1184_v48 }
 0x7a4   :  { %v1178_v55 = vmax.f32 %v1176_v49, %v1177_v50 }
 0x7a5   :  { %v1186_v56 = vrot.slane %v1185_v52, 2 }
 0x7a6   :  { %v1179_v58 = vrot.slane %v1178_v55, 2 }
 0x7a7   :  { %v1187_v59 = vmax.f32 %v1185_v52, %v1186_v56  ;;  %v1055_v52 = vadd.f32 %v7071_v13, %v6868_v7 }
 0x7a8   :  { %v1180_v61 = vmax.f32 %v1178_v55, %v1179_v58 }
 0x7a9   :  { %v1188_v0 = vrot.slane %v1187_v59, 1  ;;  %v1320_v58 = vrot.slane %v1055_v52, 6 }
 0x7aa   :  { %v1181_v1 = vrot.slane %v1180_v61, 1 }
 0x7ab   :  { %v1189_v8 = vmax.f32 %v1187_v59, %v1188_v0 }
 0x7ac   :  { %v1182_v10 = vmax.f32 %v1180_v61, %v1181_v1 }
 0x7ad   :  { %v1191_v15 = vsub.f32 %v1175_v40, %v1189_v8 }
 0x7ae   :  { %v1190_v16 = vsub.f32 %v1174_v9, %v1182_v10 }
 0x7af   :  { %v1194_v17 = vmul.f32 1.442695, %v1191_v15 }
 0x7b0   :  { %v1192_v18 = vmul.f32 1.442695, %v1190_v16 }
 0x7b1   :  { %6350 = vpow2.f32 %v1194_v17 }
 0x7b2   :  { %6352 = vpow2.f32 %v1192_v18 }
 0x7bb   :  { %v6351_v19 = vpop.eup %6350 }
 0x7bc   :  { %v6353_v20 = vpop.eup %6352  ;;  %v1203_v21 = vsel %vm649_vm3, %v6351_v19, 0.0 }
 0x7bd   :  { %v1204_v23 = vrot.slane %v1203_v21, 4  ;;  %v1196_v30 = vsel %vm649_vm3, %v6353_v20, 0.0 }
 0x7be   :  { %v1197_v34 = vrot.slane %v1196_v30, 4 }
 0x7bf   :  { %v1205_v35 = vadd.f32 %v1204_v23, %v1203_v21 }
 0x7c0   :  { %v1198_v22 = vadd.f32 %v1197_v34, %v1196_v30 }
 0x7c1   :  { %v1206_v26 = vrot.slane %v1205_v35, 2 }
 0x7c2   :  { %v1199_v36 = vrot.slane %v1198_v22, 2 }
 0x7c3   :  { %v1207_v39 = vadd.f32 %v1206_v26, %v1205_v35 }
 0x7c4   :  { %v1200_v43 = vadd.f32 %v1199_v36, %v1198_v22 }
 0x7c5   :  { %v1208_v40 = vrot.slane %v1207_v39, 1 }
 0x7c6   :  { %v1201_v9 = vrot.slane %v1200_v43, 1 }
 0x7c7   :  { %v1209_v46 = vadd.f32 %v1208_v40, %v1207_v39 }
 0x7c8   :  { %v1202_v48 = vadd.f32 %v1201_v9, %v1200_v43 }
 0x7c9   :  { %6354 = vrcp.f32 %v1209_v46 }
 0x7ca   :  { %6356 = vrcp.f32 %v1202_v48 }
 0x7d3   :  { %v6355_v49 = vpop.eup %6354 }
 0x7d4   :  { %v6357_v50 = vpop.eup %6356  ;;  %v7099_v55 = vmul.f32 %v6355_v49, %v6351_v19  ;;  %v1347_v49 = vrot.slane %v7007_v54, 6 }
 0x7d5   :  { %v7101_v56 = vmul.f32 %v6357_v50, %v6353_v20 }
 0x7d6   :  { %1221 = vperm.xlu0 %6324, %v7099_v55  }
 0x7d7   :  { %1216 = vperm.xlu1 %6325, %v7101_v56  }
 0x7da   :  { %1331 = vrot.lane.b32.xlu0 %v1320_v58, %s6577_s22 }
 0x7db   :  { %1321 = vrot.lane.b32.xlu1 %v1320_v58, %s6579_s8 }
 0x855   :  { %v1222_v59 = vpop.permute.xlu0 %1221 }
 0x856   :  { %v1225_v61 = vmul.f32 %v1222_v59, %v6796_v37  ;;  %v1217_v0 = vpop.permute.xlu1 %1216 }
 0x857   :  { %v1224_v1 = vmul.f32 %v1217_v0, %v6780_v33 }
 0x858   :  { %v1233_v13 = vsel %vm109_vm1, %v1225_v61, 0.0 }
 0x859   :  { %v1234_v8 = vrot.slane %v1233_v13, 4  ;;  %v1226_v10 = vsel %vm109_vm1, %v1224_v1, 0.0  ;;  %v1332_v52 = vpop.permute.xlu0 %1331 }
 0x85a   :  { %v1227_v15 = vrot.slane %v1226_v10, 4  ;;  %v1322_v43 = vpop.permute.xlu1 %1321 }
 0x85b   :  { %v1235_v16 = vadd.f32 %v1234_v8, %v1233_v13 }
 0x85c   :  { %v1228_v17 = vadd.f32 %v1227_v15, %v1226_v10 }
 0x85d   :  { %v1236_v18 = vrot.slane %v1235_v16, 2 }
 0x85e   :  { %v1229_v19 = vrot.slane %v1228_v17, 2 }
 0x85f   :  { %v1237_v20 = vadd.f32 %v1236_v18, %v1235_v16 }
 0x860   :  { %v1230_v21 = vadd.f32 %v1229_v19, %v1228_v17 }
 0x861   :  { %v1238_v23 = vrot.slane %v1237_v20, 1 }
 0x862   :  { %v1231_v30 = vrot.slane %v1230_v21, 1 }
 0x863   :  { %v1239_v34 = vadd.f32 %v1238_v23, %v1237_v20 }
 0x864   :  { %v1232_v35 = vadd.f32 %v1231_v30, %v1230_v21 }
 0x866   :  { %v1242_v22 = vsel %vm716_vm4, %v1239_v34, %v1232_v35 }
 0x867   :  { %5442 = vmatmul.mubr.msk.f32.vlgmr.msra.gmra.mrb[10].mxu1 %vm109_vm1, %v1242_v22 }
 0x868   :  { %6034 = vmatpush3.bf16.msra.mxu1 %v6757_v25  ;;  %5482 = vmatprep.mubr.msk.f32.mxu1 %vm6575_vm0, %v7855_v6 }
 0x869   :  { %6035 = vmatprep.subr.bf16.mxu1 %v7853_v3 }
 0x86c   :  { %6037 = vmatpush3.bf16.msra.mxu1 %v6766_v29 }
 0x86d   :  { %6039 = vmatprep.subr.bf16.mxu1 %v6850_v60 }
 0x93a   :  { %v1311_v33 = vpop.f32.mrb[10].mxu1 }
 0x93b   :  { %v1316_v26 = vrot.slane %v1311_v33, 6  ;;  %v5443_v36 = vpop.f32.mrb[11].mxu1 }
 0x93d   :  { %v1318_v39 = vadd.f32 %v1316_v26, %v6980_v14 }
 0x93f   :  { %v1324_v40 = vadd.f32 %v1322_v43, %v1318_v39 }
 0x941   :  { %v4924_v9 = vmul.f32 -1.442695, %v1324_v40 }
 0x943   :  { %6358 = vpow2.f32 %v4924_v9 }
 0x94d   :  { %v6359_v46 = vpop.eup %6358 }
 0x94e   :  { %v1328_v48 = vadd.f32 1.0, %v6359_v46 }
 0x950   :  { %6360 = vrcp.f32 %v1328_v48 }
 0x95a   :  { %v6361_v50 = vpop.eup %6360 }
 0x95b   :  { %v1334_v58 = vmul.f32 %v6361_v50, %v1332_v52  ;;  %v1349_v59 = vmul.f32 %v6361_v50, %v1347_v49  ;;  %v1341_v13 = vsub.f32 1.0, %v6361_v50 }
 0x95d   :  { %1336 = vrot.lane.b32.xlu1 %v1334_v58, %s6581_s10 }
 0x9cf   :  { %v1337_v61 = vpop.permute.xlu1 %1336 }
 0x9d0   :  { %v1339_v0 = vadd.f32 %v1337_v61, %v1318_v39 }
 0x9d2   :  { %6362 = vtanh.f32 %v1339_v0 }
 0x9dc   :  { %v6363_v1 = vpop.eup %6362 }
 0x9dd   :  { %1343 = vrot.lane.b32.xlu0 %v6363_v1, %s6579_s8 }
 0xa4f   :  { %v1344_v8 = vpop.permute.xlu0 %1343 }
 0xa50   :  { %v1346_v10 = vmul.f32 %v1344_v8, %v1341_v13 }
 0xa52   :  { %v7123_v15 = vadd.f32 %v1349_v59, %v1346_v10 }
 0xa54   :  { %v1352_v16 = vrot.slane %v7123_v15, 2 }
 0xa56   :  { %1353 = vrot.lane.b32.xlu1 %v1352_v16, %s6579_s8 }
 0xac8   :  { %v1354_v17 = vpop.permute.xlu1 %1353 }
 0xac9   :  { %5453 = vmatmul.mubr.msk.f32.vlgmr.msra.gmra.mrb[10].mxu0 %vm286_vm2, %v1354_v17  ;;  %5483 = vmatmul.mubr.msk.f32.vlgmr.msra.gmra.mrb[12].mxu1 %vm286_vm2, %v1354_v17 }
 0xaca   :  { %6022 = vmatpush3.bf16.msra.mxu0 %v7017_v57  ;;  %5471 = vmatprep.mubr.msk.f32.mxu0 %vm6575_vm0, %v7855_v6 }
 0xacb   :  { %6023 = vmatprep.subr.bf16.mxu0 %v7853_v3  ;;  %6041 = vmatpush3.bf16.msra.mxu1 %v6850_v60 }
 0xacc   :  { %6043 = vmatprep.subr.bf16.mxu1 %v6855_v62 }
 0xace   :  { %6025 = vmatpush3.bf16.msra.mxu0 %v7028_v63 }
 0xacf   :  { %6026 = vmatprep.subr.bf16.mxu0 %v7853_v3  ;;  %6045 = vmatpush3.bf16.msra.mxu1 %v6855_v62 }
 0xad0   :  { %6058 = vmatprep.subr.bf16.mxu1 %v7853_v3 }
 0xad2   :  { %6028 = vmatpush3.bf16.msra.mxu0 %v7042_v2 }
 0xad3   :  { %6029 = vmatprep.subr.bf16.mxu0 %v7853_v3 }
 0xad6   :  { %6031 = vmatpush3.bf16.msra.mxu0 %v7054_v12 }
 0xad7   :  { %6046 = vmatprep.subr.bf16.mxu0 %v7853_v3 }
 0xad9   :  { %5472 = vmatmul.mubr.msk.f32.vlgmr.msra.gmra.mrb[12].mxu0 %vm109_vm1, %v1242_v22 }
 0xada   :  { %6048 = vmatpush3.bf16.msra.mxu0 %v6927_v38  ;;  %5512 = vmatprep.mubr.msk.f32.mxu0 %vm6575_vm0, %v7855_v6 }
 0xadb   :  { %6049 = vmatprep.subr.bf16.mxu0 %v7853_v3 }
 0xade   :  { %6051 = vmatpush3.bf16.msra.mxu0 %v6937_v41 }
 0xadf   :  { %6052 = vmatprep.subr.bf16.mxu0 %v7853_v3 }
 0xae2   :  { %6054 = vmatpush3.bf16.msra.mxu0 %v6949_v45 }
 0xae3   :  { %6055 = vmatprep.subr.bf16.mxu0 %v7853_v3 }
 0xae6   :  { %6057 = vmatpush3.bf16.msra.mxu0 %v6959_v47 }
 0xae7   :  { %6076 = vmatprep.subr.bf16.mxu0 %v7853_v3 }
 0xb9c   :  { %v1423_v18 = vpop.f32.mrb[10].mxu0  ;;  %v7154_v19 = vpop.f32.mrb[12].mxu1 }
 0xb9d   :  { %v1428_v20 = vrot.slane %v1423_v18, 6  ;;  %v1616_v21 = vrot.slane %v7154_v19, %v6866_v5  ;;  %v5454_v23 = vpop.f32.mrb[11].mxu0  ;;  %v5484_v30 = vpop.f32.mrb[13].mxu1 }
 0xb9f   :  { %v1430_v34 = vadd.f32 %v1428_v20, %v6901_v28  ;;  %v1617_v35 = vcombine.high %v1616_v21, %v1616_v21  ;;  %v1624_v22 = vrot.slane %v1616_v21, %v6866_v5 }
 0xba1   :  { %v1631_v33 = vrot.slane %v1617_v35, %v6866_v5  ;;  %v1635_v26 = vrot.slane %v1624_v22, %v6875_v11 }
 0xba3   :  { %v1639_v36 = vrot.slane %v1631_v33, %v6875_v11  ;;  %v1642_v39 = vadd.f32 %v1635_v26, %v6831_v53 }
 0xba5   :  { %v1643_v43 = vadd.f32 %v6825_v51, %v1639_v36  ;;  %6364 = vtanh.f32 %v1642_v39 }
 0xba7   :  { %6366 = vtanh.f32 %v1643_v43 }
 0xbac   :  { %v1497_v40 = vpop.f32.mrb[12].mxu0 }
 0xbad   :  { %v1502_v9 = vrot.slane %v1497_v40, 6  ;;  %v5473_v46 = vpop.f32.mrb[13].mxu0 }
 0xbaf   :  { %v6365_v48 = vpop.eup %6364  ;;  %v7165_v49 = vadd.f32 %v1502_v9, %v1430_v34 }
 0xbb0   :  { %5493 = vmatprep.mubr.msk.f32.mxu1 %vm286_vm2, %v6365_v48 }
 0xbb1   :  { %v6367_v50 = vpop.eup %6366 }
 0xbb2   :  { %5494 = vmatmul.mubr.msk.f32.vlgmr.msra.gmra.mrb[14].mxu1 %vm286_vm2, %v6367_v50 }
 0xbb3   :  { %6060 = vmatpush3.bf16.msra.mxu1 %v6995_v42  ;;  %5523 = vmatprep.mubr.msk.f32.mxu1 %vm6575_vm0, %v7855_v6 }
 0xbb4   :  { %6061 = vmatprep.subr.bf16.mxu1 %v7853_v3 }
 0xbb7   :  { %6063 = vmatpush3.bf16.msra.mxu1 %v7001_v44 }
 0xbb8   :  { %6064 = vmatprep.subr.bf16.mxu1 %v7853_v3 }
 0xc85   :  { %v5495_v52 = vpop.f32.mrb[14].mxu1 }
 0xc86   :  { %v1728_v58 = vadd.f32 %v5495_v52, %v6906_v31  ;;  %v1718_v59 = vpop.f32.mrb[15].mxu1 }
 0xc87   :  { %v1727_v61 = vadd.f32 %v1718_v59, %v6911_v32 }
 0xc88   :  { %v1736_v0 = vsel %vm649_vm3, %v1728_v58, -inf }
 0xc89   :  { %v1737_v1 = vrot.slane %v1736_v0, 4  ;;  %v1729_v13 = vsel %vm649_vm3, %v1727_v61, -inf }
 0xc8a   :  { %v1730_v8 = vrot.slane %v1729_v13, 4 }
 0xc8b   :  { %v1738_v10 = vmax.f32 %v1736_v0, %v1737_v1 }
 0xc8c   :  { %v1731_v16 = vmax.f32 %v1729_v13, %v1730_v8 }
 0xc8d   :  { %v1739_v17 = vrot.slane %v1738_v10, 2 }
 0xc8e   :  { %v1732_v18 = vrot.slane %v1731_v16, 2 }
 0xc8f   :  { %v1740_v20 = vmax.f32 %v1738_v10, %v1739_v17 }
 0xc90   :  { %v1733_v21 = vmax.f32 %v1731_v16, %v1732_v18  ;;  %v1608_v16 = vadd.f32 %v7154_v19, %v6868_v7  ;;  %v7195_v19 = vld [vmem:[%s7865_s27] sm:$0xff] }
 0xc91   :  { %v1741_v23 = vrot.slane %v1740_v20, 1 }
 0xc92   :  { %v1734_v30 = vrot.slane %v1733_v21, 1 }
 0xc93   :  { %v1742_v34 = vmax.f32 %v1740_v20, %v1741_v23  ;;  %v1873_v20 = vrot.slane %v1608_v16, 4  ;;  %v1900_v16 = vrot.slane %v7123_v15, 6 }
 0xc94   :  { %v1735_v35 = vmax.f32 %v1733_v21, %v1734_v30 }
 0xc95   :  { %v1744_v31 = vsub.f32 %v1728_v58, %v1742_v34 }
 0xc96   :  { %v1743_v22 = vsub.f32 %v1727_v61, %v1735_v35 }
 0xc97   :  { %v1747_v33 = vmul.f32 1.442695, %v1744_v31 }
 0xc98   :  { %v1745_v32 = vmul.f32 1.442695, %v1743_v22 }
 0xc99   :  { %6368 = vpow2.f32 %v1747_v33 }
 0xc9a   :  { %6370 = vpow2.f32 %v1745_v32 }
 0xca3   :  { %v6369_v26 = vpop.eup %6368 }
 0xca4   :  { %v6371_v36 = vpop.eup %6370  ;;  %v1756_v39 = vsel %vm649_vm3, %v6369_v26, 0.0 }
 0xca5   :  { %v1757_v43 = vrot.slane %v1756_v39, 4  ;;  %v1749_v40 = vsel %vm649_vm3, %v6371_v36, 0.0 }
 0xca6   :  { %v1750_v9 = vrot.slane %v1749_v40, 4 }
 0xca7   :  { %v1758_v46 = vadd.f32 %v1757_v43, %v1756_v39 }
 0xca8   :  { %v1751_v48 = vadd.f32 %v1750_v9, %v1749_v40 }
 0xca9   :  { %v1759_v50 = vrot.slane %v1758_v46, 2 }
 0xcaa   :  { %v1752_v52 = vrot.slane %v1751_v48, 2 }
 0xcab   :  { %v1760_v59 = vadd.f32 %v1759_v50, %v1758_v46 }
 0xcac   :  { %v1753_v0 = vadd.f32 %v1752_v52, %v1751_v48 }
 0xcad   :  { %v1761_v58 = vrot.slane %v1760_v59, 1 }
 0xcae   :  { %v1754_v61 = vrot.slane %v1753_v0, 1 }
 0xcaf   :  { %v1762_v1 = vadd.f32 %v1761_v58, %v1760_v59 }
 0xcb0   :  { %v1755_v13 = vadd.f32 %v1754_v61, %v1753_v0 }
 0xcb1   :  { %6372 = vrcp.f32 %v1762_v1 }
 0xcb2   :  { %6374 = vrcp.f32 %v1755_v13 }
 0xcbb   :  { %v6373_v8 = vpop.eup %6372 }
 0xcbc   :  { %v6375_v10 = vpop.eup %6374  ;;  %v7183_v17 = vmul.f32 %v6373_v8, %v6369_v26 }
 0xcbd   :  { %v7185_v18 = vmul.f32 %v6375_v10, %v6371_v36 }
 0xcbe   :  { %1774 = vperm.xlu1 %6325, %v7183_v17  }
 0xcbf   :  { %1769 = vperm.xlu0 %6324, %v7185_v18  }
 0xcc2   :  { %1884 = vrot.lane.b32.xlu1 %v1873_v20, %s6577_s22 }
 0xcc3   :  { %1874 = vrot.lane.b32.xlu0 %v1873_v20, %s6579_s8 }
 0xd3d   :  { %v1775_v21 = vpop.permute.xlu1 %1774 }
 0xd3e   :  { %v1778_v23 = vmul.f32 %v1775_v21, %v6796_v37  ;;  %v1770_v30 = vpop.permute.xlu0 %1769 }
 0xd3f   :  { %v1777_v34 = vmul.f32 %v7195_v19, %v1770_v30 }
 0xd40   :  { %v1786_v35 = vsel %vm109_vm1, %v1778_v23, 0.0 }
 0xd41   :  { %v1787_v31 = vrot.slane %v1786_v35, 4  ;;  %v1779_v22 = vsel %vm109_vm1, %v1777_v34, 0.0  ;;  %v1885_v21 = vpop.permute.xlu1 %1884 }
 0xd42   :  { %v1780_v33 = vrot.slane %v1779_v22, 4  ;;  %v1875_v61 = vpop.permute.xlu0 %1874 }
 0xd43   :  { %v1788_v32 = vadd.f32 %v1787_v31, %v1786_v35 }
 0xd44   :  { %v1781_v26 = vadd.f32 %v1780_v33, %v1779_v22 }
 0xd45   :  { %v1789_v36 = vrot.slane %v1788_v32, 2 }
 0xd46   :  { %v1782_v39 = vrot.slane %v1781_v26, 2 }
 0xd47   :  { %v1790_v43 = vadd.f32 %v1789_v36, %v1788_v32 }
 0xd48   :  { %v1783_v37 = vadd.f32 %v1782_v39, %v1781_v26 }
 0xd49   :  { %v1791_v40 = vrot.slane %v1790_v43, 1 }
 0xd4a   :  { %v1784_v9 = vrot.slane %v1783_v37, 1 }
 0xd4b   :  { %v1792_v46 = vadd.f32 %v1791_v40, %v1790_v43 }
 0xd4c   :  { %v1785_v48 = vadd.f32 %v1784_v9, %v1783_v37 }
 0xd4e   :  { %v1795_v50 = vsel %vm716_vm4, %v1792_v46, %v1785_v48 }
 0xd4f   :  { %5513 = vmatmul.mubr.msk.f32.vlgmr.msra.gmra.mrb[14].mxu0 %vm109_vm1, %v1795_v50 }
 0xd50   :  { %6078 = vmatpush3.bf16.msra.mxu0 %v6757_v25  ;;  %5553 = vmatprep.mubr.msk.f32.mxu0 %vm6575_vm0, %v7855_v6 }
 0xd51   :  { %6079 = vmatprep.subr.bf16.mxu0 %v7853_v3 }
 0xd54   :  { %6081 = vmatpush3.bf16.msra.mxu0 %v6766_v29 }
 0xd55   :  { %6083 = vmatprep.subr.bf16.mxu0 %v6850_v60 }
 0xe22   :  { %v1864_v52 = vpop.f32.mrb[14].mxu0 }
 0xe23   :  { %v1869_v59 = vrot.slane %v1864_v52, 4  ;;  %v5514_v0 = vpop.f32.mrb[15].mxu0 }
 0xe25   :  { %v1871_v58 = vadd.f32 %v1869_v59, %v6980_v14 }
 0xe27   :  { %v1877_v1 = vadd.f32 %v1875_v61, %v1871_v58 }
 0xe29   :  { %v4931_v13 = vmul.f32 -1.442695, %v1877_v1 }
 0xe2b   :  { %6376 = vpow2.f32 %v4931_v13 }
 0xe35   :  { %v6377_v8 = vpop.eup %6376 }
 0xe36   :  { %v1881_v10 = vadd.f32 1.0, %v6377_v8 }
 0xe38   :  { %6378 = vrcp.f32 %v1881_v10 }
 0xe42   :  { %v6379_v20 = vpop.eup %6378 }
 0xe43   :  { %v1887_v23 = vmul.f32 %v6379_v20, %v1885_v21  ;;  %v1902_v30 = vmul.f32 %v6379_v20, %v1900_v16  ;;  %v1894_v22 = vsub.f32 1.0, %v6379_v20 }
 0xe45   :  { %1889 = vrot.lane.b32.xlu0 %v1887_v23, %s6581_s10 }
 0xeb7   :  { %v1890_v34 = vpop.permute.xlu0 %1889 }
 0xeb8   :  { %v1892_v35 = vadd.f32 %v1890_v34, %v1871_v58  ;;  %v7267_v34 = vld [vmem:[%s7867_s29 + $0x8] sm:$0xff] }
 0xeba   :  { %6380 = vtanh.f32 %v1892_v35 }
 0xec4   :  { %v6381_v31 = vpop.eup %6380 }
 0xec5   :  { %1896 = vrot.lane.b32.xlu1 %v6381_v31, %s6579_s8 }
 0xf37   :  { %v1897_v33 = vpop.permute.xlu1 %1896 }
 0xf38   :  { %v1899_v32 = vmul.f32 %v1897_v33, %v1894_v22  ;;  %v7273_v22 = vld [vmem:[%s7867_s29] sm:$0xff] }
 0xf3a   :  { %v7212_v26 = vadd.f32 %v1902_v30, %v1899_v32 }
 0xf3c   :  { %v1905_v36 = vrot.slane %v7212_v26, 4 }
 0xf3e   :  { %1906 = vrot.lane.b32.xlu0 %v1905_v36, %s6579_s8 }
 0xfb0   :  { %v1907_v39 = vpop.permute.xlu0 %1906 }
 0xfb1   :  { %5524 = vmatmul.mubr.msk.f32.vlgmr.msra.gmra.mrb[16].mxu1 %vm286_vm2, %v1907_v39  ;;  %5554 = vmatmul.mubr.msk.f32.vlgmr.msra.gmra.mrb[16].mxu0 %vm286_vm2, %v1907_v39 }
 0xfb2   :  { %6066 = vmatpush3.bf16.msra.mxu1 %v7017_v57  ;;  %5542 = vmatprep.mubr.msk.f32.mxu1 %vm6575_vm0, %v7855_v6 }
 0xfb3   :  { %6067 = vmatprep.subr.bf16.mxu1 %v7853_v3  ;;  %6085 = vmatpush3.bf16.msra.mxu0 %v6850_v60 }
 0xfb4   :  { %6087 = vmatprep.subr.bf16.mxu0 %v6855_v62 }
 0xfb6   :  { %6069 = vmatpush3.bf16.msra.mxu1 %v7028_v63 }
 0xfb7   :  { %6070 = vmatprep.subr.bf16.mxu1 %v7853_v3  ;;  %6089 = vmatpush3.bf16.msra.mxu0 %v6855_v62 }
 0xfb8   :  { %6102 = vmatprep.subr.bf16.mxu0 %v7853_v3 }
 0xfba   :  { %6072 = vmatpush3.bf16.msra.mxu1 %v7042_v2 }
 0xfbb   :  { %6073 = vmatprep.subr.bf16.mxu1 %v7853_v3 }
 0xfbe   :  { %6075 = vmatpush3.bf16.msra.mxu1 %v7054_v12 }
 0xfbf   :  { %6090 = vmatprep.subr.bf16.mxu1 %v7853_v3 }
 0xfc1   :  { %5543 = vmatmul.mubr.msk.f32.vlgmr.msra.gmra.mrb[18].mxu1 %vm109_vm1, %v1795_v50 }
 0xfc2   :  { %6092 = vmatpush3.bf16.msra.mxu1 %v6927_v38  ;;  %5583 = vmatprep.mubr.msk.f32.mxu1 %vm6575_vm0, %v7855_v6 }
 0xfc3   :  { %6093 = vmatprep.subr.bf16.mxu1 %v7853_v3 }
 0xfc6   :  { %6095 = vmatpush3.bf16.msra.mxu1 %v6937_v41 }
 0xfc7   :  { %6096 = vmatprep.subr.bf16.mxu1 %v7853_v3 }
 0xfca   :  { %6098 = vmatpush3.bf16.msra.mxu1 %v6949_v45 }
 0xfcb   :  { %6099 = vmatprep.subr.bf16.mxu1 %v7853_v3 }
 0xfce   :  { %6101 = vmatpush3.bf16.msra.mxu1 %v6959_v47 }
 0xfcf   :  { %6120 = vmatprep.subr.bf16.mxu1 %v7853_v3 }
0x1084   :  { %v1976_v43 = vpop.f32.mrb[16].mxu1  ;;  %v7243_v37 = vpop.f32.mrb[16].mxu0 }
0x1085   :  { %v1981_v40 = vrot.slane %v1976_v43, 4  ;;  %v2171_v9 = vrot.slane %v7243_v37, %v6866_v5  ;;  %v5525_v46 = vpop.f32.mrb[17].mxu1  ;;  %v5555_v48 = vpop.f32.mrb[17].mxu0 }
0x1087   :  { %v1983_v50 = vadd.f32 %v1981_v40, %v6901_v28  ;;  %v2172_v52 = vcombine.high %v2171_v9, %v2171_v9  ;;  %v2179_v59 = vrot.slane %v2171_v9, %v6866_v5 }
0x1089   :  { %v2186_v0 = vrot.slane %v2172_v52, %v6866_v5  ;;  %v2190_v58 = vrot.slane %v2179_v59, %v6875_v11 }
0x108b   :  { %v2194_v61 = vrot.slane %v2186_v0, %v6875_v11  ;;  %v2197_v1 = vadd.f32 %v2190_v58, %v6831_v53 }
0x108d   :  { %v2198_v13 = vadd.f32 %v6825_v51, %v2194_v61  ;;  %6382 = vtanh.f32 %v2197_v1 }
0x108f   :  { %6384 = vtanh.f32 %v2198_v13 }
0x1094   :  { %v2050_v8 = vpop.f32.mrb[18].mxu1 }
0x1095   :  { %v2055_v10 = vrot.slane %v2050_v8, 4  ;;  %v5544_v16 = vpop.f32.mrb[19].mxu1 }
0x1097   :  { %v6383_v20 = vpop.eup %6382  ;;  %v7254_v21 = vadd.f32 %v2055_v10, %v1983_v50 }
0x1098   :  { %5564 = vmatprep.mubr.msk.f32.mxu0 %vm286_vm2, %v6383_v20 }
0x1099   :  { %7868 = vst [vmem:[#allocation12_spill] sm:$0xff] %v7254_v21  ;;  %v6385_v23 = vpop.eup %6384 }
0x109a   :  { %5565 = vmatmul.mubr.msk.f32.vlgmr.msra.gmra.mrb[18].mxu0 %vm286_vm2, %v6385_v23 }
0x109b   :  { %6104 = vmatpush3.bf16.msra.mxu0 %v6995_v42  ;;  %5594 = vmatprep.mubr.msk.f32.mxu0 %vm6575_vm0, %v7855_v6 }
0x109c   :  { %6105 = vmatprep.subr.bf16.mxu0 %v7853_v3 }
0x109f   :  { %6107 = vmatpush3.bf16.msra.mxu0 %v7001_v44 }
0x10a0   :  { %6108 = vmatprep.subr.bf16.mxu0 %v7853_v3 }
0x116d   :  { %v5566_v30 = vpop.f32.mrb[18].mxu0 }
0x116e   :  { %v2283_v35 = vadd.f32 %v7267_v34, %v5566_v30  ;;  %v2273_v31 = vpop.f32.mrb[19].mxu0 }
0x116f   :  { %v2282_v33 = vadd.f32 %v7273_v22, %v2273_v31 }
0x1170   :  { %v2291_v32 = vsel %vm649_vm3, %v2283_v35, -inf }
0x1171   :  { %v2292_v36 = vrot.slane %v2291_v32, 4  ;;  %v2284_v39 = vsel %vm649_vm3, %v2282_v33, -inf }
0x1172   :  { %v2285_v43 = vrot.slane %v2284_v39, 4 }
0x1173   :  { %v2293_v40 = vmax.f32 %v2291_v32, %v2292_v36 }
0x1174   :  { %v2286_v9 = vmax.f32 %v2284_v39, %v2285_v43 }
0x1175   :  { %v2294_v46 = vrot.slane %v2293_v40, 2 }
0x1176   :  { %v2287_v48 = vrot.slane %v2286_v9, 2 }
0x1177   :  { %v2295_v50 = vmax.f32 %v2293_v40, %v2294_v46 }
0x1178   :  { %v2288_v52 = vmax.f32 %v2286_v9, %v2287_v48 }
0x1179   :  { %v2296_v59 = vrot.slane %v2295_v50, 1 }
0x117a   :  { %v2289_v0 = vrot.slane %v2288_v52, 1 }
0x117b   :  { %v2297_v58 = vmax.f32 %v2295_v50, %v2296_v59 }
0x117c   :  { %v2290_v61 = vmax.f32 %v2288_v52, %v2289_v0  ;;  %v2163_v0 = vadd.f32 %v7243_v37, %v6868_v7 }
0x117d   :  { %v2299_v1 = vsub.f32 %v2283_v35, %v2297_v58 }
0x117e   :  { %v2298_v13 = vsub.f32 %v2282_v33, %v2290_v61 }
0x117f   :  { %v2302_v8 = vmul.f32 1.442695, %v2299_v1  ;;  %v2428_v1 = vrot.slane %v2163_v0, 2 }
0x1180   :  { %v2300_v10 = vmul.f32 1.442695, %v2298_v13 }
0x1181   :  { %6386 = vpow2.f32 %v2302_v8  ;;  %v7293_v8 = vld [vmem:[%s7865_s27 + $0x8] sm:$0xff] }
0x1182   :  { %6388 = vpow2.f32 %v2300_v10 }
0x118b   :  { %v6387_v16 = vpop.eup %6386 }
0x118c   :  { %v6389_v20 = vpop.eup %6388  ;;  %v2311_v23 = vsel %vm649_vm3, %v6387_v16, 0.0 }
0x118d   :  { %v2312_v30 = vrot.slane %v2311_v23, 4  ;;  %v2304_v31 = vsel %vm649_vm3, %v6389_v20, 0.0 }
0x118e   :  { %v2305_v32 = vrot.slane %v2304_v31, 4 }
0x118f   :  { %v2313_v36 = vadd.f32 %v2312_v30, %v2311_v23 }
0x1190   :  { %v2306_v39 = vadd.f32 %v2305_v32, %v2304_v31 }
0x1191   :  { %v2314_v43 = vrot.slane %v2313_v36, 2 }
0x1192   :  { %v2307_v40 = vrot.slane %v2306_v39, 2 }
0x1193   :  { %v2315_v9 = vadd.f32 %v2314_v43, %v2313_v36 }
0x1194   :  { %v2308_v46 = vadd.f32 %v2307_v40, %v2306_v39 }
0x1195   :  { %v2316_v35 = vrot.slane %v2315_v9, 1 }
0x1196   :  { %v2309_v33 = vrot.slane %v2308_v46, 1 }
0x1197   :  { %v2317_v48 = vadd.f32 %v2316_v35, %v2315_v9 }
0x1198   :  { %v2310_v50 = vadd.f32 %v2309_v33, %v2308_v46 }
0x1199   :  { %6390 = vrcp.f32 %v2317_v48 }
0x119a   :  { %6392 = vrcp.f32 %v2310_v50 }
0x11a3   :  { %v6391_v52 = vpop.eup %6390 }
0x11a4   :  { %v6393_v59 = vpop.eup %6392  ;;  %v7282_v58 = vmul.f32 %v6391_v52, %v6387_v16 }
0x11a5   :  { %v7284_v61 = vmul.f32 %v6393_v59, %v6389_v20 }
0x11a6   :  { %2329 = vperm.xlu0 %6324, %v7282_v58  }
0x11a7   :  { %2324 = vperm.xlu1 %6325, %v7284_v61  }
0x11aa   :  { %2439 = vrot.lane.b32.xlu0 %v2428_v1, %s6577_s22 }
0x11ab   :  { %2429 = vrot.lane.b32.xlu1 %v2428_v1, %s6579_s8 }
0x1225   :  { %v2330_v13 = vpop.permute.xlu0 %2329 }
0x1226   :  { %v2333_v37 = vmul.f32 %v7293_v8, %v2330_v13  ;;  %v2325_v10 = vpop.permute.xlu1 %2324 }
0x1227   :  { %v2332_v16 = vmul.f32 %v7195_v19, %v2325_v10 }
0x1228   :  { %v2341_v20 = vsel %vm109_vm1, %v2333_v37, 0.0 }
0x1229   :  { %v2342_v23 = vrot.slane %v2341_v20, 4  ;;  %v2334_v30 = vsel %vm109_vm1, %v2332_v16, 0.0 }
0x122a   :  { %v2335_v31 = vrot.slane %v2334_v30, 4  ;;  %v2430_v13 = vpop.permute.xlu1 %2429 }
0x122b   :  { %v2343_v32 = vadd.f32 %v2342_v23, %v2341_v20  ;;  %v2455_v23 = vrot.slane %v7212_v26, 6 }
0x122c   :  { %v2336_v36 = vadd.f32 %v2335_v31, %v2334_v30  ;;  %v2440_v31 = vpop.permute.xlu0 %2439 }
0x122d   :  { %v2344_v39 = vrot.slane %v2343_v32, 2 }
0x122e   :  { %v2337_v43 = vrot.slane %v2336_v36, 2 }
0x122f   :  { %v2345_v40 = vadd.f32 %v2344_v39, %v2343_v32 }
0x1230   :  { %v2338_v9 = vadd.f32 %v2337_v43, %v2336_v36 }
0x1231   :  { %v2346_v46 = vrot.slane %v2345_v40, 1 }
0x1232   :  { %v2339_v35 = vrot.slane %v2338_v9, 1 }
0x1233   :  { %v2347_v33 = vadd.f32 %v2346_v46, %v2345_v40 }
0x1234   :  { %v2340_v48 = vadd.f32 %v2339_v35, %v2338_v9 }
0x1236   :  { %v2350_v50 = vsel %vm716_vm4, %v2347_v33, %v2340_v48 }
0x1237   :  { %5584 = vmatmul.mubr.msk.f32.vlgmr.msra.gmra.mrb[20].mxu1 %vm109_vm1, %v2350_v50 }
0x1238   :  { %6122 = vmatpush3.bf16.msra.mxu1 %v6757_v25  ;;  %5624 = vmatprep.mubr.msk.f32.mxu1 %vm6575_vm0, %v7855_v6 }
0x1239   :  { %6123 = vmatprep.subr.bf16.mxu1 %v7853_v3 }
0x123c   :  { %6125 = vmatpush3.bf16.msra.mxu1 %v6766_v29 }
0x123d   :  { %6127 = vmatprep.subr.bf16.mxu1 %v6850_v60 }
0x130a   :  { %v2419_v52 = vpop.f32.mrb[20].mxu1 }
0x130b   :  { %v2424_v59 = vrot.slane %v2419_v52, 2  ;;  %v5585_v0 = vpop.f32.mrb[21].mxu1 }
0x130d   :  { %v2426_v1 = vadd.f32 %v2424_v59, %v6980_v14 }
0x130f   :  { %v2432_v37 = vadd.f32 %v2430_v13, %v2426_v1 }
0x1311   :  { %v4938_v10 = vmul.f32 -1.442695, %v2432_v37 }
0x1313   :  { %6394 = vpow2.f32 %v4938_v10 }
0x131d   :  { %v6395_v16 = vpop.eup %6394 }
0x131e   :  { %v2436_v20 = vadd.f32 1.0, %v6395_v16 }
0x1320   :  { %6396 = vrcp.f32 %v2436_v20 }
0x132a   :  { %v6397_v30 = vpop.eup %6396 }
0x132b   :  { %v2442_v32 = vmul.f32 %v6397_v30, %v2440_v31  ;;  %v2457_v36 = vmul.f32 %v6397_v30, %v2455_v23  ;;  %v2449_v14 = vsub.f32 1.0, %v6397_v30 }
0x132d   :  { %2444 = vrot.lane.b32.xlu1 %v2442_v32, %s6581_s10 }
0x139f   :  { %v2445_v39 = vpop.permute.xlu1 %2444 }
0x13a0   :  { %v2447_v43 = vadd.f32 %v2445_v39, %v2426_v1 }
0x13a2   :  { %6398 = vtanh.f32 %v2447_v43 }
0x13ac   :  { %v6399_v40 = vpop.eup %6398 }
0x13ad   :  { %2451 = vrot.lane.b32.xlu0 %v6399_v40, %s6579_s8 }
0x141f   :  { %v2452_v9 = vpop.permute.xlu0 %2451 }
0x1420   :  { %v2454_v46 = vmul.f32 %v2452_v9, %v2449_v14 }
0x1422   :  { %v7311_v35 = vadd.f32 %v2457_v36, %v2454_v46 }
0x1424   :  { %7869 = vst [vmem:[#allocation13_spill] sm:$0xff] %v7311_v35  ;;  %v7852_v33 = vrot.slane %v7311_v35, 6 }
0x1426   :  { %2461 = vrot.lane.b32.xlu1 %v7852_v33, %s6579_s8 }
0x1498   :  { %v2462_v48 = vpop.permute.xlu1 %2461 }
0x1499   :  { %5595 = vmatmul.mubr.msk.f32.vlgmr.msra.gmra.mrb[20].mxu0 %vm286_vm2, %v2462_v48  ;;  %5625 = vmatmul.mubr.msk.f32.vlgmr.msra.gmra.mrb[22].mxu1 %vm286_vm2, %v2462_v48 }
0x149a   :  { %6110 = vmatpush3.bf16.msra.mxu0 %v7017_v57  ;;  %5613 = vmatprep.mubr.msk.f32.mxu0 %vm6575_vm0, %v7855_v6 }
0x149b   :  { %6111 = vmatprep.subr.bf16.mxu0 %v7853_v3  ;;  %6129 = vmatpush3.bf16.msra.mxu1 %v6850_v60 }
0x149c   :  { %6131 = vmatprep.subr.bf16.mxu1 %v6855_v62 }
0x149e   :  { %6113 = vmatpush3.bf16.msra.mxu0 %v7028_v63 }
0x149f   :  { %6114 = vmatprep.subr.bf16.mxu0 %v7853_v3  ;;  %6133 = vmatpush3.bf16.msra.mxu1 %v6855_v62 }
0x14a0   :  { %6146 = vmatprep.subr.bf16.mxu1 %v7853_v3 }
0x14a2   :  { %6116 = vmatpush3.bf16.msra.mxu0 %v7042_v2 }
0x14a3   :  { %6117 = vmatprep.subr.bf16.mxu0 %v7853_v3 }
0x14a6   :  { %6119 = vmatpush3.bf16.msra.mxu0 %v7054_v12 }
0x14a7   :  { %6134 = vmatprep.subr.bf16.mxu0 %v7853_v3 }
0x14a9   :  { %5614 = vmatmul.mubr.msk.f32.vlgmr.msra.gmra.mrb[22].mxu0 %vm109_vm1, %v2350_v50 }
0x14aa   :  { %6136 = vmatpush3.bf16.msra.mxu0 %v6927_v38  ;;  %5654 = vmatprep.mubr.msk.f32.mxu0 %vm6575_vm0, %v7855_v6 }
0x14ab   :  { %6137 = vmatprep.subr.bf16.mxu0 %v7853_v3 }
0x14ae   :  { %6139 = vmatpush3.bf16.msra.mxu0 %v6937_v41 }
0x14af   :  { %6140 = vmatprep.subr.bf16.mxu0 %v7853_v3 }
0x14b2   :  { %6142 = vmatpush3.bf16.msra.mxu0 %v6949_v45 }
0x14b3   :  { %6143 = vmatprep.subr.bf16.mxu0 %v7853_v3 }
0x14b6   :  { %6145 = vmatpush3.bf16.msra.mxu0 %v6959_v47 }
0x14b7   :  { %6164 = vmatprep.subr.bf16.mxu0 %v7853_v3 }
0x156c   :  { %v2531_v50 = vpop.f32.mrb[20].mxu0  ;;  %v7344_v52 = vpop.f32.mrb[22].mxu1 }
0x156d   :  { %v2536_v59 = vrot.slane %v2531_v50, 2  ;;  %v2728_v0 = vrot.slane %v7344_v52, %v6866_v5  ;;  %v5596_v1 = vpop.f32.mrb[21].mxu0  ;;  %v5626_v13 = vpop.f32.mrb[23].mxu1 }
0x156f   :  { %v2538_v37 = vadd.f32 %v2536_v59, %v6901_v28  ;;  %v2729_v10 = vcombine.high %v2728_v0, %v2728_v0  ;;  %v2736_v16 = vrot.slane %v2728_v0, %v6866_v5 }
0x1571   :  { %v2743_v20 = vrot.slane %v2729_v10, %v6866_v5  ;;  %v2747_v23 = vrot.slane %v2736_v16, %v6875_v11 }
0x1573   :  { %v2751_v30 = vrot.slane %v2743_v20, %v6875_v11  ;;  %v2754_v31 = vadd.f32 %v2747_v23, %v6831_v53 }
0x1575   :  { %v2755_v32 = vadd.f32 %v6825_v51, %v2751_v30  ;;  %6400 = vtanh.f32 %v2754_v31 }
0x1577   :  { %6402 = vtanh.f32 %v2755_v32 }
0x157c   :  { %v2605_v36 = vpop.f32.mrb[22].mxu0 }
0x157d   :  { %v2610_v39 = vrot.slane %v2605_v36, 2  ;;  %v5615_v43 = vpop.f32.mrb[23].mxu0 }
0x157f   :  { %v6401_v40 = vpop.eup %6400  ;;  %v7355_v28 = vadd.f32 %v2610_v39, %v2538_v37 }
0x1580   :  { %5635 = vmatprep.mubr.msk.f32.mxu1 %vm286_vm2, %v6401_v40 }
0x1581   :  { %v6403_v14 = vpop.eup %6402 }
0x1582   :  { %5636 = vmatmul.mubr.msk.f32.vlgmr.msra.gmra.mrb[24].mxu1 %vm286_vm2, %v6403_v14 }
0x1583   :  { %6148 = vmatpush3.bf16.msra.mxu1 %v6995_v42  ;;  %5665 = vmatprep.mubr.msk.f32.mxu1 %vm6575_vm0, %v7855_v6 }
0x1584   :  { %6149 = vmatprep.subr.bf16.mxu1 %v7853_v3 }
0x1587   :  { %6151 = vmatpush3.bf16.msra.mxu1 %v7001_v44 }
0x1588   :  { %6152 = vmatprep.subr.bf16.mxu1 %v7853_v3 }
0x1655   :  { %v5637_v9 = vpop.f32.mrb[24].mxu1 }
0x1656   :  { %v2840_v46 = vadd.f32 %v7267_v34, %v5637_v9  ;;  %v2830_v48 = vpop.f32.mrb[25].mxu1 }
0x1657   :  { %v2839_v50 = vadd.f32 %v7273_v22, %v2830_v48 }
0x1658   :  { %v2848_v59 = vsel %vm649_vm3, %v2840_v46, -inf }
0x1659   :  { %v2849_v0 = vrot.slane %v2848_v59, 4  ;;  %v2841_v1 = vsel %vm649_vm3, %v2839_v50, -inf }
0x165a   :  { %v2842_v13 = vrot.slane %v2841_v1, 4 }
0x165b   :  { %v2850_v37 = vmax.f32 %v2848_v59, %v2849_v0 }
0x165c   :  { %v2843_v10 = vmax.f32 %v2841_v1, %v2842_v13 }
0x165d   :  { %v2851_v16 = vrot.slane %v2850_v37, 2 }
0x165e   :  { %v2844_v20 = vrot.slane %v2843_v10, 2 }
0x165f   :  { %v2852_v23 = vmax.f32 %v2850_v37, %v2851_v16 }
0x1660   :  { %v2845_v30 = vmax.f32 %v2843_v10, %v2844_v20 }
0x1661   :  { %v2853_v31 = vrot.slane %v2852_v23, 1 }
0x1662   :  { %v2846_v32 = vrot.slane %v2845_v30, 1 }
0x1663   :  { %v2854_v36 = vmax.f32 %v2852_v23, %v2853_v31 }
0x1664   :  { %v2847_v39 = vmax.f32 %v2845_v30, %v2846_v32 }
0x1665   :  { %v2856_v43 = vsub.f32 %v2840_v46, %v2854_v36 }
0x1666   :  { %v2855_v40 = vsub.f32 %v2839_v50, %v2847_v39 }
0x1667   :  { %v2859_v14 = vmul.f32 1.442695, %v2856_v43 }
0x1668   :  { %v2857_v9 = vmul.f32 1.442695, %v2855_v40 }
0x1669   :  { %6404 = vpow2.f32 %v2859_v14 }
0x166a   :  { %6406 = vpow2.f32 %v2857_v9 }
0x1673   :  { %v6405_v48 = vpop.eup %6404 }
0x1674   :  { %v6407_v33 = vpop.eup %6406  ;;  %v2868_v3 = vsel %vm649_vm3, %v6405_v48, 0.0 }
0x1675   :  { %v2869_v59 = vrot.slane %v2868_v3, 4  ;;  %v2861_v0 = vsel %vm649_vm3, %v6407_v33, 0.0 }
0x1676   :  { %v2862_v1 = vrot.slane %v2861_v0, 4 }
0x1677   :  { %v2870_v13 = vadd.f32 %v2869_v59, %v2868_v3  ;;  %v2720_v3 = vadd.f32 %v7344_v52, %v6868_v7 }
0x1678   :  { %v2863_v37 = vadd.f32 %v2862_v1, %v2861_v0 }
0x1679   :  { %v2871_v10 = vrot.slane %v2870_v13, 2 }
0x167a   :  { %v2864_v16 = vrot.slane %v2863_v37, 2 }
0x167b   :  { %v2872_v20 = vadd.f32 %v2871_v10, %v2870_v13 }
0x167c   :  { %v2865_v23 = vadd.f32 %v2864_v16, %v2863_v37 }
0x167d   :  { %v2873_v46 = vrot.slane %v2872_v20, 1 }
0x167e   :  { %v2866_v50 = vrot.slane %v2865_v23, 1 }
0x167f   :  { %v2874_v30 = vadd.f32 %v2873_v46, %v2872_v20 }
0x1680   :  { %v2867_v31 = vadd.f32 %v2866_v50, %v2865_v23 }
0x1681   :  { %6408 = vrcp.f32 %v2874_v30 }
0x1682   :  { %6410 = vrcp.f32 %v2867_v31 }
0x168b   :  { %v6409_v32 = vpop.eup %6408 }
0x168c   :  { %v6411_v36 = vpop.eup %6410  ;;  %v7371_v39 = vmul.f32 %v6409_v32, %v6405_v48  ;;  %v7871_v32 = vmov 0.0|0.0  }
0x168d   :  { %v7373_v43 = vmul.f32 %v6411_v36, %v6407_v33 }
0x168e   :  { %7870 = vst [vmem:[#allocation14_spill] sm:$0xff] %v7371_v39  ;;  %2886 = vperm.xlu1 %6325, %v7371_v39  }
0x168f   :  { %2881 = vperm.xlu0 %6324, %v7373_v43  }
0x1692   :  { %2992 = vrot.lane.b32.xlu1 %v2720_v3, %s6577_s22 }
0x1693   :  { %2982 = vrot.lane.b32.xlu0 %v2720_v3, %s6579_s8 }
0x170d   :  { %v2887_v40 = vpop.permute.xlu1 %2886 }
0x170e   :  { %v2890_v14 = vmul.f32 %v7293_v8, %v2887_v40  ;;  %v2882_v9 = vpop.permute.xlu0 %2881 }
0x170f   :  { %v2889_v48 = vmul.f32 %v7195_v19, %v2882_v9 }
0x1710   :  { %v2898_v33 = vsel %vm109_vm1, %v2890_v14, 0.0 }
0x1711   :  { %v2899_v59 = vrot.slane %v2898_v33, 4  ;;  %v2891_v0 = vsel %vm109_vm1, %v2889_v48, 0.0 }
0x1712   :  { %v2892_v1 = vrot.slane %v2891_v0, 4  ;;  %v2983_v14 = vpop.permute.xlu0 %2982 }
0x1713   :  { %v2900_v13 = vadd.f32 %v2899_v59, %v2898_v33 }
0x1714   :  { %v2893_v37 = vadd.f32 %v2892_v1, %v2891_v0  ;;  %v2993_v1 = vpop.permute.xlu1 %2992 }
0x1715   :  { %v2901_v10 = vrot.slane %v2900_v13, 2 }
0x1716   :  { %v2894_v52 = vrot.slane %v2893_v37, 2 }
0x1717   :  { %v2902_v16 = vadd.f32 %v2901_v10, %v2900_v13 }
0x1718   :  { %v2895_v20 = vadd.f32 %v2894_v52, %v2893_v37 }
0x1719   :  { %v2903_v23 = vrot.slane %v2902_v16, 1 }
0x171a   :  { %v2896_v46 = vrot.slane %v2895_v20, 1 }
0x171b   :  { %v2904_v50 = vadd.f32 %v2903_v23, %v2902_v16  ;;  %v7872_v23 = vrot.slane %v7311_v35, 6 }
0x171c   :  { %v2897_v30 = vadd.f32 %v2896_v46, %v2895_v20 }
0x171e   :  { %v2907_v31 = vsel %vm716_vm4, %v2904_v50, %v2897_v30 }
0x171f   :  { %5655 = vmatmul.mubr.msk.f32.vlgmr.msra.gmra.mrb[24].mxu0 %vm109_vm1, %v2907_v31 }
0x1720   :  { %6166 = vmatpush3.bf16.msra.mxu0 %v6757_v25  ;;  %5695 = vmatprep.mubr.msk.f32.mxu0 %vm6575_vm0, %v7855_v6 }
0x1721   :  { %6167 = vmatprep.subr.bf16.mxu0 %v7871_v32 }
0x1724   :  { %6169 = vmatpush3.bf16.msra.mxu0 %v6766_v29 }
0x1725   :  { %6171 = vmatprep.subr.bf16.mxu0 %v6850_v60 }
0x17f2   :  { %v2976_v36 = vpop.f32.mrb[24].mxu0 }
0x17f3   :  { %v2980_v3 = vadd.f32 %v2976_v36, %v6895_v24  ;;  %v5656_v40 = vpop.f32.mrb[25].mxu0 }
0x17f5   :  { %v2985_v9 = vadd.f32 %v2983_v14, %v2980_v3 }
0x17f7   :  { %v4945_v48 = vmul.f32 -1.442695, %v2985_v9 }
0x17f9   :  { %6412 = vpow2.f32 %v4945_v48 }
0x1803   :  { %v6413_v33 = vpop.eup %6412 }
0x1804   :  { %v2989_v59 = vadd.f32 1.0, %v6413_v33 }
0x1806   :  { %6414 = vrcp.f32 %v2989_v59 }
0x1810   :  { %v6415_v0 = vpop.eup %6414 }
0x1811   :  { %v2995_v13 = vmul.f32 %v6415_v0, %v2993_v1  ;;  %v3002_v16 = vsub.f32 1.0, %v6415_v0  ;;  %v3009_v46 = vmul.f32 %v6415_v0, %v7872_v23 }
0x1813   :  { %2997 = vrot.lane.b32.xlu0 %v2995_v13, %s6581_s10 }
0x1885   :  { %v2998_v37 = vpop.permute.xlu0 %2997 }
0x1886   :  { %v3000_v10 = vadd.f32 %v2998_v37, %v2980_v3 }
0x1888   :  { %6416 = vtanh.f32 %v3000_v10 }
0x1892   :  { %v6417_v52 = vpop.eup %6416 }
0x1893   :  { %3004 = vrot.lane.b32.xlu1 %v6417_v52, %s6579_s8 }
0x1905   :  { %v3005_v20 = vpop.permute.xlu1 %3004 }
0x1906   :  { %v3007_v50 = vmul.f32 %v3005_v20, %v3002_v16 }
0x1908   :  { %v7398_v30 = vadd.f32 %v3009_v46, %v3007_v50 }
0x190a   :  { %3012 = vrot.lane.b32.xlu0 %v7398_v30, %s6579_s8 }
0x197c   :  { %v3013_v36 = vpop.permute.xlu0 %3012 }
0x197d   :  { %5666 = vmatmul.mubr.msk.f32.vlgmr.msra.gmra.mrb[26].mxu1 %vm286_vm2, %v3013_v36  ;;  %5696 = vmatmul.mubr.msk.f32.vlgmr.msra.gmra.mrb[26].mxu0 %vm286_vm2, %v3013_v36 }
0x197e   :  { %6154 = vmatpush3.bf16.msra.mxu1 %v7017_v57  ;;  %5684 = vmatprep.mubr.msk.f32.mxu1 %vm6575_vm0, %v7855_v6 }
0x197f   :  { %6155 = vmatprep.subr.bf16.mxu1 %v7871_v32  ;;  %6173 = vmatpush3.bf16.msra.mxu0 %v6850_v60 }
0x1980   :  { %6175 = vmatprep.subr.bf16.mxu0 %v6855_v62 }
0x1982   :  { %6157 = vmatpush3.bf16.msra.mxu1 %v7028_v63 }
0x1983   :  { %6158 = vmatprep.subr.bf16.mxu1 %v7871_v32  ;;  %6177 = vmatpush3.bf16.msra.mxu0 %v6855_v62 }
0x1984   :  { %6190 = vmatprep.subr.bf16.mxu0 %v7871_v32 }
0x1986   :  { %6160 = vmatpush3.bf16.msra.mxu1 %v7042_v2 }
0x1987   :  { %6161 = vmatprep.subr.bf16.mxu1 %v7871_v32 }
0x198a   :  { %6163 = vmatpush3.bf16.msra.mxu1 %v7054_v12 }
0x198b   :  { %6178 = vmatprep.subr.bf16.mxu1 %v7871_v32 }
0x198d   :  { %5685 = vmatmul.mubr.msk.f32.vlgmr.msra.gmra.mrb[26].mxu1 %vm109_vm1, %v2907_v31 }
0x198e   :  { %6180 = vmatpush3.bf16.msra.mxu1 %v6927_v38  ;;  %5725 = vmatprep.mubr.msk.f32.mxu1 %vm6575_vm0, %v7855_v6 }
0x198f   :  { %6181 = vmatprep.subr.bf16.mxu1 %v7871_v32 }
0x1992   :  { %6183 = vmatpush3.bf16.msra.mxu1 %v6937_v41 }
0x1993   :  { %6184 = vmatprep.subr.bf16.mxu1 %v7871_v32 }
0x1996   :  { %6186 = vmatpush3.bf16.msra.mxu1 %v6949_v45 }
0x1997   :  { %6187 = vmatprep.subr.bf16.mxu1 %v7871_v32 }
0x199a   :  { %6189 = vmatpush3.bf16.msra.mxu1 %v6959_v47 }
0x199b   :  { %6208 = vmatprep.subr.bf16.mxu1 %v7871_v32 }
0x1a50   :  { %v7429_v31 = vpop.f32.mrb[26].mxu0 }
0x1a51   :  { %v3257_v3 = vrot.slane %v7429_v31, %v6866_v5  ;;  %v5697_v40 = vpop.f32.mrb[27].mxu0 }
0x1a53   :  { %v3258_v14 = vcombine.high %v3257_v3, %v3257_v3  ;;  %v3265_v9 = vrot.slane %v3257_v3, %v6866_v5 }
0x1a55   :  { %v3272_v48 = vrot.slane %v3258_v14, %v6866_v5  ;;  %v3276_v33 = vrot.slane %v3265_v9, %v6875_v11 }
0x1a57   :  { %v3280_v59 = vrot.slane %v3272_v48, %v6875_v11  ;;  %v3283_v0 = vadd.f32 %v3276_v33, %v6831_v53 }
0x1a59   :  { %v3284_v1 = vadd.f32 %v6825_v51, %v3280_v59  ;;  %6418 = vtanh.f32 %v3283_v0 }
0x1a5b   :  { %6420 = vtanh.f32 %v3284_v1 }
0x1a60   :  { %v3153_v13 = vpop.f32.mrb[26].mxu1 }
0x1a61   :  { %v6297_v37 = vadd.f32 %v6899_v27, %v3153_v13  ;;  %v5686_v10 = vpop.f32.mrb[27].mxu1 }
0x1a63   :  { %v6419_v52 = vpop.eup %6418  ;;  %3169 = vst.msk [vmem:[#allocation6 + $0x2] sm:$0x3] %vm980_vm5, %v6297_v37 }
0x1a64   :  { %5706 = vmatprep.mubr.msk.f32.mxu0 %vm286_vm2, %v6419_v52 }
0x1a65   :  { %v6421_v16 = vpop.eup %6420 }
0x1a66   :  { %5707 = vmatmul.mubr.msk.f32.vlgmr.msra.gmra.mrb[28].mxu0 %vm286_vm2, %v6421_v16 }
0x1a67   :  { %6192 = vmatpush3.bf16.msra.mxu0 %v6995_v42  ;;  %5736 = vmatprep.mubr.msk.f32.mxu0 %vm6575_vm0, %v7855_v6 }
0x1a68   :  { %6193 = vmatprep.subr.bf16.mxu0 %v7871_v32 }
0x1a6b   :  { %6195 = vmatpush3.bf16.msra.mxu0 %v7001_v44 }
0x1a6c   :  { %6196 = vmatprep.subr.bf16.mxu0 %v7871_v32 }
0x1b39   :  { %v5708_v20 = vpop.f32.mrb[28].mxu0 }
0x1b3a   :  { %v3369_v23 = vadd.f32 %v7267_v34, %v5708_v20  ;;  %v3359_v46 = vpop.f32.mrb[29].mxu0 }
0x1b3b   :  { %v3368_v50 = vadd.f32 %v7273_v22, %v3359_v46 }
0x1b3c   :  { %v3377_v36 = vsel %vm649_vm3, %v3369_v23, -inf }
0x1b3d   :  { %v3378_v3 = vrot.slane %v3377_v36, 4  ;;  %v3370_v40 = vsel %vm649_vm3, %v3368_v50, -inf }
0x1b3e   :  { %v3371_v14 = vrot.slane %v3370_v40, 4 }
0x1b3f   :  { %v3379_v9 = vmax.f32 %v3377_v36, %v3378_v3 }
0x1b40   :  { %v3372_v48 = vmax.f32 %v3370_v40, %v3371_v14 }
0x1b41   :  { %v3380_v33 = vrot.slane %v3379_v9, 2 }
0x1b42   :  { %v3373_v59 = vrot.slane %v3372_v48, 2 }
0x1b43   :  { %v3381_v0 = vmax.f32 %v3379_v9, %v3380_v33 }
0x1b44   :  { %v3374_v1 = vmax.f32 %v3372_v48, %v3373_v59 }
0x1b45   :  { %v3382_v13 = vrot.slane %v3381_v0, 1 }
0x1b46   :  { %v3375_v37 = vrot.slane %v3374_v1, 1 }
0x1b47   :  { %v3383_v10 = vmax.f32 %v3381_v0, %v3382_v13 }
0x1b48   :  { %v3376_v52 = vmax.f32 %v3374_v1, %v3375_v37 }
0x1b49   :  { %v3385_v16 = vsub.f32 %v3369_v23, %v3383_v10  ;;  %v3249_v10 = vadd.f32 %v7429_v31, %v6868_v7 }
0x1b4a   :  { %v3384_v20 = vsub.f32 %v3368_v50, %v3376_v52 }
0x1b4b   :  { %v3388_v6 = vmul.f32 1.442695, %v3385_v16 }
0x1b4c   :  { %v3386_v46 = vmul.f32 1.442695, %v3384_v20 }
0x1b4d   :  { %6422 = vpow2.f32 %v3388_v6 }
0x1b4e   :  { %6424 = vpow2.f32 %v3386_v46 }
0x1b57   :  { %v6423_v35 = vpop.eup %6422 }
0x1b58   :  { %v6425_v21 = vpop.eup %6424  ;;  %v3397_v39 = vsel %vm649_vm3, %v6423_v35, 0.0 }
0x1b59   :  { %v3398_v36 = vrot.slane %v3397_v39, 4  ;;  %v3390_v3 = vsel %vm649_vm3, %v6425_v21, 0.0 }
0x1b5a   :  { %v3391_v40 = vrot.slane %v3390_v3, 4 }
0x1b5b   :  { %v3399_v14 = vadd.f32 %v3398_v36, %v3397_v39  ;;  %v3514_v39 = vrot.slane %v3249_v10, 6 }
0x1b5c   :  { %v3392_v9 = vadd.f32 %v3391_v40, %v3390_v3 }
0x1b5d   :  { %v3400_v48 = vrot.slane %v3399_v14, 2 }
0x1b5e   :  { %v3393_v33 = vrot.slane %v3392_v9, 2 }
0x1b5f   :  { %v3401_v59 = vadd.f32 %v3400_v48, %v3399_v14 }
0x1b60   :  { %v3394_v0 = vadd.f32 %v3393_v33, %v3392_v9 }
0x1b61   :  { %v3402_v23 = vrot.slane %v3401_v59, 1 }
0x1b62   :  { %v3395_v50 = vrot.slane %v3394_v0, 1 }
0x1b63   :  { %v3403_v1 = vadd.f32 %v3402_v23, %v3401_v59 }
0x1b64   :  { %v3396_v13 = vadd.f32 %v3395_v50, %v3394_v0 }
0x1b65   :  { %6426 = vrcp.f32 %v3403_v1 }
0x1b66   :  { %6428 = vrcp.f32 %v3396_v13 }
0x1b6f   :  { %v6427_v6 = vpop.eup %6426 }
0x1b70   :  { %v6429_v37 = vpop.eup %6428  ;;  %v7457_v52 = vmul.f32 %v6427_v6, %v6423_v35 }
0x1b71   :  { %v7459_v16 = vmul.f32 %v6429_v37, %v6425_v21 }
0x1b72   :  { %7873 = vst [vmem:[#allocation15_spill] sm:$0xff] %v7457_v52  ;;  %3415 = vperm.xlu0 %6324, %v7457_v52  }
0x1b73   :  { %3410 = vperm.xlu1 %6325, %v7459_v16  }
0x1b76   :  { %3525 = vrot.lane.b32.xlu0 %v3514_v39, %s6577_s22 }
0x1b77   :  { %3515 = vrot.lane.b32.xlu1 %v3514_v39, %s6579_s8 }
0x1bf1   :  { %v3416_v20 = vpop.permute.xlu0 %3415 }
0x1bf2   :  { %v3419_v46 = vmul.f32 %v7293_v8, %v3416_v20  ;;  %v3411_v36 = vpop.permute.xlu1 %3410 }
0x1bf3   :  { %v3418_v3 = vmul.f32 %v7195_v19, %v3411_v36  ;;  %v7874_v19 = vmov 0.0  }
0x1bf4   :  { %v3427_v35 = vsel %vm109_vm1, %v3419_v46, 0.0 }
0x1bf5   :  { %v3428_v31 = vrot.slane %v3427_v35, 4  ;;  %v3420_v21 = vsel %vm109_vm1, %v3418_v3, 0.0 }
0x1bf6   :  { %v3421_v40 = vrot.slane %v3420_v21, 4  ;;  %v3516_v46 = vpop.permute.xlu1 %3515 }
0x1bf7   :  { %v3429_v14 = vadd.f32 %v3428_v31, %v3427_v35 }
0x1bf8   :  { %v3422_v9 = vadd.f32 %v3421_v40, %v3420_v21  ;;  %v3541_v21 = vrot.slane %v7398_v30, 6 }
0x1bf9   :  { %v3430_v48 = vrot.slane %v3429_v14, 2 }
0x1bfa   :  { %v3423_v33 = vrot.slane %v3422_v9, 2 }
0x1bfb   :  { %v3431_v59 = vadd.f32 %v3430_v48, %v3429_v14  ;;  %v3526_v14 = vpop.permute.xlu0 %3525 }
0x1bfc   :  { %v3424_v0 = vadd.f32 %v3423_v33, %v3422_v9 }
0x1bfd   :  { %v3432_v23 = vrot.slane %v3431_v59, 1 }
0x1bfe   :  { %v3425_v50 = vrot.slane %v3424_v0, 1 }
0x1bff   :  { %v3433_v1 = vadd.f32 %v3432_v23, %v3431_v59 }
0x1c00   :  { %v3426_v13 = vadd.f32 %v3425_v50, %v3424_v0 }
0x1c02   :  { %v3436_v6 = vsel %vm716_vm4, %v3433_v1, %v3426_v13 }
0x1c03   :  { %5726 = vmatmul.mubr.msk.f32.vlgmr.msra.gmra.mrb[28].mxu1 %vm109_vm1, %v3436_v6 }
0x1c04   :  { %6210 = vmatpush3.bf16.msra.mxu1 %v6757_v25  ;;  %5766 = vmatprep.mubr.msk.f32.mxu1 %vm6575_vm0, %v7874_v19 }
0x1c05   :  { %6211 = vmatprep.subr.bf16.mxu1 %v7871_v32 }
0x1c08   :  { %6213 = vmatpush3.bf16.msra.mxu1 %v6766_v29 }
0x1c09   :  { %6215 = vmatprep.subr.bf16.mxu1 %v6850_v60 }
0x1cd6   :  { %v3505_v37 = vpop.f32.mrb[28].mxu1 }
0x1cd7   :  { %v3510_v10 = vrot.slane %v3505_v37, 6  ;;  %v5727_v39 = vpop.f32.mrb[29].mxu1 }
0x1cd9   :  { %v3512_v20 = vadd.f32 %v3510_v10, %v6895_v24 }
0x1cdb   :  { %v3518_v36 = vadd.f32 %v3516_v46, %v3512_v20 }
0x1cdd   :  { %v4952_v3 = vmul.f32 -1.442695, %v3518_v36 }
0x1cdf   :  { %6430 = vpow2.f32 %v4952_v3 }
0x1ce9   :  { %v6431_v35 = vpop.eup %6430 }
0x1cea   :  { %v3522_v31 = vadd.f32 1.0, %v6431_v35 }
0x1cec   :  { %6432 = vrcp.f32 %v3522_v31 }
0x1cf6   :  { %v6433_v40 = vpop.eup %6432 }
0x1cf7   :  { %v3528_v9 = vmul.f32 %v6433_v40, %v3526_v14  ;;  %v3543_v48 = vmul.f32 %v6433_v40, %v3541_v21  ;;  %v3535_v23 = vsub.f32 1.0, %v6433_v40 }
0x1cf9   :  { %3530 = vrot.lane.b32.xlu1 %v3528_v9, %s6581_s10 }
0x1d6b   :  { %v3531_v33 = vpop.permute.xlu1 %3530 }
0x1d6c   :  { %v3533_v59 = vadd.f32 %v3531_v33, %v3512_v20 }
0x1d6e   :  { %6434 = vtanh.f32 %v3533_v59 }
0x1d78   :  { %v6435_v0 = vpop.eup %6434 }
0x1d79   :  { %3537 = vrot.lane.b32.xlu0 %v6435_v0, %s6579_s8 }
0x1deb   :  { %v3538_v50 = vpop.permute.xlu0 %3537 }
0x1dec   :  { %v3540_v1 = vmul.f32 %v3538_v50, %v3535_v23 }
0x1dee   :  { %v7481_v13 = vadd.f32 %v3543_v48, %v3540_v1 }
0x1df0   :  { %v3546_v37 = vrot.slane %v7481_v13, 2 }
0x1df2   :  { %3547 = vrot.lane.b32.xlu1 %v3546_v37, %s6579_s8 }
0x1e64   :  { %v3548_v10 = vpop.permute.xlu1 %3547 }
0x1e65   :  { %5737 = vmatmul.mubr.msk.f32.vlgmr.msra.gmra.mrb[30].mxu0 %vm286_vm2, %v3548_v10  ;;  %5767 = vmatmul.mubr.msk.f32.vlgmr.msra.gmra.mrb[30].mxu1 %vm286_vm2, %v3548_v10 }
0x1e66   :  { %6198 = vmatpush3.bf16.msra.mxu0 %v7017_v57  ;;  %5755 = vmatprep.mubr.msk.f32.mxu0 %vm6575_vm0, %v7874_v19 }
0x1e67   :  { %6199 = vmatprep.subr.bf16.mxu0 %v7871_v32  ;;  %6217 = vmatpush3.bf16.msra.mxu1 %v6850_v60 }
0x1e68   :  { %6219 = vmatprep.subr.bf16.mxu1 %v6855_v62 }
0x1e6a   :  { %6201 = vmatpush3.bf16.msra.mxu0 %v7028_v63 }
0x1e6b   :  { %6202 = vmatprep.subr.bf16.mxu0 %v7871_v32  ;;  %6221 = vmatpush3.bf16.msra.mxu1 %v6855_v62 }
0x1e6c   :  { %6234 = vmatprep.subr.bf16.mxu1 %v7871_v32 }
0x1e6e   :  { %6204 = vmatpush3.bf16.msra.mxu0 %v7042_v2 }
0x1e6f   :  { %6205 = vmatprep.subr.bf16.mxu0 %v7871_v32 }
0x1e72   :  { %6207 = vmatpush3.bf16.msra.mxu0 %v7054_v12 }
0x1e73   :  { %6222 = vmatprep.subr.bf16.mxu0 %v7871_v32 }
0x1e75   :  { %5756 = vmatmul.mubr.msk.f32.vlgmr.msra.gmra.mrb[32].mxu0 %vm109_vm1, %v3436_v6 }
0x1e76   :  { %6224 = vmatpush3.bf16.msra.mxu0 %v6927_v38  ;;  %5796 = vmatprep.mubr.msk.f32.mxu0 %vm6575_vm0, %v7874_v19 }
0x1e77   :  { %6225 = vmatprep.subr.bf16.mxu0 %v7871_v32 }
0x1e7a   :  { %6227 = vmatpush3.bf16.msra.mxu0 %v6937_v41 }
0x1e7b   :  { %6228 = vmatprep.subr.bf16.mxu0 %v7871_v32 }
0x1e7e   :  { %6230 = vmatpush3.bf16.msra.mxu0 %v6949_v45 }
0x1e7f   :  { %6231 = vmatprep.subr.bf16.mxu0 %v7871_v32 }
0x1e82   :  { %6233 = vmatpush3.bf16.msra.mxu0 %v6959_v47 }
0x1e83   :  { %6252 = vmatprep.subr.bf16.mxu0 %v7871_v32 }
0x1f38   :  { %v3617_v6 = vpop.f32.mrb[30].mxu0  ;;  %v7512_v39 = vpop.f32.mrb[30].mxu1 }
0x1f39   :  { %v3622_v20 = vrot.slane %v3617_v6, 6  ;;  %v3809_v46 = vrot.slane %v7512_v39, %v6866_v5  ;;  %v5738_v36 = vpop.f32.mrb[31].mxu0  ;;  %v5768_v3 = vpop.f32.mrb[31].mxu1 }
0x1f3b   :  { %v3624_v35 = vadd.f32 %v6899_v27, %v3622_v20  ;;  %v3810_v31 = vcombine.high %v3809_v46, %v3809_v46  ;;  %v3817_v21 = vrot.slane %v3809_v46, %v6866_v5 }
0x1f3d   :  { %v3824_v40 = vrot.slane %v3810_v31, %v6866_v5  ;;  %v3828_v14 = vrot.slane %v3817_v21, %v6875_v11 }
0x1f3f   :  { %v3832_v9 = vrot.slane %v3824_v40, %v6875_v11  ;;  %v3835_v48 = vadd.f32 %v3828_v14, %v6831_v53 }
0x1f41   :  { %v3836_v33 = vadd.f32 %v6825_v51, %v3832_v9  ;;  %6436 = vtanh.f32 %v3835_v48 }
0x1f43   :  { %6438 = vtanh.f32 %v3836_v33 }
0x1f48   :  { %v3691_v59 = vpop.f32.mrb[32].mxu0 }
0x1f49   :  { %v3696_v0 = vrot.slane %v3691_v59, 6  ;;  %v5757_v23 = vpop.f32.mrb[33].mxu0 }
0x1f4b   :  { %v6437_v50 = vpop.eup %6436  ;;  %v7523_v1 = vadd.f32 %v3696_v0, %v3624_v35 }
0x1f4c   :  { %5777 = vmatprep.mubr.msk.f32.mxu1 %vm286_vm2, %v6437_v50 }
0x1f4d   :  { %7875 = vst [vmem:[#allocation16_spill] sm:$0xff] %v7523_v1  ;;  %v6439_v37 = vpop.eup %6438 }
0x1f4e   :  { %5778 = vmatmul.mubr.msk.f32.vlgmr.msra.gmra.mrb[32].mxu1 %vm286_vm2, %v6439_v37 }
0x1f4f   :  { %6236 = vmatpush3.bf16.msra.mxu1 %v6995_v42  ;;  %5807 = vmatprep.mubr.msk.f32.mxu1 %vm6575_vm0, %v7874_v19 }
0x1f50   :  { %6237 = vmatprep.subr.bf16.mxu1 %v7871_v32 }
0x1f53   :  { %6239 = vmatpush3.bf16.msra.mxu1 %v7001_v44 }
0x1f54   :  { %6240 = vmatprep.subr.bf16.mxu1 %v7871_v32 }
0x2021   :  { %v5779_v10 = vpop.f32.mrb[32].mxu1 }
0x2022   :  { %v3921_v6 = vadd.f32 %v7267_v34, %v5779_v10  ;;  %v3911_v20 = vpop.f32.mrb[33].mxu1 }
0x2023   :  { %v3920_v46 = vadd.f32 %v7273_v22, %v3911_v20 }
0x2024   :  { %v3929_v36 = vsel %vm649_vm3, %v3921_v6, -inf }
0x2025   :  { %v3930_v3 = vrot.slane %v3929_v36, 4  ;;  %v3922_v35 = vsel %vm649_vm3, %v3920_v46, -inf }
0x2026   :  { %v3923_v31 = vrot.slane %v3922_v35, 4 }
0x2027   :  { %v3931_v21 = vmax.f32 %v3929_v36, %v3930_v3 }
0x2028   :  { %v3924_v40 = vmax.f32 %v3922_v35, %v3923_v31 }
0x2029   :  { %v3932_v14 = vrot.slane %v3931_v21, 2 }
0x202a   :  { %v3925_v9 = vrot.slane %v3924_v40, 2 }
0x202b   :  { %v3933_v48 = vmax.f32 %v3931_v21, %v3932_v14 }
0x202c   :  { %v3926_v33 = vmax.f32 %v3924_v40, %v3925_v9 }
0x202d   :  { %v3934_v59 = vrot.slane %v3933_v48, 1 }
0x202e   :  { %v3927_v0 = vrot.slane %v3926_v33, 1 }
0x202f   :  { %v3935_v23 = vmax.f32 %v3933_v48, %v3934_v59 }
0x2030   :  { %v3928_v50 = vmax.f32 %v3926_v33, %v3927_v0 }
0x2031   :  { %v3937_v34 = vsub.f32 %v3921_v6, %v3935_v23 }
0x2032   :  { %v3936_v37 = vsub.f32 %v3920_v46, %v3928_v50  ;;  %v3801_v50 = vadd.f32 %v7512_v39, %v6868_v7  ;;  %v7553_v39 = vld [vmem:[%s7865_s27] sm:$0xff] }
0x2033   :  { %v3940_v10 = vmul.f32 1.442695, %v3937_v34 }
0x2034   :  { %v3938_v22 = vmul.f32 1.442695, %v3936_v37 }
0x2035   :  { %6440 = vpow2.f32 %v3940_v10 }
0x2036   :  { %6442 = vpow2.f32 %v3938_v22 }
0x203f   :  { %v6441_v20 = vpop.eup %6440 }
0x2040   :  { %v6443_v52 = vpop.eup %6442  ;;  %v3949_v1 = vsel %vm649_vm3, %v6441_v20, 0.0 }
0x2041   :  { %v3950_v36 = vrot.slane %v3949_v1, 4  ;;  %v3942_v3 = vsel %vm649_vm3, %v6443_v52, 0.0 }
0x2042   :  { %v3943_v35 = vrot.slane %v3942_v3, 4 }
0x2043   :  { %v3951_v31 = vadd.f32 %v3950_v36, %v3949_v1  ;;  %v4066_v1 = vrot.slane %v3801_v50, 4 }
0x2044   :  { %v3944_v21 = vadd.f32 %v3943_v35, %v3942_v3 }
0x2045   :  { %v3952_v40 = vrot.slane %v3951_v31, 2 }
0x2046   :  { %v3945_v14 = vrot.slane %v3944_v21, 2 }
0x2047   :  { %v3953_v9 = vadd.f32 %v3952_v40, %v3951_v31 }
0x2048   :  { %v3946_v48 = vadd.f32 %v3945_v14, %v3944_v21 }
0x2049   :  { %v3954_v6 = vrot.slane %v3953_v9, 1 }
0x204a   :  { %v3947_v46 = vrot.slane %v3946_v48, 1 }
0x204b   :  { %v3955_v33 = vadd.f32 %v3954_v6, %v3953_v9 }
0x204c   :  { %v3948_v59 = vadd.f32 %v3947_v46, %v3946_v48 }
0x204d   :  { %6444 = vrcp.f32 %v3955_v33 }
0x204e   :  { %6446 = vrcp.f32 %v3948_v59 }
0x2057   :  { %v6445_v0 = vpop.eup %6444 }
0x2058   :  { %v6447_v23 = vpop.eup %6446  ;;  %v7541_v34 = vmul.f32 %v6445_v0, %v6441_v20 }
0x2059   :  { %v7543_v37 = vmul.f32 %v6447_v23, %v6443_v52 }
0x205a   :  { %3967 = vperm.xlu1 %6325, %v7541_v34  }
0x205b   :  { %3962 = vperm.xlu0 %6324, %v7543_v37  }
0x205e   :  { %4077 = vrot.lane.b32.xlu1 %v4066_v1, %s6577_s22 }
0x205f   :  { %4067 = vrot.lane.b32.xlu0 %v4066_v1, %s6579_s8 }
0x20d9   :  { %v3968_v10 = vpop.permute.xlu1 %3967 }
0x20da   :  { %v3971_v22 = vmul.f32 %v7293_v8, %v3968_v10  ;;  %v3963_v36 = vpop.permute.xlu0 %3962 }
0x20db   :  { %v3970_v52 = vmul.f32 %v7553_v39, %v3963_v36 }
0x20dc   :  { %v3979_v20 = vsel %vm109_vm1, %v3971_v22, 0.0 }
0x20dd   :  { %v3980_v3 = vrot.slane %v3979_v20, 4  ;;  %v3972_v35 = vsel %vm109_vm1, %v3970_v52, 0.0 }
0x20de   :  { %v3973_v31 = vrot.slane %v3972_v35, 4  ;;  %v4068_v22 = vpop.permute.xlu0 %4067 }
0x20df   :  { %v3981_v21 = vadd.f32 %v3980_v3, %v3979_v20  ;;  %v4093_v3 = vrot.slane %v7481_v13, 6 }
0x20e0   :  { %v3974_v40 = vadd.f32 %v3973_v31, %v3972_v35  ;;  %v4078_v31 = vpop.permute.xlu1 %4077 }
0x20e1   :  { %v3982_v14 = vrot.slane %v3981_v21, 2 }
0x20e2   :  { %v3975_v9 = vrot.slane %v3974_v40, 2 }
0x20e3   :  { %v3983_v48 = vadd.f32 %v3982_v14, %v3981_v21 }
0x20e4   :  { %v3976_v8 = vadd.f32 %v3975_v9, %v3974_v40 }
0x20e5   :  { %v3984_v6 = vrot.slane %v3983_v48, 1 }
0x20e6   :  { %v3977_v46 = vrot.slane %v3976_v8, 1 }
0x20e7   :  { %v3985_v33 = vadd.f32 %v3984_v6, %v3983_v48 }
0x20e8   :  { %v3978_v59 = vadd.f32 %v3977_v46, %v3976_v8 }
0x20ea   :  { %v3988_v0 = vsel %vm716_vm4, %v3985_v33, %v3978_v59 }
0x20eb   :  { %5797 = vmatmul.mubr.msk.f32.vlgmr.msra.gmra.mrb[34].mxu0 %vm109_vm1, %v3988_v0 }
0x20ec   :  { %6254 = vmatpush3.bf16.msra.mxu0 %v6757_v25  ;;  %5837 = vmatprep.mubr.msk.f32.mxu0 %vm6575_vm0, %v7874_v19 }
0x20ed   :  { %6255 = vmatprep.subr.bf16.mxu0 %v7871_v32 }
0x20f0   :  { %6257 = vmatpush3.bf16.msra.mxu0 %v6766_v29 }
0x20f1   :  { %6259 = vmatprep.subr.bf16.mxu0 %v6850_v60 }
0x21be   :  { %v4057_v23 = vpop.f32.mrb[34].mxu0 }
0x21bf   :  { %v4062_v50 = vrot.slane %v4057_v23, 4  ;;  %v5798_v1 = vpop.f32.mrb[35].mxu0 }
0x21c1   :  { %v4064_v10 = vadd.f32 %v4062_v50, %v6895_v24 }
0x21c3   :  { %v4070_v36 = vadd.f32 %v4068_v22, %v4064_v10 }
0x21c5   :  { %v4959_v52 = vmul.f32 -1.442695, %v4070_v36 }
0x21c7   :  { %6448 = vpow2.f32 %v4959_v52 }
0x21d1   :  { %v6449_v20 = vpop.eup %6448 }
0x21d2   :  { %v4074_v25 = vadd.f32 1.0, %v6449_v20 }
0x21d4   :  { %6450 = vrcp.f32 %v4074_v25 }
0x21de   :  { %v6451_v35 = vpop.eup %6450 }
0x21df   :  { %v4080_v21 = vmul.f32 %v6451_v35, %v4078_v31  ;;  %v4095_v29 = vmul.f32 %v6451_v35, %v4093_v3  ;;  %v4087_v48 = vsub.f32 1.0, %v6451_v35 }
0x21e1   :  { %4082 = vrot.lane.b32.xlu0 %v4080_v21, %s6581_s10 }
0x2253   :  { %v4083_v40 = vpop.permute.xlu0 %4082 }
0x2254   :  { %v4085_v14 = vadd.f32 %v4083_v40, %v4064_v10 }
0x2256   :  { %6452 = vtanh.f32 %v4085_v14 }
0x2260   :  { %v6453_v9 = vpop.eup %6452 }
0x2261   :  { %4089 = vrot.lane.b32.xlu1 %v6453_v9, %s6579_s8 }
0x22d3   :  { %v4090_v8 = vpop.permute.xlu1 %4089 }
0x22d4   :  { %v4092_v6 = vmul.f32 %v4090_v8, %v4087_v48 }
0x22d6   :  { %v7570_v46 = vadd.f32 %v4095_v29, %v4092_v6 }
0x22d8   :  { %v4098_v33 = vrot.slane %v7570_v46, 4 }
0x22da   :  { %4099 = vrot.lane.b32.xlu0 %v4098_v33, %s6579_s8 }
0x234c   :  { %v4100_v59 = vpop.permute.xlu0 %4099 }
0x234d   :  { %5808 = vmatmul.mubr.msk.f32.vlgmr.msra.gmra.mrb[34].mxu1 %vm286_vm2, %v4100_v59  ;;  %5838 = vmatmul.mubr.msk.f32.vlgmr.msra.gmra.mrb[36].mxu0 %vm286_vm2, %v4100_v59 }
0x234e   :  { %6242 = vmatpush3.bf16.msra.mxu1 %v7017_v57  ;;  %5826 = vmatprep.mubr.msk.f32.mxu1 %vm6575_vm0, %v7874_v19 }
0x234f   :  { %6243 = vmatprep.subr.bf16.mxu1 %v7871_v32  ;;  %6261 = vmatpush3.bf16.msra.mxu0 %v6850_v60 }
0x2350   :  { %6263 = vmatprep.subr.bf16.mxu0 %v6855_v62 }
0x2352   :  { %6245 = vmatpush3.bf16.msra.mxu1 %v7028_v63 }
0x2353   :  { %6246 = vmatprep.subr.bf16.mxu1 %v7871_v32  ;;  %6265 = vmatpush3.bf16.msra.mxu0 %v6855_v62 }
0x2354   :  { %6278 = vmatprep.subr.bf16.mxu0 %v7871_v32 }
0x2356   :  { %6248 = vmatpush3.bf16.msra.mxu1 %v7042_v2 }
0x2357   :  { %6249 = vmatprep.subr.bf16.mxu1 %v7871_v32 }
0x235a   :  { %6251 = vmatpush3.bf16.msra.mxu1 %v7054_v12 }
0x235b   :  { %6266 = vmatprep.subr.bf16.mxu1 %v7871_v32 }
0x235d   :  { %5827 = vmatmul.mubr.msk.f32.vlgmr.msra.gmra.mrb[36].mxu1 %vm109_vm1, %v3988_v0 }
0x235e   :  { %6268 = vmatpush3.bf16.msra.mxu1 %v6927_v38  ;;  %5867 = vmatprep.mubr.msk.f32.mxu1 %vm6575_vm0, %v7874_v19 }
0x235f   :  { %6269 = vmatprep.subr.bf16.mxu1 %v7871_v32 }
0x2362   :  { %6271 = vmatpush3.bf16.msra.mxu1 %v6937_v41 }
0x2363   :  { %6272 = vmatprep.subr.bf16.mxu1 %v7871_v32 }
0x2366   :  { %6274 = vmatpush3.bf16.msra.mxu1 %v6949_v45 }
0x2367   :  { %6275 = vmatprep.subr.bf16.mxu1 %v7871_v32 }
0x236a   :  { %6277 = vmatpush3.bf16.msra.mxu1 %v6959_v47 }
0x2420   :  { %v4169_v60 = vpop.f32.mrb[34].mxu1  ;;  %v7600_v62 = vpop.f32.mrb[36].mxu0 }
0x2421   :  { %v4174_v0 = vrot.slane %v4169_v60, 4  ;;  %v4363_v38 = vrot.slane %v7600_v62, %v6866_v5  ;;  %v5809_v23 = vpop.f32.mrb[35].mxu1  ;;  %v5839_v50 = vpop.f32.mrb[37].mxu0 }
0x2423   :  { %v4176_v1 = vadd.f32 %v6899_v27, %v4174_v0  ;;  %v4364_v41 = vcombine.high %v4363_v38, %v4363_v38  ;;  %v4371_v10 = vrot.slane %v4363_v38, %v6866_v5 }
0x2425   :  { %v4378_v45 = vrot.slane %v4364_v41, %v6866_v5  ;;  %v4382_v22 = vrot.slane %v4371_v10, %v6875_v11 }
0x2427   :  { %v4386_v47 = vrot.slane %v4378_v45, %v6875_v11  ;;  %v4389_v36 = vadd.f32 %v4382_v22, %v6831_v53  ;;  %v6477_v53 = vld [vmem:[%s7867_s29 + $0x8] sm:$0xff] }
0x2429   :  { %v4390_v52 = vadd.f32 %v6825_v51, %v4386_v47  ;;  %6454 = vtanh.f32 %v4389_v36 }
0x242b   :  { %6456 = vtanh.f32 %v4390_v52 }
0x2430   :  { %v4243_v20 = vpop.f32.mrb[36].mxu1 }
0x2431   :  { %v4248_v25 = vrot.slane %v4243_v20, 4  ;;  %v5828_v3 = vpop.f32.mrb[37].mxu1 }
0x2433   :  { %v6455_v35 = vpop.eup %6454  ;;  %v7611_v31 = vadd.f32 %v4248_v25, %v4176_v1 }
0x2434   :  { %5848 = vmatprep.mubr.msk.f32.mxu0 %vm286_vm2, %v6455_v35 }
0x2435   :  { %v6457_v21 = vpop.eup %6456 }
0x2436   :  { %5849 = vmatmul.mubr.msk.f32.vlgmr.msra.gmra.mrb[38].mxu0 %vm286_vm2, %v6457_v21 }
0x2437   :  { %6280 = vmatpush3.bf16.msra.mxu0 %v6995_v42  ;;  %5878 = vmatprep.mubr.msk.f32.mxu0 %vm6575_vm0, %v7874_v19  ;;  %v6478_v42 = vld [vmem:[%s7867_s29] sm:$0xff] }
0x2438   :  { %6281 = vmatprep.subr.bf16.mxu0 %v7871_v32 }
0x243b   :  { %6283 = vmatpush3.bf16.msra.mxu0 %v7001_v44 }
0x243c   :  { %6284 = vmatprep.subr.bf16.mxu0 %v7871_v32 }
0x2509   :  { %v5850_v51 = vpop.f32.mrb[38].mxu0 }
0x250a   :  { %v4475_v5 = vadd.f32 %v6477_v53, %v5850_v51  ;;  %v4465_v11 = vpop.f32.mrb[39].mxu0 }
0x250b   :  { %v4474_v29 = vadd.f32 %v6478_v42, %v4465_v11 }
0x250c   :  { %v4483_v40 = vsel %vm649_vm3, %v4475_v5, -inf }
0x250d   :  { %v4484_v14 = vrot.slane %v4483_v40, 4  ;;  %v4476_v9 = vsel %vm649_vm3, %v4474_v29, -inf }
0x250e   :  { %v4477_v44 = vrot.slane %v4476_v9, 4 }
0x250f   :  { %v4485_v48 = vmax.f32 %v4483_v40, %v4484_v14 }
0x2510   :  { %v4478_v8 = vmax.f32 %v4476_v9, %v4477_v44  ;;  %v4355_v44 = vadd.f32 %v7600_v62, %v6868_v7 }
0x2511   :  { %v4486_v6 = vrot.slane %v4485_v48, 2 }
0x2512   :  { %v4479_v33 = vrot.slane %v4478_v8, 2 }
0x2513   :  { %v4487_v59 = vmax.f32 %v4485_v48, %v4486_v6  ;;  %v4620_v6 = vrot.slane %v4355_v44, 2 }
0x2514   :  { %v4480_v60 = vmax.f32 %v4478_v8, %v4479_v33 }
0x2515   :  { %v4488_v0 = vrot.slane %v4487_v59, 1 }
0x2516   :  { %v4481_v38 = vrot.slane %v4480_v60, 1 }
0x2517   :  { %v4489_v23 = vmax.f32 %v4487_v59, %v4488_v0  ;;  %v6479_v59 = vld [vmem:[%s7865_s27 + $0x8] sm:$0xff]  ;;  %s6583_s27 = smov 1  }
0x2518   :  { %v4482_v50 = vmax.f32 %v4480_v60, %v4481_v38 }
0x2519   :  { %v4491_v1 = vsub.f32 %v4475_v5, %v4489_v23 }
0x251a   :  { %v4490_v41 = vsub.f32 %v4474_v29, %v4482_v50 }
0x251b   :  { %v4494_v10 = vmul.f32 1.442695, %v4491_v1 }
0x251c   :  { %v4492_v45 = vmul.f32 1.442695, %v4490_v41 }
0x251d   :  { %6458 = vpow2.f32 %v4494_v10 }
0x251e   :  { %6460 = vpow2.f32 %v4492_v45 }
0x2527   :  { %v6459_v22 = vpop.eup %6458 }
0x2528   :  { %v6461_v47 = vpop.eup %6460  ;;  %v4503_v36 = vsel %vm649_vm3, %v6459_v22, 0.0 }
0x2529   :  { %v4504_v52 = vrot.slane %v4503_v36, 4  ;;  %v4496_v20 = vsel %vm649_vm3, %v6461_v47, 0.0 }
0x252a   :  { %v4497_v25 = vrot.slane %v4496_v20, 4 }
0x252b   :  { %v4505_v3 = vadd.f32 %v4504_v52, %v4503_v36 }
0x252c   :  { %v4498_v35 = vadd.f32 %v4497_v25, %v4496_v20 }
0x252d   :  { %v4506_v21 = vrot.slane %v4505_v3, 2 }
0x252e   :  { %v4499_v51 = vrot.slane %v4498_v35, 2 }
0x252f   :  { %v4507_v53 = vadd.f32 %v4506_v21, %v4505_v3 }
0x2530   :  { %v4500_v11 = vadd.f32 %v4499_v51, %v4498_v35 }
0x2531   :  { %v4508_v5 = vrot.slane %v4507_v53, 1 }
0x2532   :  { %v4501_v42 = vrot.slane %v4500_v11, 1 }
0x2533   :  { %v4509_v29 = vadd.f32 %v4508_v5, %v4507_v53 }
0x2534   :  { %v4502_v40 = vadd.f32 %v4501_v42, %v4500_v11 }
0x2535   :  { %6462 = vrcp.f32 %v4509_v29 }
0x2536   :  { %6464 = vrcp.f32 %v4502_v40  ;;  %v4647_v40 = vrot.slane %v7570_v46, 6 }
0x253f   :  { %v6463_v14 = vpop.eup %6462 }
0x2540   :  { %v6465_v9 = vpop.eup %6464  ;;  %v7633_v48 = vmul.f32 %v6463_v14, %v6459_v22 }
0x2541   :  { %v7635_v8 = vmul.f32 %v6465_v9, %v6461_v47 }
0x2542   :  { %4521 = vperm.xlu0 %6324, %v7633_v48  }
0x2543   :  { %4516 = vperm.xlu1 %6325, %v7635_v8  }
0x2546   :  { %4631 = vrot.lane.b32.xlu0 %v4620_v6, %s6577_s22 }
0x2547   :  { %4621 = vrot.lane.b32.xlu1 %v4620_v6, %s6579_s8 }
0x25c1   :  { %v4522_v33 = vpop.permute.xlu0 %4521 }
0x25c2   :  { %v4525_v60 = vmul.f32 %v6479_v59, %v4522_v33  ;;  %v4517_v7 = vpop.permute.xlu1 %4516 }
0x25c3   :  { %v4524_v62 = vmul.f32 %v7553_v39, %v4517_v7 }
0x25c4   :  { %v4533_v0 = vsel %vm109_vm1, %v4525_v60, 0.0 }
0x25c5   :  { %v4534_v38 = vrot.slane %v4533_v0, 4  ;;  %v4526_v23 = vsel %vm109_vm1, %v4524_v62, 0.0  ;;  %v4632_v9 = vpop.permute.xlu0 %4631 }
0x25c6   :  { %v4527_v50 = vrot.slane %v4526_v23, 4  ;;  %v4622_v53 = vpop.permute.xlu1 %4621 }
0x25c7   :  { %v4535_v1 = vadd.f32 %v4534_v38, %v4533_v0 }
0x25c8   :  { %v4528_v41 = vadd.f32 %v4527_v50, %v4526_v23 }
0x25c9   :  { %v4536_v10 = vrot.slane %v4535_v1, 2 }
0x25ca   :  { %v4529_v45 = vrot.slane %v4528_v41, 2 }
0x25cb   :  { %v4537_v22 = vadd.f32 %v4536_v10, %v4535_v1 }
0x25cc   :  { %v4530_v47 = vadd.f32 %v4529_v45, %v4528_v41 }
0x25cd   :  { %v4538_v36 = vrot.slane %v4537_v22, 1 }
0x25ce   :  { %v4531_v52 = vrot.slane %v4530_v47, 1 }
0x25cf   :  { %v4539_v20 = vadd.f32 %v4538_v36, %v4537_v22  ;;  %v7876_v36 = vld [vmem:[#allocation16_spill] sm:$0xff] }
0x25d0   :  { %v4532_v25 = vadd.f32 %v4531_v52, %v4530_v47 }
0x25d2   :  { %v7648_v3 = vsel %vm716_vm4, %v4539_v20, %v4532_v25  ;;  %v7877_v20 = vld [vmem:[#allocation14_spill] sm:$0xff] }
0x25d3   :  { %5868 = vmatmul.mubr.msk.f32.vlgmr.msra.gmra.mrb[38].mxu1 %vm109_vm1, %v7648_v3 }
0x26a6   :  { %v4611_v39 = vpop.f32.mrb[38].mxu1 }
0x26a7   :  { %v4616_v35 = vrot.slane %v4611_v39, 2  ;;  %v5869_v21 = vpop.f32.mrb[39].mxu1  ;;  %v7878_v39 = vld [vmem:[#allocation12_spill] sm:$0xff] }
0x26a8   :  { %v7879_v21 = vld [vmem:[#allocation15_spill] sm:$0xff] }
0x26a9   :  { %v4618_v51 = vadd.f32 %v4616_v35, %v6895_v24  ;;  %v6582_v24 = vmov 1983009808   ;;  %v2072_v35 = vcombine.high %v7878_v39, %v7878_v39 }
0x26aa   :  { %v971_v7 = vunpack.c.l.s4 %v6582_v24 }
0x26ab   :  { %v4624_v11 = vadd.f32 %v4622_v53, %v4618_v51  ;;  %v4264_v53 = vcombine.high %v7611_v31, %v7611_v31 }
0x26ac   :  { %v972_v62 = vunpack.c.0.s8 %v971_v7 }
0x26ad   :  { %v4966_v5 = vmul.f32 -1.442695, %v4624_v11 }
0x26ae   :  { %v7661_v0 = vsub.s32 %v972_v62, %v6863_v4  ;;  %v2058_v4 = vcombine.high %v7212_v26, %v7212_v26  ;;  %v2628_v26 = vcombine.high %v7355_v28, %v7355_v28 }
0x26af   :  { %6466 = vpow2.f32 %v4966_v5 }
0x26b0   :  { %v976_v38 = vrot.slane %v7007_v54, %v7661_v0  ;;  %v2065_v54 = vrot.slane %v2058_v4, %v7661_v0  ;;  %v1511_v28 = vrot.slane %v7123_v15, %v7661_v0  ;;  %v3164_v15 = vrot.slane %v7398_v30, %v7661_v0 }
0x26b1   :  { %v3716_v52 = vrot.slane %v7876_v36, %v7661_v0  ;;  %v2079_v11 = vrot.slane %v2072_v35, %v7661_v0 }
0x26b2   :  { %v1512_v22 = vcombine.high %v1511_v28, %v1511_v28 }
0x26b9   :  { %v6467_v42 = vpop.eup %6466 }
0x26ba   :  { %v4628_v29 = vadd.f32 1.0, %v6467_v42  ;;  %v7880_v42 = vld [vmem:[#allocation13_spill] sm:$0xff] }
0x26bc   :  { %6468 = vrcp.f32 %v4628_v29  ;;  %v2613_v29 = vcombine.high %v7880_v42, %v7880_v42 }
0x26c6   :  { %v6469_v14 = vpop.eup %6468 }
0x26c7   :  { %v4634_v44 = vmul.f32 %v6469_v14, %v4632_v9  ;;  %v4649_v6 = vmul.f32 %v6469_v14, %v4647_v40  ;;  %v4271_v40 = vrot.slane %v4264_v53, %v7661_v0 }
0x26c9   :  { %4636 = vrot.lane.b32.xlu1 %v4634_v44, %s6581_s10 }
0x273b   :  { %v4637_v33 = vpop.permute.xlu1 %4636 }
0x273c   :  { %v4639_v59 = vadd.f32 %v4637_v33, %v4618_v51 }
0x273e   :  { %6470 = vtanh.f32 %v4639_v59 }
0x2748   :  { %v6471_v60 = vpop.eup %6470 }
0x2749   :  { %4643 = vrot.lane.b32.xlu0 %v6471_v60, %s6579_s8 }
0x274d   :  { %1529 = vrot.lane.b32.xlu0 %v7101_v56, %s6583_s27  ;;  %v1523_v56 = vrot.slane %v7165_v49, %v7661_v0 }
0x2751   :  { %2084 = vrot.lane.b32.xlu0 %v7185_v18, %s6584_s13  ;;  %v1524_v18 = vcombine.high %v1523_v56, %v1523_v56 }
0x2755   :  { %2641 = vrot.lane.b32.xlu0 %v7284_v61, %s6585_s5  ;;  %v4251_v61 = vcombine.high %v7570_v46, %v7570_v46  ;;  %v2635_v46 = vrot.slane %v2628_v26, %v7661_v0 }
0x2757   :  { %v4258_v49 = vrot.slane %v4251_v61, %v7661_v0 }
0x2759   :  { %977 = vrot.lane.b32.xlu0 %v976_v38, %s6579_s8 }
0x275d   :  { %3170 = vrot.lane.b32.xlu0 %v7373_v43, %s6586_s3  ;;  %v4641_v43 = vsub.f32 1.0, %v6469_v14  ;;  %v2620_v14 = vrot.slane %v2613_v29, %v7661_v0 }
0x275f   :  { %v2621_v31 = vcombine.high %v2620_v14, %v2620_v14 }
0x2761   :  { %1525 = vrot.lane.b32.xlu0 %v1524_v18, %s6577_s22 }
0x2765   :  { %3722 = vrot.lane.b32.xlu0 %v7459_v16, %s6587_s7 }
0x2769   :  { %2066 = vrot.lane.b32.xlu0 %v2065_v54, %s6577_s22 }
0x276d   :  { %4259 = vrot.lane.b32.xlu0 %v4258_v49, %s6577_s22 }
0x2771   :  { %4276 = vrot.lane.b32.xlu0 %v7543_v37, %s6588_s26  ;;  %v2636_v37 = vcombine.high %v2635_v46, %v2635_v46 }
0x27bb   :  { %v4644_v16 = vpop.permute.xlu0 %4643 }
0x27bc   :  { %v4646_v23 = vmul.f32 %v4644_v16, %v4641_v43 }
0x27be   :  { %v4650_v50 = vadd.f32 %v4649_v6, %v4646_v23 }
0x27bf   :  { %v1530_v1 = vpop.permute.xlu0 %1529 }
0x27c0   :  { %1536 = vst.msk [vmem:[#allocation7] sm:$0xff] %vm1535_vm6, %v1530_v1  ;;  %4841 = vrot.lane.b32.xlu0 %v4650_v50, %s6579_s8  ;;  %v4652_v41 = vrot.slane %v4650_v50, 6  ;;  %v4805_v9 = vcombine.high %v4650_v50, %v4650_v50 }
0x27c2   :  { %4653 = vrot.lane.b32.xlu1 %v4652_v41, %s6579_s8  ;;  %v4812_v44 = vrot.slane %v4805_v9, %v7661_v0 }
0x27c3   :  { %v2085_v10 = vpop.permute.xlu0 %2084 }
0x27c4   :  { %2091 = vst.msk [vmem:[#allocation7] sm:$0xff] %vm2090_vm7, %v2085_v10  ;;  %2637 = vrot.lane.b32.xlu0 %v2636_v37, %s6579_s8  ;;  %v4813_v6 = vcombine.high %v4812_v44, %v4812_v44 }
0x27c6   :  { %1531 = vrot.lane.b32.xlu1 %v7099_v55, %s6583_s27 }
0x27c7   :  { %v2642_v45 = vpop.permute.xlu0 %2641 }
0x27c8   :  { %2648 = vst.msk [vmem:[#allocation7] sm:$0xff] %vm2647_vm8, %v2642_v45 }
0x27ca   :  { %2086 = vrot.lane.b32.xlu1 %v7183_v17, %s6584_s13 }
0x27cb   :  { %v978_v47 = vpop.permute.xlu0 %977 }
0x27cc   :  { %981 = vst.msk [vmem:[#allocation2] sm:$0x3] %vm980_vm5, %v978_v47 }
0x27cd   :  { %1515 = vst.msk [vmem:[#allocation2] sm:$0x3] %vm1514_vm9, %v1512_v22 }
0x27ce   :  { %2643 = vrot.lane.b32.xlu1 %v7282_v58, %s6585_s5  ;;  %v3717_v58 = vcombine.high %v3716_v52, %v3716_v52 }
0x27cf   :  { %v3171_v55 = vpop.permute.xlu0 %3170 }
0x27d0   :  { %3177 = vst.msk [vmem:[#allocation7] sm:$0xff] %vm3176_vm10, %v3171_v55 }
0x27d2   :  { %3165 = vrot.lane.b32.xlu1 %v3164_v15, %s6579_s8 }
0x27d3   :  { %v1526_v17 = vpop.permute.xlu0 %1525 }
0x27d4   :  { %1528 = vst.msk [vmem:[#allocation6] sm:$0x3] %vm1514_vm9, %v1526_v17 }
0x27d6   :  { %3172 = vrot.lane.b32.xlu1 %v7877_v20, %s6586_s3 }
0x27d7   :  { %v3723_v25 = vpop.permute.xlu0 %3722 }
0x27d8   :  { %3729 = vst.msk [vmem:[#allocation7] sm:$0xff] %vm3728_vm11, %v3723_v25 }
0x27da   :  { %3718 = vrot.lane.b32.xlu1 %v3717_v58, %s6577_s22  ;;  %s6589_s22 = smov 7  }
0x27db   :  { %v2067_v30 = vpop.permute.xlu0 %2066 }
0x27dc   :  { %2070 = vst.msk [vmem:[#allocation2] sm:$0x3] %vm2069_vm12, %v2067_v30 }
0x27de   :  { %3724 = vrot.lane.b32.xlu1 %v7879_v21, %s6587_s7 }
0x27df   :  { %v4260_v51 = vpop.permute.xlu0 %4259 }
0x27e2   :  { %2080 = vrot.lane.b32.xlu1 %v2079_v11, %s6581_s10 }
0x27e3   :  { %v4277_v5 = vpop.permute.xlu0 %4276 }
0x27e4   :  { %4283 = vst.msk [vmem:[#allocation7] sm:$0xff] %vm4282_vm13, %v4277_v5 }
0x27e6   :  { %4272 = vrot.lane.b32.xlu1 %v4271_v40, %s6581_s10 }
0x27ea   :  { %4278 = vrot.lane.b32.xlu1 %v7541_v34, %s6588_s26 }
0x27ee   :  { %2622 = vrot.lane.b32.xlu1 %v2621_v31, %s6581_s10 }
0x27f2   :  { %4814 = vrot.lane.b32.xlu1 %v4813_v6, %s6581_s10  ;;  %s6590_s10 = smov [#allocation4]  }
0x27f3   :  { %s4862_s28 = sshll.u32 %s6590_s10, 4  ;;  %s4863_s28 = int_to_ptr.vmem [resolvable:$true] %s4862_s28 }
0x27f4   :  { %s6480_s0 = scalar_lea.vmem %s4863_s28, 32  ;;  %p6485_p1 = scmp.lt.s32.totalorder %s4863_s28, %s4863_s28 }
0x27f5   :  { %p6481_p0 = scmp.ne.s32.totalorder %s4863_s28, %s6480_s0  ;;  %p6486_p2 = scmp.lt.s32.totalorder %s6480_s0, %s6480_s0 }
0x27f6   :  { %4832 = vrot.lane.b32.xlu1 %v7635_v8, %s6589_s22 }
0x27f7   :  { %p6487_p3 = por %p6486_p2, %p6485_p1 }
0x27f9   :  { %p6488_p4 = pnand %p6487_p3, %p6481_p0 }
0x2832   :  { %v4842_v33 = vpop.permute.xlu0 %4841 }
0x2833   :  { %4845 = vst.msk [vmem:[#allocation4 - $0x6] sm:$0xc0] %vm4844_vm14, %v4842_v33 }
0x2834   :  { %v4654_v59 = vpop.permute.xlu1 %4653 }
0x2835   :  { %5879 = vmatmul.mubr.msk.f32.vlgmr.msra.gmra.mrb[40].mxu0 %vm286_vm2, %v4654_v59 }
0x2836   :  { %6286 = vmatpush3.bf16.msra.mxu0 %v7017_v57  ;;  %5897 = vmatprep.mubr.msk.f32.mxu0 %vm6575_vm0, %v7874_v19  ;;  %v3705_v57 = vrot.slane %v7481_v13, %v7661_v0  ;;  %v2638_v13 = vpop.permute.xlu0 %2637  ;;  %vm4838_vm0 = vcmask 64568  }
0x2837   :  { %6287 = vmatprep.subr.bf16.mxu0 %v7871_v32 }
0x2838   :  { %v1532_v34 = vpop.permute.xlu1 %1531  ;;  %v3706_v60 = vcombine.high %v3705_v57, %v3705_v57 }
0x2839   :  { %1537 = vst.msk [vmem:[#allocation7 + $0x8] sm:$0xff] %vm1535_vm6, %v1532_v34 }
0x283a   :  { %6289 = vmatpush3.bf16.msra.mxu0 %v7028_v63 }
0x283b   :  { %6290 = vmatprep.subr.bf16.mxu0 %v7871_v32 }
0x283c   :  { %v2087_v8 = vpop.permute.xlu1 %2086 }
0x283d   :  { %2092 = vst.msk [vmem:[#allocation7 + $0x8] sm:$0xff] %vm2090_vm7, %v2087_v8 }
0x283e   :  { %6292 = vmatpush3.bf16.msra.mxu0 %v7042_v2 }
0x283f   :  { %6293 = vmatprep.subr.bf16.mxu0 %v7871_v32 }
0x2840   :  { %v2644_v19 = vpop.permute.xlu1 %2643 }
0x2841   :  { %2649 = vst.msk [vmem:[#allocation7 + $0x8] sm:$0xff] %vm2647_vm8, %v2644_v19 }
0x2842   :  { %6295 = vmatpush3.bf16.msra.mxu0 %v7054_v12 }
0x2844   :  { %v3166_v24 = vpop.permute.xlu1 %3165 }
0x2845   :  { %5898 = vmatmul.mubr.msk.f32.vlgmr.msra.gmra.mrb[42].mxu0 %vm109_vm1, %v7648_v3  ;;  %3168 = vst.msk [vmem:[#allocation2 + $0x2] sm:$0x3] %vm980_vm5, %v3166_v24 }
0x2846   :  { %3708 = vst.msk [vmem:[#allocation2 + $0x2] sm:$0x3] %vm1514_vm9, %v3706_v60 }
0x2847   :  { %4262 = vst.msk [vmem:[#allocation2 + $0x2] sm:$0x3] %vm2069_vm12, %v4260_v51 }
0x2848   :  { %v3173_v63 = vpop.permute.xlu1 %3172 }
0x2849   :  { %3178 = vst.msk [vmem:[#allocation7 + $0x8] sm:$0xff] %vm3176_vm10, %v3173_v63 }
0x284c   :  { %v3719_v2 = vpop.permute.xlu1 %3718 }
0x284d   :  { %3721 = vst.msk [vmem:[#allocation6 + $0x2] sm:$0x3] %vm1514_vm9, %v3719_v2 }
0x2850   :  { %v3725_v32 = vpop.permute.xlu1 %3724 }
0x2851   :  { %3730 = vst.msk [vmem:[#allocation7 + $0x8] sm:$0xff] %vm3728_vm11, %v3725_v32 }
0x2854   :  { %v2081_v12 = vpop.permute.xlu1 %2080 }
0x2855   :  { %2083 = vst.msk [vmem:[#allocation6] sm:$0x3] %vm2069_vm12, %v2081_v12 }
0x2856   :  { %2640 = vst.msk [vmem:[#allocation6] sm:$0x3] %vm2625_vm15, %v2638_v13 }
0x2858   :  { %v4273_v3 = vpop.permute.xlu1 %4272 }
0x2859   :  { %4275 = vst.msk [vmem:[#allocation6 + $0x2] sm:$0x3] %vm2069_vm12, %v4273_v3 }
0x285c   :  { %v4279_v7 = vpop.permute.xlu1 %4278 }
0x285d   :  { %4284 = vst.msk [vmem:[#allocation7 + $0x8] sm:$0xff] %vm4282_vm13, %v4279_v7 }
0x2860   :  { %v2623_v62 = vpop.permute.xlu1 %2622 }
0x2861   :  { %2626 = vst.msk [vmem:[#allocation2] sm:$0x3] %vm2625_vm15, %v2623_v62 }
0x2864   :  { %v4815_v38 = vpop.permute.xlu1 %4814 }
0x2865   :  { %4817 = vst.msk [vmem:[#allocation2 + $0x2] sm:$0x3] %vm2625_vm15, %v4815_v38 }
0x2868   :  { %v4833_v56 = vpop.permute.xlu1 %4832 }
0x2869   :  { %4839 = vst.msk [vmem:[#allocation7] sm:$0xff] %vm4838_vm0, %v4833_v56 }
0x2908   :  { %v4723_v18 = vpop.f32.mrb[40].mxu0 }
0x2909   :  { %v4728_v4 = vrot.slane %v4723_v18, 2  ;;  %v5880_v54 = vpop.f32.mrb[41].mxu0 }
0x290b   :  { %v4730_v61 = vadd.f32 %v6899_v27, %v4728_v4 }
0x2918   :  { %v4797_v49 = vpop.f32.mrb[42].mxu0 }
0x2919   :  { %v4802_v26 = vrot.slane %v4797_v49, 2  ;;  %v5899_v43 = vpop.f32.mrb[43].mxu0 }
0x291a   :  { %6491 = shalt.err (!%p6488_p4)
}
0x291b   :  { %s6492_s6 = scalar_lea.hbm %s7846_s17, 32 }
0x291c   :  { %p6493_p5 = scmp.ne.s32.totalorder %s7846_s17, %s6492_s6  ;;  %p6496_p6 = scmp.lt.u32.totalorder %s6492_s6, %s7846_s17 }
0x291e   :  { %p6498_p7 = pnand %p6496_p6, %p6493_p5 }
0x2920   :  { %6501 = shalt.err (!%p6498_p7)
}
0x2921   :  { %4865 = dma.vmem_to_hbm [thread:$0]  %s4863_s28, 32, %s7846_s17, [#allocation5]   ;;  %v4804_v27 = vadd.f32 %v4802_v26, %v4730_v61 }
0x2922   :  { %s6502_s2 = scalar_lea.vmem %s4853_s15, 64  ;;  %p6507_p9 = scmp.lt.s32.totalorder %s4853_s15, %s4853_s15 }
0x2923   :  { %p6503_p8 = scmp.ne.s32.totalorder %s4853_s15, %s6502_s2  ;;  %p6508_p10 = scmp.lt.s32.totalorder %s6502_s2, %s6502_s2 }
0x2925   :  { %p6509_p11 = por %p6508_p10, %p6507_p9 }
0x2927   :  { %p6510_p12 = pnand %p6509_p11, %p6503_p8 }
0x2929   :  { %6513 = shalt.err (!%p6510_p12)
}
0x292a   :  { %s6514_s29 = scalar_lea.hbm %s7845_s16, 64 }
0x292b   :  { %p6515_p13 = scmp.ne.s32.totalorder %s7845_s16, %s6514_s29  ;;  %p6518_p0 = scmp.lt.u32.totalorder %s6514_s29, %s7845_s16 }
0x292d   :  { %p6520_p1 = pnand %p6518_p0, %p6515_p13 }
0x292f   :  { %6523 = shalt.err (!%p6520_p1)
}
0x2930   :  { %4855 = dma.vmem_to_hbm [thread:$0]  %s4853_s15, 64, %s7845_s16, [#allocation3]   ;;  %v4819_v16 = vcombine.high %v4804_v27, %v4804_v27 }
0x2931   :  { %s6592_s7 = smov [#allocation6]   ;;  %s6593_s10 = smov [#allocation7]  }
0x2932   :  { %v4826_v23 = vrot.slane %v4819_v16, %v7661_v0  ;;  %s4872_s26 = sshll.u32 %s6592_s7, 4  ;;  %s4881_s28 = sshll.u32 %s6593_s10, 4  ;;  %s4873_s26 = int_to_ptr.vmem [resolvable:$true] %s4872_s26  ;;  %s7797_s28 = int_to_ptr.vmem [resolvable:$true] %s4881_s28 }
0x2933   :  { %s6524_s16 = scalar_lea.vmem %s4873_s26, 64  ;;  %p6529_p3 = scmp.lt.s32.totalorder %s4873_s26, %s4873_s26 }
0x2934   :  { %v4827_v50 = vcombine.high %v4826_v23, %v4826_v23  ;;  %p6525_p2 = scmp.ne.s32.totalorder %s4873_s26, %s6524_s16  ;;  %p6530_p4 = scmp.lt.s32.totalorder %s6524_s16, %s6524_s16 }
0x2936   :  { %4828 = vrot.lane.b32.xlu0 %v4827_v50, %s6579_s8  ;;  %p6531_p5 = por %p6530_p4, %p6529_p3 }
0x2938   :  { %p6532_p6 = pnand %p6531_p5, %p6525_p2 }
0x293a   :  { %4834 = vrot.lane.b32.xlu0 %v7633_v48, %s6589_s22 }
0x29a8   :  { %v4829_v46 = vpop.permute.xlu0 %4828 }
0x29a9   :  { %4831 = vst.msk [vmem:[#allocation6 + $0x2] sm:$0x3] %vm2625_vm15, %v4829_v46 }
0x29aa   :  { %6535 = shalt.err (!%p6532_p6)
}
0x29ab   :  { %s6536_s22 = scalar_lea.hbm %s7847_s18, 64 }
0x29ac   :  { %p6537_p7 = scmp.ne.s32.totalorder %s7847_s18, %s6536_s22  ;;  %p6540_p8 = scmp.lt.u32.totalorder %s6536_s22, %s7847_s18 }
0x29ae   :  { %p6542_p9 = pnand %p6540_p8, %p6537_p7 }
0x29b0   :  { %6545 = shalt.err (!%p6542_p9)
}
0x29b1   :  { %4875 = dma.vmem_to_hbm [thread:$0]  %s4873_s26, 64, %s7847_s18, [#allocation5]   ;;  %v4835_v48 = vpop.permute.xlu0 %4834 }
0x29b2   :  { %4840 = vst.msk [vmem:[#allocation7 + $0x8] sm:$0xff] %vm4838_vm0, %v4835_v48  ;;  %s6546_s14 = scalar_lea.vmem %s7797_s28, 256  ;;  %p6551_p11 = scmp.lt.s32.totalorder %s7797_s28, %s7797_s28 }
0x29b3   :  { %p6547_p10 = scmp.ne.s32.totalorder %s7797_s28, %s6546_s14  ;;  %p6552_p12 = scmp.lt.s32.totalorder %s6546_s14, %s6546_s14 }
0x29b5   :  { %p6553_p13 = por %p6552_p12, %p6551_p11 }
0x29b7   :  { %p6554_p0 = pnand %p6553_p13, %p6547_p10 }
0x29b9   :  { %6557 = shalt.err (!%p6554_p0)
}
0x29ba   :  { %s6558_s12 = scalar_lea.hbm %s7848_s19, 256 }
0x29bb   :  { %p6559_p1 = scmp.ne.s32.totalorder %s7848_s19, %s6558_s12  ;;  %p6562_p2 = scmp.lt.u32.totalorder %s6558_s12, %s7848_s19 }
0x29bd   :  { %p6564_p3 = pnand %p6562_p2, %p6559_p1 }
0x29bf   :  { %6567 = shalt.err (!%p6564_p3)
}
0x29c0   :  { %s6594_s24 = smov 128   ;;  %s6595_s29 = smov 8  }
0x29c1   :  { %4887 = dma.vmem_to_hbm [thread:$0]  %s7797_s28, 256, %s7848_s19, [#allocation8], %s6594_s24, %s6594_s24, %s6595_s29  }
0x29c2   :  { %6568 = dma.done.wait [#allocation3], 64  }
0x29c3   :  { %6569 = vsyncadd [#allocation3], 4294967232 }
0x29c4   :  { %6570 = dma.done.wait [#allocation5], 96  }
0x29c5   :  { %6571 = vsyncadd [#allocation5], 4294967200 }
0x29c6   :  { %6572 = dma.done.wait [#allocation8], 256  }
0x29c7   :  { %6573 = vsyncadd [#allocation8], 4294967040 }
0x29c8   :  { %4900 = vsyncpa [#allocation3], 1 }
0x29c9   :  { %4901 = vsyncpa [#allocation5], 1 }
0x29ca   :  { %4902 = vsyncpa [#allocation8], 1 }

</bundles_post_ra>
